<compile_context>
chip_gen: v6e
topology: v6e:2x2x1
jax: 0.10.0
libtpu: 0.0.40
codegen_flags: <defaults>
</compile_context>

<pallas_src>
import jax
import jax.numpy as jnp
from jax.experimental import pallas as pl
from jax.experimental.pallas import tpu as pltpu

# problem sizes (small, consistent with the module's shapes)
BATCH = 8
SEQ = 8
INPUT_SIZE = 16
HIDDEN = 32
OUTPUT_SIZE = 16


def rnn_encdec_kernel(
    x_ref,                      # (SEQ, BATCH, INPUT_SIZE)   time-major input
    wex_ref, weh_ref,           # encoder GRU weights: (3, I, H), (3, H, H)
    bex_ref, beh_ref,           # encoder GRU biases:  (3, 1, H), (3, 1, H)
    wdx_ref, wdh_ref,           # decoder GRU weights: (3, H, H), (3, H, H)
    bdx_ref, bdh_ref,           # decoder GRU biases:  (3, 1, H), (3, 1, H)
    wo_ref, bo_ref,             # output head: (H, O), (1, O)
    out_ref,                    # (SEQ, BATCH, OUTPUT_SIZE)
):
    f32 = jnp.float32
    H = HIDDEN
    B = BATCH

    # ---------------- encoder parameters (gate-major, static indices) ----------
    wex_r, wex_z, wex_n = wex_ref[0], wex_ref[1], wex_ref[2]   # (I, H)
    weh_r, weh_z, weh_n = weh_ref[0], weh_ref[1], weh_ref[2]   # (H, H)
    bex_r, bex_z, bex_n = bex_ref[0], bex_ref[1], bex_ref[2]   # (1, H)
    # hoist recurrent-bias broadcasts once (not once per unrolled step)
    beh_r = jnp.broadcast_to(beh_ref[0], (B, H))
    beh_z = jnp.broadcast_to(beh_ref[1], (B, H))
    beh_n = jnp.broadcast_to(beh_ref[2], (B, H))

    # ---------------- hoisted encoder input projection -------------------------
    # one (SEQ*B, I) x (I, H) matmul per gate, off the recurrent chain
    x_flat = x_ref[...].reshape(SEQ * B, INPUT_SIZE)
    gx_r = (jnp.dot(x_flat, wex_r, preferred_element_type=f32) + bex_r).reshape(SEQ, B, H)
    gx_z = (jnp.dot(x_flat, wex_z, preferred_element_type=f32) + bex_z).reshape(SEQ, B, H)
    gx_n = (jnp.dot(x_flat, wex_n, preferred_element_type=f32) + bex_n).reshape(SEQ, B, H)

    # ---------------- encoder recurrence (fully unrolled) ----------------------
    h = jnp.zeros((B, H), f32)
    enc_outs = []
    for t in range(SEQ):
        gh_r = jnp.dot(h, weh_r, preferred_element_type=f32) + beh_r
        gh_z = jnp.dot(h, weh_z, preferred_element_type=f32) + beh_z
        gh_n = jnp.dot(h, weh_n, preferred_element_type=f32) + beh_n
        r = jax.nn.sigmoid(gx_r[t] + gh_r)
        z = jax.nn.sigmoid(gx_z[t] + gh_z)
        n = jnp.tanh(gx_n[t] + r * gh_n)
        h = (1.0 - z) * n + z * h
        enc_outs.append(h)

    enc_all = jnp.concatenate(enc_outs, axis=0)                # (SEQ*B, H), time-major

    # ---------------- decoder parameters ---------------------------------------
    wdx_r, wdx_z, wdx_n = wdx_ref[0], wdx_ref[1], wdx_ref[2]   # (H, H)
    wdh_r, wdh_z, wdh_n = wdh_ref[0], wdh_ref[1], wdh_ref[2]   # (H, H)
    bdx_r, bdx_z, bdx_n = bdx_ref[0], bdx_ref[1], bdx_ref[2]   # (1, H)
    bdh_r = jnp.broadcast_to(bdh_ref[0], (B, H))
    bdh_z = jnp.broadcast_to(bdh_ref[1], (B, H))
    bdh_n = jnp.broadcast_to(bdh_ref[2], (B, H))

    # ---------------- hoisted decoder input projection -------------------------
    # all encoder outputs exist before the decoder starts -> not on the recurrence
    gdx_r = (jnp.dot(enc_all, wdx_r, preferred_element_type=f32) + bdx_r).reshape(SEQ, B, H)
    gdx_z = (jnp.dot(enc_all, wdx_z, preferred_element_type=f32) + bdx_z).reshape(SEQ, B, H)
    gdx_n = (jnp.dot(enc_all, wdx_n, preferred_element_type=f32) + bdx_n).reshape(SEQ, B, H)

    # ---------------- decoder recurrence, seeded with encoder final state ------
    g = h
    dec_outs = []
    for t in range(SEQ):
        gh_r = jnp.dot(g, wdh_r, preferred_element_type=f32) + bdh_r
        gh_z = jnp.dot(g, wdh_z, preferred_element_type=f32) + bdh_z
        gh_n = jnp.dot(g, wdh_n, preferred_element_type=f32) + bdh_n
        r = jax.nn.sigmoid(gdx_r[t] + gh_r)
        z = jax.nn.sigmoid(gdx_z[t] + gh_z)
        n = jnp.tanh(gdx_n[t] + r * gh_n)
        g = (1.0 - z) * n + z * g
        dec_outs.append(g)

    dec_all = jnp.concatenate(dec_outs, axis=0)                # (SEQ*B, H)

    # ---------------- hoisted output head: one matmul, one store ---------------
    logits = jnp.dot(dec_all, wo_ref[...], preferred_element_type=f32) + bo_ref[...]
    out_ref[...] = logits.reshape(SEQ, B, OUTPUT_SIZE)
    # NOTE: decoder softmax is discarded by Model.forward, so it is not emitted.


def _split_w(w):
    """(D, 3H) fused (r,z,n) -> gate-major (3, D, H)."""
    return jnp.stack(
        [w[:, :HIDDEN], w[:, HIDDEN:2 * HIDDEN], w[:, 2 * HIDDEN:]], axis=0)


def _split_b(b):
    """(1, 3H) fused (r,z,n) -> gate-major (3, 1, H)."""
    return jnp.stack(
        [b[:, :HIDDEN], b[:, HIDDEN:2 * HIDDEN], b[:, 2 * HIDDEN:]], axis=0)


@jax.jit
def rnn_encdec(x, params):
    """x: (batch, seq, input_size) float32 -> logits (batch, seq, output_size)."""
    x_tm = jnp.transpose(x, (1, 0, 2)).astype(jnp.float32)     # time-major

    vmem = pl.BlockSpec(memory_space=pltpu.MemorySpace.VMEM)
    out = pl.pallas_call(
        rnn_encdec_kernel,
        out_shape=jax.ShapeDtypeStruct((SEQ, BATCH, OUTPUT_SIZE), jnp.float32),
        in_specs=[vmem] * 11,                                   # 11 operands
        out_specs=vmem,
    )(
        x_tm,
        _split_w(params["wex"]), _split_w(params["weh"]),
        _split_b(params["bex"]), _split_b(params["beh"]),
        _split_w(params["wdx"]), _split_w(params["wdh"]),
        _split_b(params["bdx"]), _split_b(params["bdh"]),
        params["wo"], params["bo"],
    )
    return jnp.transpose(out, (1, 0, 2))                        # (batch, seq, out)


def make_params(key):
    ks = jax.random.split(key, 11)
    s = 0.1
    return {
        "wex": s * jax.random.normal(ks[0], (INPUT_SIZE, 3 * HIDDEN), jnp.float32),
        "weh": s * jax.random.normal(ks[1], (HIDDEN, 3 * HIDDEN), jnp.float32),
        "bex": s * jax.random.normal(ks[2], (1, 3 * HIDDEN), jnp.float32),
        "beh": s * jax.random.normal(ks[3], (1, 3 * HIDDEN), jnp.float32),
        "wdx": s * jax.random.normal(ks[4], (HIDDEN, 3 * HIDDEN), jnp.float32),
        "wdh": s * jax.random.normal(ks[5], (HIDDEN, 3 * HIDDEN), jnp.float32),
        "bdx": s * jax.random.normal(ks[6], (1, 3 * HIDDEN), jnp.float32),
        "bdh": s * jax.random.normal(ks[7], (1, 3 * HIDDEN), jnp.float32),
        "wo": s * jax.random.normal(ks[8], (HIDDEN, OUTPUT_SIZE), jnp.float32),
        "bo": s * jax.random.normal(ks[9], (1, OUTPUT_SIZE), jnp.float32),
    }


def reference(x, p):
    """Pure-JAX reference (PyTorch GRU convention, fused gate layout)."""
    def gru(x_t, h, wx, wh, bx, bh):
        gx = x_t @ wx + bx
        gh = h @ wh + bh
        r = jax.nn.sigmoid(gx[:, :HIDDEN] + gh[:, :HIDDEN])
        z = jax.nn.sigmoid(gx[:, HIDDEN:2 * HIDDEN] + gh[:, HIDDEN:2 * HIDDEN])
        n = jnp.tanh(gx[:, 2 * HIDDEN:] + r * gh[:, 2 * HIDDEN:])
        return (1.0 - z) * n + z * h

    x_tm = jnp.transpose(x, (1, 0, 2))
    h = jnp.zeros((BATCH, HIDDEN), jnp.float32)
    enc_outs = []
    for t in range(SEQ):
        h = gru(x_tm[t], h, p["wex"], p["weh"], p["bex"], p["beh"])
        enc_outs.append(h)
    g = h
    logits = []
    for t in range(SEQ):
        g = gru(enc_outs[t], g, p["wdx"], p["wdh"], p["bdx"], p["bdh"])
        logits.append(g @ p["wo"] + p["bo"])
    return jnp.transpose(jnp.stack(logits, 0), (1, 0, 2))


if __name__ == "__main__":
    key = jax.random.PRNGKey(0)
    kx, kp = jax.random.split(key)
    x = jax.random.normal(kx, (BATCH, SEQ, INPUT_SIZE), jnp.float32)
    params = make_params(kp)

    out = rnn_encdec(x, params)
    out = jax.block_until_ready(out)

    ref = reference(x, params)
    assert out.shape == (BATCH, SEQ, OUTPUT_SIZE)
    assert jnp.allclose(out, ref, atol=1e-4, rtol=1e-4)
    print("KERNEL_OK")
</pallas_src>

<mosaic_0001>
module attributes {stable_mosaic.version = 11 : i64} {
  func.func @rnn_encdec_kernel(%arg0: memref<8x8x16xf32, #tpu.memory_space<vmem>>, %arg1: memref<3x16x32xf32, #tpu.memory_space<vmem>>, %arg2: memref<3x32x32xf32, #tpu.memory_space<vmem>>, %arg3: memref<3x1x32xf32, #tpu.memory_space<vmem>>, %arg4: memref<3x1x32xf32, #tpu.memory_space<vmem>>, %arg5: memref<3x32x32xf32, #tpu.memory_space<vmem>>, %arg6: memref<3x32x32xf32, #tpu.memory_space<vmem>>, %arg7: memref<3x1x32xf32, #tpu.memory_space<vmem>>, %arg8: memref<3x1x32xf32, #tpu.memory_space<vmem>>, %arg9: memref<32x16xf32, #tpu.memory_space<vmem>>, %arg10: memref<1x16xf32, #tpu.memory_space<vmem>>, %arg11: memref<8x8x16xf32, #tpu.memory_space<vmem>>) attributes {dimension_semantics = [], scalar_prefetch = 0 : i64, scratch_operands = 0 : i64, tpu.core_type = #tpu.core_type<tc>} {
    %c0 = arith.constant 0 : index
    %c0_0 = arith.constant 0 : index
    %c0_1 = arith.constant 0 : index
    %0 = vector.load %arg1[%c0, %c0_0, %c0_1] : memref<3x16x32xf32, #tpu.memory_space<vmem>>, vector<1x16x32xf32>
    %1 = vector.shape_cast %0 : vector<1x16x32xf32> to vector<16x32xf32>
    %c1 = arith.constant 1 : index
    %c0_2 = arith.constant 0 : index
    %c0_3 = arith.constant 0 : index
    %2 = vector.load %arg1[%c1, %c0_2, %c0_3] : memref<3x16x32xf32, #tpu.memory_space<vmem>>, vector<1x16x32xf32>
    %3 = vector.shape_cast %2 : vector<1x16x32xf32> to vector<16x32xf32>
    %c2 = arith.constant 2 : index
    %c0_4 = arith.constant 0 : index
    %c0_5 = arith.constant 0 : index
    %4 = vector.load %arg1[%c2, %c0_4, %c0_5] : memref<3x16x32xf32, #tpu.memory_space<vmem>>, vector<1x16x32xf32>
    %5 = vector.shape_cast %4 : vector<1x16x32xf32> to vector<16x32xf32>
    %c0_6 = arith.constant 0 : index
    %c0_7 = arith.constant 0 : index
    %c0_8 = arith.constant 0 : index
    %6 = vector.load %arg2[%c0_6, %c0_7, %c0_8] : memref<3x32x32xf32, #tpu.memory_space<vmem>>, vector<1x32x32xf32>
    %7 = vector.shape_cast %6 : vector<1x32x32xf32> to vector<32x32xf32>
    %c1_9 = arith.constant 1 : index
    %c0_10 = arith.constant 0 : index
    %c0_11 = arith.constant 0 : index
    %8 = vector.load %arg2[%c1_9, %c0_10, %c0_11] : memref<3x32x32xf32, #tpu.memory_space<vmem>>, vector<1x32x32xf32>
    %9 = vector.shape_cast %8 : vector<1x32x32xf32> to vector<32x32xf32>
    %c2_12 = arith.constant 2 : index
    %c0_13 = arith.constant 0 : index
    %c0_14 = arith.constant 0 : index
    %10 = vector.load %arg2[%c2_12, %c0_13, %c0_14] : memref<3x32x32xf32, #tpu.memory_space<vmem>>, vector<1x32x32xf32>
    %11 = vector.shape_cast %10 : vector<1x32x32xf32> to vector<32x32xf32>
    %c0_15 = arith.constant 0 : index
    %c0_16 = arith.constant 0 : index
    %c0_17 = arith.constant 0 : index
    %12 = vector.load %arg3[%c0_15, %c0_16, %c0_17] : memref<3x1x32xf32, #tpu.memory_space<vmem>>, vector<1x1x32xf32>
    %13 = vector.shape_cast %12 : vector<1x1x32xf32> to vector<1x32xf32>
    %c1_18 = arith.constant 1 : index
    %c0_19 = arith.constant 0 : index
    %c0_20 = arith.constant 0 : index
    %14 = vector.load %arg3[%c1_18, %c0_19, %c0_20] : memref<3x1x32xf32, #tpu.memory_space<vmem>>, vector<1x1x32xf32>
    %15 = vector.shape_cast %14 : vector<1x1x32xf32> to vector<1x32xf32>
    %c2_21 = arith.constant 2 : index
    %c0_22 = arith.constant 0 : index
    %c0_23 = arith.constant 0 : index
    %16 = vector.load %arg3[%c2_21, %c0_22, %c0_23] : memref<3x1x32xf32, #tpu.memory_space<vmem>>, vector<1x1x32xf32>
    %17 = vector.shape_cast %16 : vector<1x1x32xf32> to vector<1x32xf32>
    %c0_24 = arith.constant 0 : index
    %c0_25 = arith.constant 0 : index
    %c0_26 = arith.constant 0 : index
    %18 = vector.load %arg4[%c0_24, %c0_25, %c0_26] : memref<3x1x32xf32, #tpu.memory_space<vmem>>, vector<1x1x32xf32>
    %19 = vector.shape_cast %18 : vector<1x1x32xf32> to vector<1x32xf32>
    %20 = vector.shape_cast %19 : vector<1x32xf32> to vector<1x32xf32>
    %21 = vector.broadcast %20 : vector<1x32xf32> to vector<8x32xf32>
    %c1_27 = arith.constant 1 : index
    %c0_28 = arith.constant 0 : index
    %c0_29 = arith.constant 0 : index
    %22 = vector.load %arg4[%c1_27, %c0_28, %c0_29] : memref<3x1x32xf32, #tpu.memory_space<vmem>>, vector<1x1x32xf32>
    %23 = vector.shape_cast %22 : vector<1x1x32xf32> to vector<1x32xf32>
    %24 = vector.shape_cast %23 : vector<1x32xf32> to vector<1x32xf32>
    %25 = vector.broadcast %24 : vector<1x32xf32> to vector<8x32xf32>
    %c2_30 = arith.constant 2 : index
    %c0_31 = arith.constant 0 : index
    %c0_32 = arith.constant 0 : index
    %26 = vector.load %arg4[%c2_30, %c0_31, %c0_32] : memref<3x1x32xf32, #tpu.memory_space<vmem>>, vector<1x1x32xf32>
    %27 = vector.shape_cast %26 : vector<1x1x32xf32> to vector<1x32xf32>
    %28 = vector.shape_cast %27 : vector<1x32xf32> to vector<1x32xf32>
    %29 = vector.broadcast %28 : vector<1x32xf32> to vector<8x32xf32>
    %c0_33 = arith.constant 0 : index
    %c0_34 = arith.constant 0 : index
    %c0_35 = arith.constant 0 : index
    %30 = vector.load %arg0[%c0_33, %c0_34, %c0_35] : memref<8x8x16xf32, #tpu.memory_space<vmem>>, vector<8x8x16xf32>
    %31 = vector.shape_cast %30 : vector<8x8x16xf32> to vector<64x16xf32>
    %cst = arith.constant dense<0.000000e+00> : vector<64x32xf32>
    %32 = tpu.matmul %31, %1, %cst {dimension_numbers = #tpu.dot_dimension_numbers<[1], [0], [0], [1], [0, 0, 1, 1], [], []>} : vector<64x16xf32>, vector<16x32xf32>, vector<64x32xf32> -> vector<64x32xf32>
    %33 = vector.broadcast %13 : vector<1x32xf32> to vector<64x32xf32>
    %34 = arith.addf %32, %33 : vector<64x32xf32>
    %35 = vector.shape_cast %34 : vector<64x32xf32> to vector<8x8x32xf32>
    %cst_36 = arith.constant dense<0.000000e+00> : vector<64x32xf32>
    %36 = tpu.matmul %31, %3, %cst_36 {dimension_numbers = #tpu.dot_dimension_numbers<[1], [0], [0], [1], [0, 0, 1, 1], [], []>} : vector<64x16xf32>, vector<16x32xf32>, vector<64x32xf32> -> vector<64x32xf32>
    %37 = vector.broadcast %15 : vector<1x32xf32> to vector<64x32xf32>
    %38 = arith.addf %36, %37 : vector<64x32xf32>
    %39 = vector.shape_cast %38 : vector<64x32xf32> to vector<8x8x32xf32>
    %cst_37 = arith.constant dense<0.000000e+00> : vector<64x32xf32>
    %40 = tpu.matmul %31, %5, %cst_37 {dimension_numbers = #tpu.dot_dimension_numbers<[1], [0], [0], [1], [0, 0, 1, 1], [], []>} : vector<64x16xf32>, vector<16x32xf32>, vector<64x32xf32> -> vector<64x32xf32>
    %41 = vector.broadcast %17 : vector<1x32xf32> to vector<64x32xf32>
    %42 = arith.addf %40, %41 : vector<64x32xf32>
    %43 = vector.shape_cast %42 : vector<64x32xf32> to vector<8x8x32xf32>
    %cst_38 = arith.constant 0.000000e+00 : f32
    %44 = vector.broadcast %cst_38 : f32 to vector<8x32xf32>
    %cst_39 = arith.constant dense<0.000000e+00> : vector<8x32xf32>
    %45 = tpu.matmul %44, %7, %cst_39 {dimension_numbers = #tpu.dot_dimension_numbers<[1], [0], [0], [1], [0, 0, 1, 1], [], []>} : vector<8x32xf32>, vector<32x32xf32>, vector<8x32xf32> -> vector<8x32xf32>
    %46 = arith.addf %45, %21 : vector<8x32xf32>
    %cst_40 = arith.constant dense<0.000000e+00> : vector<8x32xf32>
    %47 = tpu.matmul %44, %9, %cst_40 {dimension_numbers = #tpu.dot_dimension_numbers<[1], [0], [0], [1], [0, 0, 1, 1], [], []>} : vector<8x32xf32>, vector<32x32xf32>, vector<8x32xf32> -> vector<8x32xf32>
    %48 = arith.addf %47, %25 : vector<8x32xf32>
    %cst_41 = arith.constant dense<0.000000e+00> : vector<8x32xf32>
    %49 = tpu.matmul %44, %11, %cst_41 {dimension_numbers = #tpu.dot_dimension_numbers<[1], [0], [0], [1], [0, 0, 1, 1], [], []>} : vector<8x32xf32>, vector<32x32xf32>, vector<8x32xf32> -> vector<8x32xf32>
    %50 = arith.addf %49, %29 : vector<8x32xf32>
    %51 = vector.extract_strided_slice %35 {offsets = [0, 0, 0], sizes = [1, 8, 32], strides = [1, 1, 1]} : vector<8x8x32xf32> to vector<1x8x32xf32>
    %52 = vector.shape_cast %51 : vector<1x8x32xf32> to vector<8x32xf32>
    %53 = arith.addf %52, %46 : vector<8x32xf32>
    %54 = arith.negf %53 : vector<8x32xf32>
    %55 = math.exp %54 : vector<8x32xf32>
    %cst_42 = arith.constant 1.000000e+00 : f32
    %56 = vector.broadcast %cst_42 : f32 to vector<8x32xf32>
    %57 = arith.addf %56, %55 : vector<8x32xf32>
    %58 = arith.divf %56, %57 : vector<8x32xf32>
    %59 = vector.extract_strided_slice %39 {offsets = [0, 0, 0], sizes = [1, 8, 32], strides = [1, 1, 1]} : vector<8x8x32xf32> to vector<1x8x32xf32>
    %60 = vector.shape_cast %59 : vector<1x8x32xf32> to vector<8x32xf32>
    %61 = arith.addf %60, %48 : vector<8x32xf32>
    %62 = arith.negf %61 : vector<8x32xf32>
    %63 = math.exp %62 : vector<8x32xf32>
    %cst_43 = arith.constant 1.000000e+00 : f32
    %64 = vector.broadcast %cst_43 : f32 to vector<8x32xf32>
    %65 = arith.addf %64, %63 : vector<8x32xf32>
    %66 = arith.divf %64, %65 : vector<8x32xf32>
    %67 = vector.extract_strided_slice %43 {offsets = [0, 0, 0], sizes = [1, 8, 32], strides = [1, 1, 1]} : vector<8x8x32xf32> to vector<1x8x32xf32>
    %68 = vector.shape_cast %67 : vector<1x8x32xf32> to vector<8x32xf32>
    %69 = arith.mulf %58, %50 : vector<8x32xf32>
    %70 = arith.addf %68, %69 : vector<8x32xf32>
    %71 = math.tanh %70 : vector<8x32xf32>
    %cst_44 = arith.constant 1.000000e+00 : f32
    %72 = vector.broadcast %cst_44 : f32 to vector<8x32xf32>
    %73 = arith.subf %72, %66 : vector<8x32xf32>
    %74 = arith.mulf %73, %71 : vector<8x32xf32>
    %75 = arith.mulf %66, %44 : vector<8x32xf32>
    %76 = arith.addf %74, %75 : vector<8x32xf32>
    %cst_45 = arith.constant dense<0.000000e+00> : vector<8x32xf32>
    %77 = tpu.matmul %76, %7, %cst_45 {dimension_numbers = #tpu.dot_dimension_numbers<[1], [0], [0], [1], [0, 0, 1, 1], [], []>} : vector<8x32xf32>, vector<32x32xf32>, vector<8x32xf32> -> vector<8x32xf32>
    %78 = arith.addf %77, %21 : vector<8x32xf32>
    %cst_46 = arith.constant dense<0.000000e+00> : vector<8x32xf32>
    %79 = tpu.matmul %76, %9, %cst_46 {dimension_numbers = #tpu.dot_dimension_numbers<[1], [0], [0], [1], [0, 0, 1, 1], [], []>} : vector<8x32xf32>, vector<32x32xf32>, vector<8x32xf32> -> vector<8x32xf32>
    %80 = arith.addf %79, %25 : vector<8x32xf32>
    %cst_47 = arith.constant dense<0.000000e+00> : vector<8x32xf32>
    %81 = tpu.matmul %76, %11, %cst_47 {dimension_numbers = #tpu.dot_dimension_numbers<[1], [0], [0], [1], [0, 0, 1, 1], [], []>} : vector<8x32xf32>, vector<32x32xf32>, vector<8x32xf32> -> vector<8x32xf32>
    %82 = arith.addf %81, %29 : vector<8x32xf32>
    %83 = vector.extract_strided_slice %35 {offsets = [1, 0, 0], sizes = [1, 8, 32], strides = [1, 1, 1]} : vector<8x8x32xf32> to vector<1x8x32xf32>
    %84 = vector.shape_cast %83 : vector<1x8x32xf32> to vector<8x32xf32>
    %85 = arith.addf %84, %78 : vector<8x32xf32>
    %86 = arith.negf %85 : vector<8x32xf32>
    %87 = math.exp %86 : vector<8x32xf32>
    %cst_48 = arith.constant 1.000000e+00 : f32
    %88 = vector.broadcast %cst_48 : f32 to vector<8x32xf32>
    %89 = arith.addf %88, %87 : vector<8x32xf32>
    %90 = arith.divf %88, %89 : vector<8x32xf32>
    %91 = vector.extract_strided_slice %39 {offsets = [1, 0, 0], sizes = [1, 8, 32], strides = [1, 1, 1]} : vector<8x8x32xf32> to vector<1x8x32xf32>
    %92 = vector.shape_cast %91 : vector<1x8x32xf32> to vector<8x32xf32>
    %93 = arith.addf %92, %80 : vector<8x32xf32>
    %94 = arith.negf %93 : vector<8x32xf32>
    %95 = math.exp %94 : vector<8x32xf32>
    %cst_49 = arith.constant 1.000000e+00 : f32
    %96 = vector.broadcast %cst_49 : f32 to vector<8x32xf32>
    %97 = arith.addf %96, %95 : vector<8x32xf32>
    %98 = arith.divf %96, %97 : vector<8x32xf32>
    %99 = vector.extract_strided_slice %43 {offsets = [1, 0, 0], sizes = [1, 8, 32], strides = [1, 1, 1]} : vector<8x8x32xf32> to vector<1x8x32xf32>
    %100 = vector.shape_cast %99 : vector<1x8x32xf32> to vector<8x32xf32>
    %101 = arith.mulf %90, %82 : vector<8x32xf32>
    %102 = arith.addf %100, %101 : vector<8x32xf32>
    %103 = math.tanh %102 : vector<8x32xf32>
    %cst_50 = arith.constant 1.000000e+00 : f32
    %104 = vector.broadcast %cst_50 : f32 to vector<8x32xf32>
    %105 = arith.subf %104, %98 : vector<8x32xf32>
    %106 = arith.mulf %105, %103 : vector<8x32xf32>
    %107 = arith.mulf %98, %76 : vector<8x32xf32>
    %108 = arith.addf %106, %107 : vector<8x32xf32>
    %cst_51 = arith.constant dense<0.000000e+00> : vector<8x32xf32>
    %109 = tpu.matmul %108, %7, %cst_51 {dimension_numbers = #tpu.dot_dimension_numbers<[1], [0], [0], [1], [0, 0, 1, 1], [], []>} : vector<8x32xf32>, vector<32x32xf32>, vector<8x32xf32> -> vector<8x32xf32>
    %110 = arith.addf %109, %21 : vector<8x32xf32>
    %cst_52 = arith.constant dense<0.000000e+00> : vector<8x32xf32>
    %111 = tpu.matmul %108, %9, %cst_52 {dimension_numbers = #tpu.dot_dimension_numbers<[1], [0], [0], [1], [0, 0, 1, 1], [], []>} : vector<8x32xf32>, vector<32x32xf32>, vector<8x32xf32> -> vector<8x32xf32>
    %112 = arith.addf %111, %25 : vector<8x32xf32>
    %cst_53 = arith.constant dense<0.000000e+00> : vector<8x32xf32>
    %113 = tpu.matmul %108, %11, %cst_53 {dimension_numbers = #tpu.dot_dimension_numbers<[1], [0], [0], [1], [0, 0, 1, 1], [], []>} : vector<8x32xf32>, vector<32x32xf32>, vector<8x32xf32> -> vector<8x32xf32>
    %114 = arith.addf %113, %29 : vector<8x32xf32>
    %115 = vector.extract_strided_slice %35 {offsets = [2, 0, 0], sizes = [1, 8, 32], strides = [1, 1, 1]} : vector<8x8x32xf32> to vector<1x8x32xf32>
    %116 = vector.shape_cast %115 : vector<1x8x32xf32> to vector<8x32xf32>
    %117 = arith.addf %116, %110 : vector<8x32xf32>
    %118 = arith.negf %117 : vector<8x32xf32>
    %119 = math.exp %118 : vector<8x32xf32>
    %cst_54 = arith.constant 1.000000e+00 : f32
    %120 = vector.broadcast %cst_54 : f32 to vector<8x32xf32>
    %121 = arith.addf %120, %119 : vector<8x32xf32>
    %122 = arith.divf %120, %121 : vector<8x32xf32>
    %123 = vector.extract_strided_slice %39 {offsets = [2, 0, 0], sizes = [1, 8, 32], strides = [1, 1, 1]} : vector<8x8x32xf32> to vector<1x8x32xf32>
    %124 = vector.shape_cast %123 : vector<1x8x32xf32> to vector<8x32xf32>
    %125 = arith.addf %124, %112 : vector<8x32xf32>
    %126 = arith.negf %125 : vector<8x32xf32>
    %127 = math.exp %126 : vector<8x32xf32>
    %cst_55 = arith.constant 1.000000e+00 : f32
    %128 = vector.broadcast %cst_55 : f32 to vector<8x32xf32>
    %129 = arith.addf %128, %127 : vector<8x32xf32>
    %130 = arith.divf %128, %129 : vector<8x32xf32>
    %131 = vector.extract_strided_slice %43 {offsets = [2, 0, 0], sizes = [1, 8, 32], strides = [1, 1, 1]} : vector<8x8x32xf32> to vector<1x8x32xf32>
    %132 = vector.shape_cast %131 : vector<1x8x32xf32> to vector<8x32xf32>
    %133 = arith.mulf %122, %114 : vector<8x32xf32>
    %134 = arith.addf %132, %133 : vector<8x32xf32>
    %135 = math.tanh %134 : vector<8x32xf32>
    %cst_56 = arith.constant 1.000000e+00 : f32
    %136 = vector.broadcast %cst_56 : f32 to vector<8x32xf32>
    %137 = arith.subf %136, %130 : vector<8x32xf32>
    %138 = arith.mulf %137, %135 : vector<8x32xf32>
    %139 = arith.mulf %130, %108 : vector<8x32xf32>
    %140 = arith.addf %138, %139 : vector<8x32xf32>
    %cst_57 = arith.constant dense<0.000000e+00> : vector<8x32xf32>
    %141 = tpu.matmul %140, %7, %cst_57 {dimension_numbers = #tpu.dot_dimension_numbers<[1], [0], [0], [1], [0, 0, 1, 1], [], []>} : vector<8x32xf32>, vector<32x32xf32>, vector<8x32xf32> -> vector<8x32xf32>
    %142 = arith.addf %141, %21 : vector<8x32xf32>
    %cst_58 = arith.constant dense<0.000000e+00> : vector<8x32xf32>
    %143 = tpu.matmul %140, %9, %cst_58 {dimension_numbers = #tpu.dot_dimension_numbers<[1], [0], [0], [1], [0, 0, 1, 1], [], []>} : vector<8x32xf32>, vector<32x32xf32>, vector<8x32xf32> -> vector<8x32xf32>
    %144 = arith.addf %143, %25 : vector<8x32xf32>
    %cst_59 = arith.constant dense<0.000000e+00> : vector<8x32xf32>
    %145 = tpu.matmul %140, %11, %cst_59 {dimension_numbers = #tpu.dot_dimension_numbers<[1], [0], [0], [1], [0, 0, 1, 1], [], []>} : vector<8x32xf32>, vector<32x32xf32>, vector<8x32xf32> -> vector<8x32xf32>
    %146 = arith.addf %145, %29 : vector<8x32xf32>
    %147 = vector.extract_strided_slice %35 {offsets = [3, 0, 0], sizes = [1, 8, 32], strides = [1, 1, 1]} : vector<8x8x32xf32> to vector<1x8x32xf32>
    %148 = vector.shape_cast %147 : vector<1x8x32xf32> to vector<8x32xf32>
    %149 = arith.addf %148, %142 : vector<8x32xf32>
    %150 = arith.negf %149 : vector<8x32xf32>
    %151 = math.exp %150 : vector<8x32xf32>
    %cst_60 = arith.constant 1.000000e+00 : f32
    %152 = vector.broadcast %cst_60 : f32 to vector<8x32xf32>
    %153 = arith.addf %152, %151 : vector<8x32xf32>
    %154 = arith.divf %152, %153 : vector<8x32xf32>
    %155 = vector.extract_strided_slice %39 {offsets = [3, 0, 0], sizes = [1, 8, 32], strides = [1, 1, 1]} : vector<8x8x32xf32> to vector<1x8x32xf32>
    %156 = vector.shape_cast %155 : vector<1x8x32xf32> to vector<8x32xf32>
    %157 = arith.addf %156, %144 : vector<8x32xf32>
    %158 = arith.negf %157 : vector<8x32xf32>
    %159 = math.exp %158 : vector<8x32xf32>
    %cst_61 = arith.constant 1.000000e+00 : f32
    %160 = vector.broadcast %cst_61 : f32 to vector<8x32xf32>
    %161 = arith.addf %160, %159 : vector<8x32xf32>
    %162 = arith.divf %160, %161 : vector<8x32xf32>
    %163 = vector.extract_strided_slice %43 {offsets = [3, 0, 0], sizes = [1, 8, 32], strides = [1, 1, 1]} : vector<8x8x32xf32> to vector<1x8x32xf32>
    %164 = vector.shape_cast %163 : vector<1x8x32xf32> to vector<8x32xf32>
    %165 = arith.mulf %154, %146 : vector<8x32xf32>
    %166 = arith.addf %164, %165 : vector<8x32xf32>
    %167 = math.tanh %166 : vector<8x32xf32>
    %cst_62 = arith.constant 1.000000e+00 : f32
    %168 = vector.broadcast %cst_62 : f32 to vector<8x32xf32>
    %169 = arith.subf %168, %162 : vector<8x32xf32>
    %170 = arith.mulf %169, %167 : vector<8x32xf32>
    %171 = arith.mulf %162, %140 : vector<8x32xf32>
    %172 = arith.addf %170, %171 : vector<8x32xf32>
    %cst_63 = arith.constant dense<0.000000e+00> : vector<8x32xf32>
    %173 = tpu.matmul %172, %7, %cst_63 {dimension_numbers = #tpu.dot_dimension_numbers<[1], [0], [0], [1], [0, 0, 1, 1], [], []>} : vector<8x32xf32>, vector<32x32xf32>, vector<8x32xf32> -> vector<8x32xf32>
    %174 = arith.addf %173, %21 : vector<8x32xf32>
    %cst_64 = arith.constant dense<0.000000e+00> : vector<8x32xf32>
    %175 = tpu.matmul %172, %9, %cst_64 {dimension_numbers = #tpu.dot_dimension_numbers<[1], [0], [0], [1], [0, 0, 1, 1], [], []>} : vector<8x32xf32>, vector<32x32xf32>, vector<8x32xf32> -> vector<8x32xf32>
    %176 = arith.addf %175, %25 : vector<8x32xf32>
    %cst_65 = arith.constant dense<0.000000e+00> : vector<8x32xf32>
    %177 = tpu.matmul %172, %11, %cst_65 {dimension_numbers = #tpu.dot_dimension_numbers<[1], [0], [0], [1], [0, 0, 1, 1], [], []>} : vector<8x32xf32>, vector<32x32xf32>, vector<8x32xf32> -> vector<8x32xf32>
    %178 = arith.addf %177, %29 : vector<8x32xf32>
    %179 = vector.extract_strided_slice %35 {offsets = [4, 0, 0], sizes = [1, 8, 32], strides = [1, 1, 1]} : vector<8x8x32xf32> to vector<1x8x32xf32>
    %180 = vector.shape_cast %179 : vector<1x8x32xf32> to vector<8x32xf32>
    %181 = arith.addf %180, %174 : vector<8x32xf32>
    %182 = arith.negf %181 : vector<8x32xf32>
    %183 = math.exp %182 : vector<8x32xf32>
    %cst_66 = arith.constant 1.000000e+00 : f32
    %184 = vector.broadcast %cst_66 : f32 to vector<8x32xf32>
    %185 = arith.addf %184, %183 : vector<8x32xf32>
    %186 = arith.divf %184, %185 : vector<8x32xf32>
    %187 = vector.extract_strided_slice %39 {offsets = [4, 0, 0], sizes = [1, 8, 32], strides = [1, 1, 1]} : vector<8x8x32xf32> to vector<1x8x32xf32>
    %188 = vector.shape_cast %187 : vector<1x8x32xf32> to vector<8x32xf32>
    %189 = arith.addf %188, %176 : vector<8x32xf32>
    %190 = arith.negf %189 : vector<8x32xf32>
    %191 = math.exp %190 : vector<8x32xf32>
    %cst_67 = arith.constant 1.000000e+00 : f32
    %192 = vector.broadcast %cst_67 : f32 to vector<8x32xf32>
    %193 = arith.addf %192, %191 : vector<8x32xf32>
    %194 = arith.divf %192, %193 : vector<8x32xf32>
    %195 = vector.extract_strided_slice %43 {offsets = [4, 0, 0], sizes = [1, 8, 32], strides = [1, 1, 1]} : vector<8x8x32xf32> to vector<1x8x32xf32>
    %196 = vector.shape_cast %195 : vector<1x8x32xf32> to vector<8x32xf32>
    %197 = arith.mulf %186, %178 : vector<8x32xf32>
    %198 = arith.addf %196, %197 : vector<8x32xf32>
    %199 = math.tanh %198 : vector<8x32xf32>
    %cst_68 = arith.constant 1.000000e+00 : f32
    %200 = vector.broadcast %cst_68 : f32 to vector<8x32xf32>
    %201 = arith.subf %200, %194 : vector<8x32xf32>
    %202 = arith.mulf %201, %199 : vector<8x32xf32>
    %203 = arith.mulf %194, %172 : vector<8x32xf32>
    %204 = arith.addf %202, %203 : vector<8x32xf32>
    %cst_69 = arith.constant dense<0.000000e+00> : vector<8x32xf32>
    %205 = tpu.matmul %204, %7, %cst_69 {dimension_numbers = #tpu.dot_dimension_numbers<[1], [0], [0], [1], [0, 0, 1, 1], [], []>} : vector<8x32xf32>, vector<32x32xf32>, vector<8x32xf32> -> vector<8x32xf32>
    %206 = arith.addf %205, %21 : vector<8x32xf32>
    %cst_70 = arith.constant dense<0.000000e+00> : vector<8x32xf32>
    %207 = tpu.matmul %204, %9, %cst_70 {dimension_numbers = #tpu.dot_dimension_numbers<[1], [0], [0], [1], [0, 0, 1, 1], [], []>} : vector<8x32xf32>, vector<32x32xf32>, vector<8x32xf32> -> vector<8x32xf32>
    %208 = arith.addf %207, %25 : vector<8x32xf32>
    %cst_71 = arith.constant dense<0.000000e+00> : vector<8x32xf32>
    %209 = tpu.matmul %204, %11, %cst_71 {dimension_numbers = #tpu.dot_dimension_numbers<[1], [0], [0], [1], [0, 0, 1, 1], [], []>} : vector<8x32xf32>, vector<32x32xf32>, vector<8x32xf32> -> vector<8x32xf32>
    %210 = arith.addf %209, %29 : vector<8x32xf32>
    %211 = vector.extract_strided_slice %35 {offsets = [5, 0, 0], sizes = [1, 8, 32], strides = [1, 1, 1]} : vector<8x8x32xf32> to vector<1x8x32xf32>
    %212 = vector.shape_cast %211 : vector<1x8x32xf32> to vector<8x32xf32>
    %213 = arith.addf %212, %206 : vector<8x32xf32>
    %214 = arith.negf %213 : vector<8x32xf32>
    %215 = math.exp %214 : vector<8x32xf32>
    %cst_72 = arith.constant 1.000000e+00 : f32
    %216 = vector.broadcast %cst_72 : f32 to vector<8x32xf32>
    %217 = arith.addf %216, %215 : vector<8x32xf32>
    %218 = arith.divf %216, %217 : vector<8x32xf32>
    %219 = vector.extract_strided_slice %39 {offsets = [5, 0, 0], sizes = [1, 8, 32], strides = [1, 1, 1]} : vector<8x8x32xf32> to vector<1x8x32xf32>
    %220 = vector.shape_cast %219 : vector<1x8x32xf32> to vector<8x32xf32>
    %221 = arith.addf %220, %208 : vector<8x32xf32>
    %222 = arith.negf %221 : vector<8x32xf32>
    %223 = math.exp %222 : vector<8x32xf32>
    %cst_73 = arith.constant 1.000000e+00 : f32
    %224 = vector.broadcast %cst_73 : f32 to vector<8x32xf32>
    %225 = arith.addf %224, %223 : vector<8x32xf32>
    %226 = arith.divf %224, %225 : vector<8x32xf32>
    %227 = vector.extract_strided_slice %43 {offsets = [5, 0, 0], sizes = [1, 8, 32], strides = [1, 1, 1]} : vector<8x8x32xf32> to vector<1x8x32xf32>
    %228 = vector.shape_cast %227 : vector<1x8x32xf32> to vector<8x32xf32>
    %229 = arith.mulf %218, %210 : vector<8x32xf32>
    %230 = arith.addf %228, %229 : vector<8x32xf32>
    %231 = math.tanh %230 : vector<8x32xf32>
    %cst_74 = arith.constant 1.000000e+00 : f32
    %232 = vector.broadcast %cst_74 : f32 to vector<8x32xf32>
    %233 = arith.subf %232, %226 : vector<8x32xf32>
    %234 = arith.mulf %233, %231 : vector<8x32xf32>
    %235 = arith.mulf %226, %204 : vector<8x32xf32>
    %236 = arith.addf %234, %235 : vector<8x32xf32>
    %cst_75 = arith.constant dense<0.000000e+00> : vector<8x32xf32>
    %237 = tpu.matmul %236, %7, %cst_75 {dimension_numbers = #tpu.dot_dimension_numbers<[1], [0], [0], [1], [0, 0, 1, 1], [], []>} : vector<8x32xf32>, vector<32x32xf32>, vector<8x32xf32> -> vector<8x32xf32>
    %238 = arith.addf %237, %21 : vector<8x32xf32>
    %cst_76 = arith.constant dense<0.000000e+00> : vector<8x32xf32>
    %239 = tpu.matmul %236, %9, %cst_76 {dimension_numbers = #tpu.dot_dimension_numbers<[1], [0], [0], [1], [0, 0, 1, 1], [], []>} : vector<8x32xf32>, vector<32x32xf32>, vector<8x32xf32> -> vector<8x32xf32>
    %240 = arith.addf %239, %25 : vector<8x32xf32>
    %cst_77 = arith.constant dense<0.000000e+00> : vector<8x32xf32>
    %241 = tpu.matmul %236, %11, %cst_77 {dimension_numbers = #tpu.dot_dimension_numbers<[1], [0], [0], [1], [0, 0, 1, 1], [], []>} : vector<8x32xf32>, vector<32x32xf32>, vector<8x32xf32> -> vector<8x32xf32>
    %242 = arith.addf %241, %29 : vector<8x32xf32>
    %243 = vector.extract_strided_slice %35 {offsets = [6, 0, 0], sizes = [1, 8, 32], strides = [1, 1, 1]} : vector<8x8x32xf32> to vector<1x8x32xf32>
    %244 = vector.shape_cast %243 : vector<1x8x32xf32> to vector<8x32xf32>
    %245 = arith.addf %244, %238 : vector<8x32xf32>
    %246 = arith.negf %245 : vector<8x32xf32>
    %247 = math.exp %246 : vector<8x32xf32>
    %cst_78 = arith.constant 1.000000e+00 : f32
    %248 = vector.broadcast %cst_78 : f32 to vector<8x32xf32>
    %249 = arith.addf %248, %247 : vector<8x32xf32>
    %250 = arith.divf %248, %249 : vector<8x32xf32>
    %251 = vector.extract_strided_slice %39 {offsets = [6, 0, 0], sizes = [1, 8, 32], strides = [1, 1, 1]} : vector<8x8x32xf32> to vector<1x8x32xf32>
    %252 = vector.shape_cast %251 : vector<1x8x32xf32> to vector<8x32xf32>
    %253 = arith.addf %252, %240 : vector<8x32xf32>
    %254 = arith.negf %253 : vector<8x32xf32>
    %255 = math.exp %254 : vector<8x32xf32>
    %cst_79 = arith.constant 1.000000e+00 : f32
    %256 = vector.broadcast %cst_79 : f32 to vector<8x32xf32>
    %257 = arith.addf %256, %255 : vector<8x32xf32>
    %258 = arith.divf %256, %257 : vector<8x32xf32>
    %259 = vector.extract_strided_slice %43 {offsets = [6, 0, 0], sizes = [1, 8, 32], strides = [1, 1, 1]} : vector<8x8x32xf32> to vector<1x8x32xf32>
    %260 = vector.shape_cast %259 : vector<1x8x32xf32> to vector<8x32xf32>
    %261 = arith.mulf %250, %242 : vector<8x32xf32>
    %262 = arith.addf %260, %261 : vector<8x32xf32>
    %263 = math.tanh %262 : vector<8x32xf32>
    %cst_80 = arith.constant 1.000000e+00 : f32
    %264 = vector.broadcast %cst_80 : f32 to vector<8x32xf32>
    %265 = arith.subf %264, %258 : vector<8x32xf32>
    %266 = arith.mulf %265, %263 : vector<8x32xf32>
    %267 = arith.mulf %258, %236 : vector<8x32xf32>
    %268 = arith.addf %266, %267 : vector<8x32xf32>
    %cst_81 = arith.constant dense<0.000000e+00> : vector<8x32xf32>
    %269 = tpu.matmul %268, %7, %cst_81 {dimension_numbers = #tpu.dot_dimension_numbers<[1], [0], [0], [1], [0, 0, 1, 1], [], []>} : vector<8x32xf32>, vector<32x32xf32>, vector<8x32xf32> -> vector<8x32xf32>
    %270 = arith.addf %269, %21 : vector<8x32xf32>
    %cst_82 = arith.constant dense<0.000000e+00> : vector<8x32xf32>
    %271 = tpu.matmul %268, %9, %cst_82 {dimension_numbers = #tpu.dot_dimension_numbers<[1], [0], [0], [1], [0, 0, 1, 1], [], []>} : vector<8x32xf32>, vector<32x32xf32>, vector<8x32xf32> -> vector<8x32xf32>
    %272 = arith.addf %271, %25 : vector<8x32xf32>
    %cst_83 = arith.constant dense<0.000000e+00> : vector<8x32xf32>
    %273 = tpu.matmul %268, %11, %cst_83 {dimension_numbers = #tpu.dot_dimension_numbers<[1], [0], [0], [1], [0, 0, 1, 1], [], []>} : vector<8x32xf32>, vector<32x32xf32>, vector<8x32xf32> -> vector<8x32xf32>
    %274 = arith.addf %273, %29 : vector<8x32xf32>
    %275 = vector.extract_strided_slice %35 {offsets = [7, 0, 0], sizes = [1, 8, 32], strides = [1, 1, 1]} : vector<8x8x32xf32> to vector<1x8x32xf32>
    %276 = vector.shape_cast %275 : vector<1x8x32xf32> to vector<8x32xf32>
    %277 = arith.addf %276, %270 : vector<8x32xf32>
    %278 = arith.negf %277 : vector<8x32xf32>
    %279 = math.exp %278 : vector<8x32xf32>
    %cst_84 = arith.constant 1.000000e+00 : f32
    %280 = vector.broadcast %cst_84 : f32 to vector<8x32xf32>
    %281 = arith.addf %280, %279 : vector<8x32xf32>
    %282 = arith.divf %280, %281 : vector<8x32xf32>
    %283 = vector.extract_strided_slice %39 {offsets = [7, 0, 0], sizes = [1, 8, 32], strides = [1, 1, 1]} : vector<8x8x32xf32> to vector<1x8x32xf32>
    %284 = vector.shape_cast %283 : vector<1x8x32xf32> to vector<8x32xf32>
    %285 = arith.addf %284, %272 : vector<8x32xf32>
    %286 = arith.negf %285 : vector<8x32xf32>
    %287 = math.exp %286 : vector<8x32xf32>
    %cst_85 = arith.constant 1.000000e+00 : f32
    %288 = vector.broadcast %cst_85 : f32 to vector<8x32xf32>
    %289 = arith.addf %288, %287 : vector<8x32xf32>
    %290 = arith.divf %288, %289 : vector<8x32xf32>
    %291 = vector.extract_strided_slice %43 {offsets = [7, 0, 0], sizes = [1, 8, 32], strides = [1, 1, 1]} : vector<8x8x32xf32> to vector<1x8x32xf32>
    %292 = vector.shape_cast %291 : vector<1x8x32xf32> to vector<8x32xf32>
    %293 = arith.mulf %282, %274 : vector<8x32xf32>
    %294 = arith.addf %292, %293 : vector<8x32xf32>
    %295 = math.tanh %294 : vector<8x32xf32>
    %cst_86 = arith.constant 1.000000e+00 : f32
    %296 = vector.broadcast %cst_86 : f32 to vector<8x32xf32>
    %297 = arith.subf %296, %290 : vector<8x32xf32>
    %298 = arith.mulf %297, %295 : vector<8x32xf32>
    %299 = arith.mulf %290, %268 : vector<8x32xf32>
    %300 = arith.addf %298, %299 : vector<8x32xf32>
    %301 = tpu.concatenate %76, %108, %140, %172, %204, %236, %268, %300 in 0 : vector<8x32xf32>, vector<8x32xf32>, vector<8x32xf32>, vector<8x32xf32>, vector<8x32xf32>, vector<8x32xf32>, vector<8x32xf32>, vector<8x32xf32> -> vector<64x32xf32>
    %c0_87 = arith.constant 0 : index
    %c0_88 = arith.constant 0 : index
    %c0_89 = arith.constant 0 : index
    %302 = vector.load %arg5[%c0_87, %c0_88, %c0_89] : memref<3x32x32xf32, #tpu.memory_space<vmem>>, vector<1x32x32xf32>
    %303 = vector.shape_cast %302 : vector<1x32x32xf32> to vector<32x32xf32>
    %c1_90 = arith.constant 1 : index
    %c0_91 = arith.constant 0 : index
    %c0_92 = arith.constant 0 : index
    %304 = vector.load %arg5[%c1_90, %c0_91, %c0_92] : memref<3x32x32xf32, #tpu.memory_space<vmem>>, vector<1x32x32xf32>
    %305 = vector.shape_cast %304 : vector<1x32x32xf32> to vector<32x32xf32>
    %c2_93 = arith.constant 2 : index
    %c0_94 = arith.constant 0 : index
    %c0_95 = arith.constant 0 : index
    %306 = vector.load %arg5[%c2_93, %c0_94, %c0_95] : memref<3x32x32xf32, #tpu.memory_space<vmem>>, vector<1x32x32xf32>
    %307 = vector.shape_cast %306 : vector<1x32x32xf32> to vector<32x32xf32>
    %c0_96 = arith.constant 0 : index
    %c0_97 = arith.constant 0 : index
    %c0_98 = arith.constant 0 : index
    %308 = vector.load %arg6[%c0_96, %c0_97, %c0_98] : memref<3x32x32xf32, #tpu.memory_space<vmem>>, vector<1x32x32xf32>
    %309 = vector.shape_cast %308 : vector<1x32x32xf32> to vector<32x32xf32>
    %c1_99 = arith.constant 1 : index
    %c0_100 = arith.constant 0 : index
    %c0_101 = arith.constant 0 : index
    %310 = vector.load %arg6[%c1_99, %c0_100, %c0_101] : memref<3x32x32xf32, #tpu.memory_space<vmem>>, vector<1x32x32xf32>
    %311 = vector.shape_cast %310 : vector<1x32x32xf32> to vector<32x32xf32>
    %c2_102 = arith.constant 2 : index
    %c0_103 = arith.constant 0 : index
    %c0_104 = arith.constant 0 : index
    %312 = vector.load %arg6[%c2_102, %c0_103, %c0_104] : memref<3x32x32xf32, #tpu.memory_space<vmem>>, vector<1x32x32xf32>
    %313 = vector.shape_cast %312 : vector<1x32x32xf32> to vector<32x32xf32>
    %c0_105 = arith.constant 0 : index
    %c0_106 = arith.constant 0 : index
    %c0_107 = arith.constant 0 : index
    %314 = vector.load %arg7[%c0_105, %c0_106, %c0_107] : memref<3x1x32xf32, #tpu.memory_space<vmem>>, vector<1x1x32xf32>
    %315 = vector.shape_cast %314 : vector<1x1x32xf32> to vector<1x32xf32>
    %c1_108 = arith.constant 1 : index
    %c0_109 = arith.constant 0 : index
    %c0_110 = arith.constant 0 : index
    %316 = vector.load %arg7[%c1_108, %c0_109, %c0_110] : memref<3x1x32xf32, #tpu.memory_space<vmem>>, vector<1x1x32xf32>
    %317 = vector.shape_cast %316 : vector<1x1x32xf32> to vector<1x32xf32>
    %c2_111 = arith.constant 2 : index
    %c0_112 = arith.constant 0 : index
    %c0_113 = arith.constant 0 : index
    %318 = vector.load %arg7[%c2_111, %c0_112, %c0_113] : memref<3x1x32xf32, #tpu.memory_space<vmem>>, vector<1x1x32xf32>
    %319 = vector.shape_cast %318 : vector<1x1x32xf32> to vector<1x32xf32>
    %c0_114 = arith.constant 0 : index
    %c0_115 = arith.constant 0 : index
    %c0_116 = arith.constant 0 : index
    %320 = vector.load %arg8[%c0_114, %c0_115, %c0_116] : memref<3x1x32xf32, #tpu.memory_space<vmem>>, vector<1x1x32xf32>
    %321 = vector.shape_cast %320 : vector<1x1x32xf32> to vector<1x32xf32>
    %322 = vector.shape_cast %321 : vector<1x32xf32> to vector<1x32xf32>
    %323 = vector.broadcast %322 : vector<1x32xf32> to vector<8x32xf32>
    %c1_117 = arith.constant 1 : index
    %c0_118 = arith.constant 0 : index
    %c0_119 = arith.constant 0 : index
    %324 = vector.load %arg8[%c1_117, %c0_118, %c0_119] : memref<3x1x32xf32, #tpu.memory_space<vmem>>, vector<1x1x32xf32>
    %325 = vector.shape_cast %324 : vector<1x1x32xf32> to vector<1x32xf32>
    %326 = vector.shape_cast %325 : vector<1x32xf32> to vector<1x32xf32>
    %327 = vector.broadcast %326 : vector<1x32xf32> to vector<8x32xf32>
    %c2_120 = arith.constant 2 : index
    %c0_121 = arith.constant 0 : index
    %c0_122 = arith.constant 0 : index
    %328 = vector.load %arg8[%c2_120, %c0_121, %c0_122] : memref<3x1x32xf32, #tpu.memory_space<vmem>>, vector<1x1x32xf32>
    %329 = vector.shape_cast %328 : vector<1x1x32xf32> to vector<1x32xf32>
    %330 = vector.shape_cast %329 : vector<1x32xf32> to vector<1x32xf32>
    %331 = vector.broadcast %330 : vector<1x32xf32> to vector<8x32xf32>
    %cst_123 = arith.constant dense<0.000000e+00> : vector<64x32xf32>
    %332 = tpu.matmul %301, %303, %cst_123 {dimension_numbers = #tpu.dot_dimension_numbers<[1], [0], [0], [1], [0, 0, 1, 1], [], []>} : vector<64x32xf32>, vector<32x32xf32>, vector<64x32xf32> -> vector<64x32xf32>
    %333 = vector.broadcast %315 : vector<1x32xf32> to vector<64x32xf32>
    %334 = arith.addf %332, %333 : vector<64x32xf32>
    %335 = vector.shape_cast %334 : vector<64x32xf32> to vector<8x8x32xf32>
    %cst_124 = arith.constant dense<0.000000e+00> : vector<64x32xf32>
    %336 = tpu.matmul %301, %305, %cst_124 {dimension_numbers = #tpu.dot_dimension_numbers<[1], [0], [0], [1], [0, 0, 1, 1], [], []>} : vector<64x32xf32>, vector<32x32xf32>, vector<64x32xf32> -> vector<64x32xf32>
    %337 = vector.broadcast %317 : vector<1x32xf32> to vector<64x32xf32>
    %338 = arith.addf %336, %337 : vector<64x32xf32>
    %339 = vector.shape_cast %338 : vector<64x32xf32> to vector<8x8x32xf32>
    %cst_125 = arith.constant dense<0.000000e+00> : vector<64x32xf32>
    %340 = tpu.matmul %301, %307, %cst_125 {dimension_numbers = #tpu.dot_dimension_numbers<[1], [0], [0], [1], [0, 0, 1, 1], [], []>} : vector<64x32xf32>, vector<32x32xf32>, vector<64x32xf32> -> vector<64x32xf32>
    %341 = vector.broadcast %319 : vector<1x32xf32> to vector<64x32xf32>
    %342 = arith.addf %340, %341 : vector<64x32xf32>
    %343 = vector.shape_cast %342 : vector<64x32xf32> to vector<8x8x32xf32>
    %cst_126 = arith.constant dense<0.000000e+00> : vector<8x32xf32>
    %344 = tpu.matmul %300, %309, %cst_126 {dimension_numbers = #tpu.dot_dimension_numbers<[1], [0], [0], [1], [0, 0, 1, 1], [], []>} : vector<8x32xf32>, vector<32x32xf32>, vector<8x32xf32> -> vector<8x32xf32>
    %345 = arith.addf %344, %323 : vector<8x32xf32>
    %cst_127 = arith.constant dense<0.000000e+00> : vector<8x32xf32>
    %346 = tpu.matmul %300, %311, %cst_127 {dimension_numbers = #tpu.dot_dimension_numbers<[1], [0], [0], [1], [0, 0, 1, 1], [], []>} : vector<8x32xf32>, vector<32x32xf32>, vector<8x32xf32> -> vector<8x32xf32>
    %347 = arith.addf %346, %327 : vector<8x32xf32>
    %cst_128 = arith.constant dense<0.000000e+00> : vector<8x32xf32>
    %348 = tpu.matmul %300, %313, %cst_128 {dimension_numbers = #tpu.dot_dimension_numbers<[1], [0], [0], [1], [0, 0, 1, 1], [], []>} : vector<8x32xf32>, vector<32x32xf32>, vector<8x32xf32> -> vector<8x32xf32>
    %349 = arith.addf %348, %331 : vector<8x32xf32>
    %350 = vector.extract_strided_slice %335 {offsets = [0, 0, 0], sizes = [1, 8, 32], strides = [1, 1, 1]} : vector<8x8x32xf32> to vector<1x8x32xf32>
    %351 = vector.shape_cast %350 : vector<1x8x32xf32> to vector<8x32xf32>
    %352 = arith.addf %351, %345 : vector<8x32xf32>
    %353 = arith.negf %352 : vector<8x32xf32>
    %354 = math.exp %353 : vector<8x32xf32>
    %cst_129 = arith.constant 1.000000e+00 : f32
    %355 = vector.broadcast %cst_129 : f32 to vector<8x32xf32>
    %356 = arith.addf %355, %354 : vector<8x32xf32>
    %357 = arith.divf %355, %356 : vector<8x32xf32>
    %358 = vector.extract_strided_slice %339 {offsets = [0, 0, 0], sizes = [1, 8, 32], strides = [1, 1, 1]} : vector<8x8x32xf32> to vector<1x8x32xf32>
    %359 = vector.shape_cast %358 : vector<1x8x32xf32> to vector<8x32xf32>
    %360 = arith.addf %359, %347 : vector<8x32xf32>
    %361 = arith.negf %360 : vector<8x32xf32>
    %362 = math.exp %361 : vector<8x32xf32>
    %cst_130 = arith.constant 1.000000e+00 : f32
    %363 = vector.broadcast %cst_130 : f32 to vector<8x32xf32>
    %364 = arith.addf %363, %362 : vector<8x32xf32>
    %365 = arith.divf %363, %364 : vector<8x32xf32>
    %366 = vector.extract_strided_slice %343 {offsets = [0, 0, 0], sizes = [1, 8, 32], strides = [1, 1, 1]} : vector<8x8x32xf32> to vector<1x8x32xf32>
    %367 = vector.shape_cast %366 : vector<1x8x32xf32> to vector<8x32xf32>
    %368 = arith.mulf %357, %349 : vector<8x32xf32>
    %369 = arith.addf %367, %368 : vector<8x32xf32>
    %370 = math.tanh %369 : vector<8x32xf32>
    %cst_131 = arith.constant 1.000000e+00 : f32
    %371 = vector.broadcast %cst_131 : f32 to vector<8x32xf32>
    %372 = arith.subf %371, %365 : vector<8x32xf32>
    %373 = arith.mulf %372, %370 : vector<8x32xf32>
    %374 = arith.mulf %365, %300 : vector<8x32xf32>
    %375 = arith.addf %373, %374 : vector<8x32xf32>
    %cst_132 = arith.constant dense<0.000000e+00> : vector<8x32xf32>
    %376 = tpu.matmul %375, %309, %cst_132 {dimension_numbers = #tpu.dot_dimension_numbers<[1], [0], [0], [1], [0, 0, 1, 1], [], []>} : vector<8x32xf32>, vector<32x32xf32>, vector<8x32xf32> -> vector<8x32xf32>
    %377 = arith.addf %376, %323 : vector<8x32xf32>
    %cst_133 = arith.constant dense<0.000000e+00> : vector<8x32xf32>
    %378 = tpu.matmul %375, %311, %cst_133 {dimension_numbers = #tpu.dot_dimension_numbers<[1], [0], [0], [1], [0, 0, 1, 1], [], []>} : vector<8x32xf32>, vector<32x32xf32>, vector<8x32xf32> -> vector<8x32xf32>
    %379 = arith.addf %378, %327 : vector<8x32xf32>
    %cst_134 = arith.constant dense<0.000000e+00> : vector<8x32xf32>
    %380 = tpu.matmul %375, %313, %cst_134 {dimension_numbers = #tpu.dot_dimension_numbers<[1], [0], [0], [1], [0, 0, 1, 1], [], []>} : vector<8x32xf32>, vector<32x32xf32>, vector<8x32xf32> -> vector<8x32xf32>
    %381 = arith.addf %380, %331 : vector<8x32xf32>
    %382 = vector.extract_strided_slice %335 {offsets = [1, 0, 0], sizes = [1, 8, 32], strides = [1, 1, 1]} : vector<8x8x32xf32> to vector<1x8x32xf32>
    %383 = vector.shape_cast %382 : vector<1x8x32xf32> to vector<8x32xf32>
    %384 = arith.addf %383, %377 : vector<8x32xf32>
    %385 = arith.negf %384 : vector<8x32xf32>
    %386 = math.exp %385 : vector<8x32xf32>
    %cst_135 = arith.constant 1.000000e+00 : f32
    %387 = vector.broadcast %cst_135 : f32 to vector<8x32xf32>
    %388 = arith.addf %387, %386 : vector<8x32xf32>
    %389 = arith.divf %387, %388 : vector<8x32xf32>
    %390 = vector.extract_strided_slice %339 {offsets = [1, 0, 0], sizes = [1, 8, 32], strides = [1, 1, 1]} : vector<8x8x32xf32> to vector<1x8x32xf32>
    %391 = vector.shape_cast %390 : vector<1x8x32xf32> to vector<8x32xf32>
    %392 = arith.addf %391, %379 : vector<8x32xf32>
    %393 = arith.negf %392 : vector<8x32xf32>
    %394 = math.exp %393 : vector<8x32xf32>
    %cst_136 = arith.constant 1.000000e+00 : f32
    %395 = vector.broadcast %cst_136 : f32 to vector<8x32xf32>
    %396 = arith.addf %395, %394 : vector<8x32xf32>
    %397 = arith.divf %395, %396 : vector<8x32xf32>
    %398 = vector.extract_strided_slice %343 {offsets = [1, 0, 0], sizes = [1, 8, 32], strides = [1, 1, 1]} : vector<8x8x32xf32> to vector<1x8x32xf32>
    %399 = vector.shape_cast %398 : vector<1x8x32xf32> to vector<8x32xf32>
    %400 = arith.mulf %389, %381 : vector<8x32xf32>
    %401 = arith.addf %399, %400 : vector<8x32xf32>
    %402 = math.tanh %401 : vector<8x32xf32>
    %cst_137 = arith.constant 1.000000e+00 : f32
    %403 = vector.broadcast %cst_137 : f32 to vector<8x32xf32>
    %404 = arith.subf %403, %397 : vector<8x32xf32>
    %405 = arith.mulf %404, %402 : vector<8x32xf32>
    %406 = arith.mulf %397, %375 : vector<8x32xf32>
    %407 = arith.addf %405, %406 : vector<8x32xf32>
    %cst_138 = arith.constant dense<0.000000e+00> : vector<8x32xf32>
    %408 = tpu.matmul %407, %309, %cst_138 {dimension_numbers = #tpu.dot_dimension_numbers<[1], [0], [0], [1], [0, 0, 1, 1], [], []>} : vector<8x32xf32>, vector<32x32xf32>, vector<8x32xf32> -> vector<8x32xf32>
    %409 = arith.addf %408, %323 : vector<8x32xf32>
    %cst_139 = arith.constant dense<0.000000e+00> : vector<8x32xf32>
    %410 = tpu.matmul %407, %311, %cst_139 {dimension_numbers = #tpu.dot_dimension_numbers<[1], [0], [0], [1], [0, 0, 1, 1], [], []>} : vector<8x32xf32>, vector<32x32xf32>, vector<8x32xf32> -> vector<8x32xf32>
    %411 = arith.addf %410, %327 : vector<8x32xf32>
    %cst_140 = arith.constant dense<0.000000e+00> : vector<8x32xf32>
    %412 = tpu.matmul %407, %313, %cst_140 {dimension_numbers = #tpu.dot_dimension_numbers<[1], [0], [0], [1], [0, 0, 1, 1], [], []>} : vector<8x32xf32>, vector<32x32xf32>, vector<8x32xf32> -> vector<8x32xf32>
    %413 = arith.addf %412, %331 : vector<8x32xf32>
    %414 = vector.extract_strided_slice %335 {offsets = [2, 0, 0], sizes = [1, 8, 32], strides = [1, 1, 1]} : vector<8x8x32xf32> to vector<1x8x32xf32>
    %415 = vector.shape_cast %414 : vector<1x8x32xf32> to vector<8x32xf32>
    %416 = arith.addf %415, %409 : vector<8x32xf32>
    %417 = arith.negf %416 : vector<8x32xf32>
    %418 = math.exp %417 : vector<8x32xf32>
    %cst_141 = arith.constant 1.000000e+00 : f32
    %419 = vector.broadcast %cst_141 : f32 to vector<8x32xf32>
    %420 = arith.addf %419, %418 : vector<8x32xf32>
    %421 = arith.divf %419, %420 : vector<8x32xf32>
    %422 = vector.extract_strided_slice %339 {offsets = [2, 0, 0], sizes = [1, 8, 32], strides = [1, 1, 1]} : vector<8x8x32xf32> to vector<1x8x32xf32>
    %423 = vector.shape_cast %422 : vector<1x8x32xf32> to vector<8x32xf32>
    %424 = arith.addf %423, %411 : vector<8x32xf32>
    %425 = arith.negf %424 : vector<8x32xf32>
    %426 = math.exp %425 : vector<8x32xf32>
    %cst_142 = arith.constant 1.000000e+00 : f32
    %427 = vector.broadcast %cst_142 : f32 to vector<8x32xf32>
    %428 = arith.addf %427, %426 : vector<8x32xf32>
    %429 = arith.divf %427, %428 : vector<8x32xf32>
    %430 = vector.extract_strided_slice %343 {offsets = [2, 0, 0], sizes = [1, 8, 32], strides = [1, 1, 1]} : vector<8x8x32xf32> to vector<1x8x32xf32>
    %431 = vector.shape_cast %430 : vector<1x8x32xf32> to vector<8x32xf32>
    %432 = arith.mulf %421, %413 : vector<8x32xf32>
    %433 = arith.addf %431, %432 : vector<8x32xf32>
    %434 = math.tanh %433 : vector<8x32xf32>
    %cst_143 = arith.constant 1.000000e+00 : f32
    %435 = vector.broadcast %cst_143 : f32 to vector<8x32xf32>
    %436 = arith.subf %435, %429 : vector<8x32xf32>
    %437 = arith.mulf %436, %434 : vector<8x32xf32>
    %438 = arith.mulf %429, %407 : vector<8x32xf32>
    %439 = arith.addf %437, %438 : vector<8x32xf32>
    %cst_144 = arith.constant dense<0.000000e+00> : vector<8x32xf32>
    %440 = tpu.matmul %439, %309, %cst_144 {dimension_numbers = #tpu.dot_dimension_numbers<[1], [0], [0], [1], [0, 0, 1, 1], [], []>} : vector<8x32xf32>, vector<32x32xf32>, vector<8x32xf32> -> vector<8x32xf32>
    %441 = arith.addf %440, %323 : vector<8x32xf32>
    %cst_145 = arith.constant dense<0.000000e+00> : vector<8x32xf32>
    %442 = tpu.matmul %439, %311, %cst_145 {dimension_numbers = #tpu.dot_dimension_numbers<[1], [0], [0], [1], [0, 0, 1, 1], [], []>} : vector<8x32xf32>, vector<32x32xf32>, vector<8x32xf32> -> vector<8x32xf32>
    %443 = arith.addf %442, %327 : vector<8x32xf32>
    %cst_146 = arith.constant dense<0.000000e+00> : vector<8x32xf32>
    %444 = tpu.matmul %439, %313, %cst_146 {dimension_numbers = #tpu.dot_dimension_numbers<[1], [0], [0], [1], [0, 0, 1, 1], [], []>} : vector<8x32xf32>, vector<32x32xf32>, vector<8x32xf32> -> vector<8x32xf32>
    %445 = arith.addf %444, %331 : vector<8x32xf32>
    %446 = vector.extract_strided_slice %335 {offsets = [3, 0, 0], sizes = [1, 8, 32], strides = [1, 1, 1]} : vector<8x8x32xf32> to vector<1x8x32xf32>
    %447 = vector.shape_cast %446 : vector<1x8x32xf32> to vector<8x32xf32>
    %448 = arith.addf %447, %441 : vector<8x32xf32>
    %449 = arith.negf %448 : vector<8x32xf32>
    %450 = math.exp %449 : vector<8x32xf32>
    %cst_147 = arith.constant 1.000000e+00 : f32
    %451 = vector.broadcast %cst_147 : f32 to vector<8x32xf32>
    %452 = arith.addf %451, %450 : vector<8x32xf32>
    %453 = arith.divf %451, %452 : vector<8x32xf32>
    %454 = vector.extract_strided_slice %339 {offsets = [3, 0, 0], sizes = [1, 8, 32], strides = [1, 1, 1]} : vector<8x8x32xf32> to vector<1x8x32xf32>
    %455 = vector.shape_cast %454 : vector<1x8x32xf32> to vector<8x32xf32>
    %456 = arith.addf %455, %443 : vector<8x32xf32>
    %457 = arith.negf %456 : vector<8x32xf32>
    %458 = math.exp %457 : vector<8x32xf32>
    %cst_148 = arith.constant 1.000000e+00 : f32
    %459 = vector.broadcast %cst_148 : f32 to vector<8x32xf32>
    %460 = arith.addf %459, %458 : vector<8x32xf32>
    %461 = arith.divf %459, %460 : vector<8x32xf32>
    %462 = vector.extract_strided_slice %343 {offsets = [3, 0, 0], sizes = [1, 8, 32], strides = [1, 1, 1]} : vector<8x8x32xf32> to vector<1x8x32xf32>
    %463 = vector.shape_cast %462 : vector<1x8x32xf32> to vector<8x32xf32>
    %464 = arith.mulf %453, %445 : vector<8x32xf32>
    %465 = arith.addf %463, %464 : vector<8x32xf32>
    %466 = math.tanh %465 : vector<8x32xf32>
    %cst_149 = arith.constant 1.000000e+00 : f32
    %467 = vector.broadcast %cst_149 : f32 to vector<8x32xf32>
    %468 = arith.subf %467, %461 : vector<8x32xf32>
    %469 = arith.mulf %468, %466 : vector<8x32xf32>
    %470 = arith.mulf %461, %439 : vector<8x32xf32>
    %471 = arith.addf %469, %470 : vector<8x32xf32>
    %cst_150 = arith.constant dense<0.000000e+00> : vector<8x32xf32>
    %472 = tpu.matmul %471, %309, %cst_150 {dimension_numbers = #tpu.dot_dimension_numbers<[1], [0], [0], [1], [0, 0, 1, 1], [], []>} : vector<8x32xf32>, vector<32x32xf32>, vector<8x32xf32> -> vector<8x32xf32>
    %473 = arith.addf %472, %323 : vector<8x32xf32>
    %cst_151 = arith.constant dense<0.000000e+00> : vector<8x32xf32>
    %474 = tpu.matmul %471, %311, %cst_151 {dimension_numbers = #tpu.dot_dimension_numbers<[1], [0], [0], [1], [0, 0, 1, 1], [], []>} : vector<8x32xf32>, vector<32x32xf32>, vector<8x32xf32> -> vector<8x32xf32>
    %475 = arith.addf %474, %327 : vector<8x32xf32>
    %cst_152 = arith.constant dense<0.000000e+00> : vector<8x32xf32>
    %476 = tpu.matmul %471, %313, %cst_152 {dimension_numbers = #tpu.dot_dimension_numbers<[1], [0], [0], [1], [0, 0, 1, 1], [], []>} : vector<8x32xf32>, vector<32x32xf32>, vector<8x32xf32> -> vector<8x32xf32>
    %477 = arith.addf %476, %331 : vector<8x32xf32>
    %478 = vector.extract_strided_slice %335 {offsets = [4, 0, 0], sizes = [1, 8, 32], strides = [1, 1, 1]} : vector<8x8x32xf32> to vector<1x8x32xf32>
    %479 = vector.shape_cast %478 : vector<1x8x32xf32> to vector<8x32xf32>
    %480 = arith.addf %479, %473 : vector<8x32xf32>
    %481 = arith.negf %480 : vector<8x32xf32>
    %482 = math.exp %481 : vector<8x32xf32>
    %cst_153 = arith.constant 1.000000e+00 : f32
    %483 = vector.broadcast %cst_153 : f32 to vector<8x32xf32>
    %484 = arith.addf %483, %482 : vector<8x32xf32>
    %485 = arith.divf %483, %484 : vector<8x32xf32>
    %486 = vector.extract_strided_slice %339 {offsets = [4, 0, 0], sizes = [1, 8, 32], strides = [1, 1, 1]} : vector<8x8x32xf32> to vector<1x8x32xf32>
    %487 = vector.shape_cast %486 : vector<1x8x32xf32> to vector<8x32xf32>
    %488 = arith.addf %487, %475 : vector<8x32xf32>
    %489 = arith.negf %488 : vector<8x32xf32>
    %490 = math.exp %489 : vector<8x32xf32>
    %cst_154 = arith.constant 1.000000e+00 : f32
    %491 = vector.broadcast %cst_154 : f32 to vector<8x32xf32>
    %492 = arith.addf %491, %490 : vector<8x32xf32>
    %493 = arith.divf %491, %492 : vector<8x32xf32>
    %494 = vector.extract_strided_slice %343 {offsets = [4, 0, 0], sizes = [1, 8, 32], strides = [1, 1, 1]} : vector<8x8x32xf32> to vector<1x8x32xf32>
    %495 = vector.shape_cast %494 : vector<1x8x32xf32> to vector<8x32xf32>
    %496 = arith.mulf %485, %477 : vector<8x32xf32>
    %497 = arith.addf %495, %496 : vector<8x32xf32>
    %498 = math.tanh %497 : vector<8x32xf32>
    %cst_155 = arith.constant 1.000000e+00 : f32
    %499 = vector.broadcast %cst_155 : f32 to vector<8x32xf32>
    %500 = arith.subf %499, %493 : vector<8x32xf32>
    %501 = arith.mulf %500, %498 : vector<8x32xf32>
    %502 = arith.mulf %493, %471 : vector<8x32xf32>
    %503 = arith.addf %501, %502 : vector<8x32xf32>
    %cst_156 = arith.constant dense<0.000000e+00> : vector<8x32xf32>
    %504 = tpu.matmul %503, %309, %cst_156 {dimension_numbers = #tpu.dot_dimension_numbers<[1], [0], [0], [1], [0, 0, 1, 1], [], []>} : vector<8x32xf32>, vector<32x32xf32>, vector<8x32xf32> -> vector<8x32xf32>
    %505 = arith.addf %504, %323 : vector<8x32xf32>
    %cst_157 = arith.constant dense<0.000000e+00> : vector<8x32xf32>
    %506 = tpu.matmul %503, %311, %cst_157 {dimension_numbers = #tpu.dot_dimension_numbers<[1], [0], [0], [1], [0, 0, 1, 1], [], []>} : vector<8x32xf32>, vector<32x32xf32>, vector<8x32xf32> -> vector<8x32xf32>
    %507 = arith.addf %506, %327 : vector<8x32xf32>
    %cst_158 = arith.constant dense<0.000000e+00> : vector<8x32xf32>
    %508 = tpu.matmul %503, %313, %cst_158 {dimension_numbers = #tpu.dot_dimension_numbers<[1], [0], [0], [1], [0, 0, 1, 1], [], []>} : vector<8x32xf32>, vector<32x32xf32>, vector<8x32xf32> -> vector<8x32xf32>
    %509 = arith.addf %508, %331 : vector<8x32xf32>
    %510 = vector.extract_strided_slice %335 {offsets = [5, 0, 0], sizes = [1, 8, 32], strides = [1, 1, 1]} : vector<8x8x32xf32> to vector<1x8x32xf32>
    %511 = vector.shape_cast %510 : vector<1x8x32xf32> to vector<8x32xf32>
    %512 = arith.addf %511, %505 : vector<8x32xf32>
    %513 = arith.negf %512 : vector<8x32xf32>
    %514 = math.exp %513 : vector<8x32xf32>
    %cst_159 = arith.constant 1.000000e+00 : f32
    %515 = vector.broadcast %cst_159 : f32 to vector<8x32xf32>
    %516 = arith.addf %515, %514 : vector<8x32xf32>
    %517 = arith.divf %515, %516 : vector<8x32xf32>
    %518 = vector.extract_strided_slice %339 {offsets = [5, 0, 0], sizes = [1, 8, 32], strides = [1, 1, 1]} : vector<8x8x32xf32> to vector<1x8x32xf32>
    %519 = vector.shape_cast %518 : vector<1x8x32xf32> to vector<8x32xf32>
    %520 = arith.addf %519, %507 : vector<8x32xf32>
    %521 = arith.negf %520 : vector<8x32xf32>
    %522 = math.exp %521 : vector<8x32xf32>
    %cst_160 = arith.constant 1.000000e+00 : f32
    %523 = vector.broadcast %cst_160 : f32 to vector<8x32xf32>
    %524 = arith.addf %523, %522 : vector<8x32xf32>
    %525 = arith.divf %523, %524 : vector<8x32xf32>
    %526 = vector.extract_strided_slice %343 {offsets = [5, 0, 0], sizes = [1, 8, 32], strides = [1, 1, 1]} : vector<8x8x32xf32> to vector<1x8x32xf32>
    %527 = vector.shape_cast %526 : vector<1x8x32xf32> to vector<8x32xf32>
    %528 = arith.mulf %517, %509 : vector<8x32xf32>
    %529 = arith.addf %527, %528 : vector<8x32xf32>
    %530 = math.tanh %529 : vector<8x32xf32>
    %cst_161 = arith.constant 1.000000e+00 : f32
    %531 = vector.broadcast %cst_161 : f32 to vector<8x32xf32>
    %532 = arith.subf %531, %525 : vector<8x32xf32>
    %533 = arith.mulf %532, %530 : vector<8x32xf32>
    %534 = arith.mulf %525, %503 : vector<8x32xf32>
    %535 = arith.addf %533, %534 : vector<8x32xf32>
    %cst_162 = arith.constant dense<0.000000e+00> : vector<8x32xf32>
    %536 = tpu.matmul %535, %309, %cst_162 {dimension_numbers = #tpu.dot_dimension_numbers<[1], [0], [0], [1], [0, 0, 1, 1], [], []>} : vector<8x32xf32>, vector<32x32xf32>, vector<8x32xf32> -> vector<8x32xf32>
    %537 = arith.addf %536, %323 : vector<8x32xf32>
    %cst_163 = arith.constant dense<0.000000e+00> : vector<8x32xf32>
    %538 = tpu.matmul %535, %311, %cst_163 {dimension_numbers = #tpu.dot_dimension_numbers<[1], [0], [0], [1], [0, 0, 1, 1], [], []>} : vector<8x32xf32>, vector<32x32xf32>, vector<8x32xf32> -> vector<8x32xf32>
    %539 = arith.addf %538, %327 : vector<8x32xf32>
    %cst_164 = arith.constant dense<0.000000e+00> : vector<8x32xf32>
    %540 = tpu.matmul %535, %313, %cst_164 {dimension_numbers = #tpu.dot_dimension_numbers<[1], [0], [0], [1], [0, 0, 1, 1], [], []>} : vector<8x32xf32>, vector<32x32xf32>, vector<8x32xf32> -> vector<8x32xf32>
    %541 = arith.addf %540, %331 : vector<8x32xf32>
    %542 = vector.extract_strided_slice %335 {offsets = [6, 0, 0], sizes = [1, 8, 32], strides = [1, 1, 1]} : vector<8x8x32xf32> to vector<1x8x32xf32>
    %543 = vector.shape_cast %542 : vector<1x8x32xf32> to vector<8x32xf32>
    %544 = arith.addf %543, %537 : vector<8x32xf32>
    %545 = arith.negf %544 : vector<8x32xf32>
    %546 = math.exp %545 : vector<8x32xf32>
    %cst_165 = arith.constant 1.000000e+00 : f32
    %547 = vector.broadcast %cst_165 : f32 to vector<8x32xf32>
    %548 = arith.addf %547, %546 : vector<8x32xf32>
    %549 = arith.divf %547, %548 : vector<8x32xf32>
    %550 = vector.extract_strided_slice %339 {offsets = [6, 0, 0], sizes = [1, 8, 32], strides = [1, 1, 1]} : vector<8x8x32xf32> to vector<1x8x32xf32>
    %551 = vector.shape_cast %550 : vector<1x8x32xf32> to vector<8x32xf32>
    %552 = arith.addf %551, %539 : vector<8x32xf32>
    %553 = arith.negf %552 : vector<8x32xf32>
    %554 = math.exp %553 : vector<8x32xf32>
    %cst_166 = arith.constant 1.000000e+00 : f32
    %555 = vector.broadcast %cst_166 : f32 to vector<8x32xf32>
    %556 = arith.addf %555, %554 : vector<8x32xf32>
    %557 = arith.divf %555, %556 : vector<8x32xf32>
    %558 = vector.extract_strided_slice %343 {offsets = [6, 0, 0], sizes = [1, 8, 32], strides = [1, 1, 1]} : vector<8x8x32xf32> to vector<1x8x32xf32>
    %559 = vector.shape_cast %558 : vector<1x8x32xf32> to vector<8x32xf32>
    %560 = arith.mulf %549, %541 : vector<8x32xf32>
    %561 = arith.addf %559, %560 : vector<8x32xf32>
    %562 = math.tanh %561 : vector<8x32xf32>
    %cst_167 = arith.constant 1.000000e+00 : f32
    %563 = vector.broadcast %cst_167 : f32 to vector<8x32xf32>
    %564 = arith.subf %563, %557 : vector<8x32xf32>
    %565 = arith.mulf %564, %562 : vector<8x32xf32>
    %566 = arith.mulf %557, %535 : vector<8x32xf32>
    %567 = arith.addf %565, %566 : vector<8x32xf32>
    %cst_168 = arith.constant dense<0.000000e+00> : vector<8x32xf32>
    %568 = tpu.matmul %567, %309, %cst_168 {dimension_numbers = #tpu.dot_dimension_numbers<[1], [0], [0], [1], [0, 0, 1, 1], [], []>} : vector<8x32xf32>, vector<32x32xf32>, vector<8x32xf32> -> vector<8x32xf32>
    %569 = arith.addf %568, %323 : vector<8x32xf32>
    %cst_169 = arith.constant dense<0.000000e+00> : vector<8x32xf32>
    %570 = tpu.matmul %567, %311, %cst_169 {dimension_numbers = #tpu.dot_dimension_numbers<[1], [0], [0], [1], [0, 0, 1, 1], [], []>} : vector<8x32xf32>, vector<32x32xf32>, vector<8x32xf32> -> vector<8x32xf32>
    %571 = arith.addf %570, %327 : vector<8x32xf32>
    %cst_170 = arith.constant dense<0.000000e+00> : vector<8x32xf32>
    %572 = tpu.matmul %567, %313, %cst_170 {dimension_numbers = #tpu.dot_dimension_numbers<[1], [0], [0], [1], [0, 0, 1, 1], [], []>} : vector<8x32xf32>, vector<32x32xf32>, vector<8x32xf32> -> vector<8x32xf32>
    %573 = arith.addf %572, %331 : vector<8x32xf32>
    %574 = vector.extract_strided_slice %335 {offsets = [7, 0, 0], sizes = [1, 8, 32], strides = [1, 1, 1]} : vector<8x8x32xf32> to vector<1x8x32xf32>
    %575 = vector.shape_cast %574 : vector<1x8x32xf32> to vector<8x32xf32>
    %576 = arith.addf %575, %569 : vector<8x32xf32>
    %577 = arith.negf %576 : vector<8x32xf32>
    %578 = math.exp %577 : vector<8x32xf32>
    %cst_171 = arith.constant 1.000000e+00 : f32
    %579 = vector.broadcast %cst_171 : f32 to vector<8x32xf32>
    %580 = arith.addf %579, %578 : vector<8x32xf32>
    %581 = arith.divf %579, %580 : vector<8x32xf32>
    %582 = vector.extract_strided_slice %339 {offsets = [7, 0, 0], sizes = [1, 8, 32], strides = [1, 1, 1]} : vector<8x8x32xf32> to vector<1x8x32xf32>
    %583 = vector.shape_cast %582 : vector<1x8x32xf32> to vector<8x32xf32>
    %584 = arith.addf %583, %571 : vector<8x32xf32>
    %585 = arith.negf %584 : vector<8x32xf32>
    %586 = math.exp %585 : vector<8x32xf32>
    %cst_172 = arith.constant 1.000000e+00 : f32
    %587 = vector.broadcast %cst_172 : f32 to vector<8x32xf32>
    %588 = arith.addf %587, %586 : vector<8x32xf32>
    %589 = arith.divf %587, %588 : vector<8x32xf32>
    %590 = vector.extract_strided_slice %343 {offsets = [7, 0, 0], sizes = [1, 8, 32], strides = [1, 1, 1]} : vector<8x8x32xf32> to vector<1x8x32xf32>
    %591 = vector.shape_cast %590 : vector<1x8x32xf32> to vector<8x32xf32>
    %592 = arith.mulf %581, %573 : vector<8x32xf32>
    %593 = arith.addf %591, %592 : vector<8x32xf32>
    %594 = math.tanh %593 : vector<8x32xf32>
    %cst_173 = arith.constant 1.000000e+00 : f32
    %595 = vector.broadcast %cst_173 : f32 to vector<8x32xf32>
    %596 = arith.subf %595, %589 : vector<8x32xf32>
    %597 = arith.mulf %596, %594 : vector<8x32xf32>
    %598 = arith.mulf %589, %567 : vector<8x32xf32>
    %599 = arith.addf %597, %598 : vector<8x32xf32>
    %600 = tpu.concatenate %375, %407, %439, %471, %503, %535, %567, %599 in 0 : vector<8x32xf32>, vector<8x32xf32>, vector<8x32xf32>, vector<8x32xf32>, vector<8x32xf32>, vector<8x32xf32>, vector<8x32xf32>, vector<8x32xf32> -> vector<64x32xf32>
    %c0_174 = arith.constant 0 : index
    %c0_175 = arith.constant 0 : index
    %601 = vector.load %arg9[%c0_174, %c0_175] : memref<32x16xf32, #tpu.memory_space<vmem>>, vector<32x16xf32>
    %cst_176 = arith.constant dense<0.000000e+00> : vector<64x16xf32>
    %602 = tpu.matmul %600, %601, %cst_176 {dimension_numbers = #tpu.dot_dimension_numbers<[1], [0], [0], [1], [0, 0, 1, 1], [], []>} : vector<64x32xf32>, vector<32x16xf32>, vector<64x16xf32> -> vector<64x16xf32>
    %c0_177 = arith.constant 0 : index
    %c0_178 = arith.constant 0 : index
    %603 = vector.load %arg10[%c0_177, %c0_178] : memref<1x16xf32, #tpu.memory_space<vmem>>, vector<1x16xf32>
    %604 = vector.broadcast %603 : vector<1x16xf32> to vector<64x16xf32>
    %605 = arith.addf %602, %604 : vector<64x16xf32>
    %606 = vector.shape_cast %605 : vector<64x16xf32> to vector<8x8x16xf32>
    %c0_179 = arith.constant 0 : index
    %c0_180 = arith.constant 0 : index
    %c0_181 = arith.constant 0 : index
    %607 = vector.load %arg11[%c0_179, %c0_180, %c0_181] : memref<8x8x16xf32, #tpu.memory_space<vmem>>, vector<8x8x16xf32>
    tpu.vector_store %arg11[%c0_179, %c0_180, %c0_181], %606 {strides = array<i32>} : memref<8x8x16xf32, #tpu.memory_space<vmem>>, vector<8x8x16xf32>,
    return
  }
}

</mosaic_0001>

<bundles_post_ra>
// kernel: rnn_encdec.1
= control target key start
LH: loop header
LB: loop body
LE: loop exit
PB: predicated region body
PF: predicated region fallthrough
CT: control target
= control target key end

     0   :  { %vm102_vm0 = vcmask 130048   ;;  %v6045_v12 = vmov 0.0   ;;  %vm6046_vm1 = vmmov 0   ;;  %vm454_vm2 = vcmask 261120   ;;  %s7317_s1 = inlined_call_operand.vmem [shape: f32[3,16,32], index: 1, kind: input, shape index: {}]   ;;  %s7318_s0 = inlined_call_operand.vmem [shape: f32[8,8,16], index: 0, kind: input, shape index: {}]   ;;  %s7319_s2 = inlined_call_operand.vmem [shape: f32[3,32,32], index: 2, kind: input, shape index: {}]   ;;  %s7320_s3 = inlined_call_operand.vmem [shape: f32[3,1,32], index: 3, kind: input, shape index: {}]   ;;  %s7321_s4 = inlined_call_operand.vmem [shape: f32[3,1,32], index: 4, kind: input, shape index: {}]   ;;  %s7322_s5 = inlined_call_operand.vmem [shape: f32[3,32,32], index: 5, kind: input, shape index: {}]   ;;  %s7323_s6 = inlined_call_operand.vmem [shape: f32[3,32,32], index: 6, kind: input, shape index: {}]   ;;  %s7324_s8 = inlined_call_operand.vmem [shape: f32[3,1,32], index: 8, kind: input, shape index: {}]   ;;  %s7325_s7 = inlined_call_operand.vmem [shape: f32[3,1,32], index: 7, kind: input, shape index: {}]   ;;  %s7326_s9 = inlined_call_operand.vmem [shape: f32[32,16], index: 9, kind: input, shape index: {}]   ;;  %s7327_s10 = inlined_call_operand.vmem [shape: f32[1,16], index: 10, kind: input, shape index: {}]   ;;  %s7328_s11 = inlined_call_operand.vmem [shape: f32[8,8,16], index: 11, kind: output, shape index: {}]  }
   0x1   :  { %v39_v0 = vld [vmem:[%s7317_s1 + $0x8] sm:$0xff]  ;;  %v38_v1 = vld [vmem:[%s7317_s1] sm:$0xff]  ;;  %v90_v2 = vld [vmem:[%s7318_s0 + $0x10] sm:$0xff] }
   0x2   :  { %5875 = vmatprep.subr.mxu1 %v39_v0  ;;  %5226 = vmatprep.mubr.msk.f32.mxu1 %vm102_vm0, %v90_v2  ;;  %v91_v3 = vld [vmem:[%s7318_s0 + $0x18] sm:$0xff]  ;;  %v92_v5 = vld [vmem:[%s7318_s0 + $0x20] sm:$0xff]  ;;  %v4719_v6 = vld [vmem:[%s7317_s1 + $0x10] sm:$0xff] }
   0x3   :  { %5877 = vmatpush3.msra.mxu1 %v39_v0  ;;  %v4720_v4 = vld [vmem:[%s7317_s1 + $0x18] sm:$0xff]  ;;  %5219 = vmatprep.subr.mxu0 %v39_v0  ;;  %v93_v7 = vld [vmem:[%s7318_s0 + $0x28] sm:$0xff]  ;;  %v94_v8 = vld [vmem:[%s7318_s0 + $0x30] sm:$0xff] }
   0x4   :  { %5876 = vmatprep.subr.mxu1 %v38_v1  ;;  %5220 = vmatpush3.msra.mxu0 %v39_v0  ;;  %v88_v9 = vld [vmem:[%s7318_s0] sm:$0xff]  ;;  %v4722_v10 = vld [vmem:[%s7317_s1 + $0x28] sm:$0xff]  ;;  %v95_v13 = vld [vmem:[%s7318_s0 + $0x38] sm:$0xff] }
   0x5   :  { %5878 = vmatpush3.msra.mxu1 %v38_v1  ;;  %5221 = vmatprep.subr.mxu0 %v38_v1  ;;  %v89_v11 = vld [vmem:[%s7318_s0 + $0x8] sm:$0xff]  ;;  %v4721_v14 = vld [vmem:[%s7317_s1 + $0x20] sm:$0xff]  ;;  %v6162_v15 = vld [vmem:[%s7319_s2 + $0x58] sm:$0xff] }
   0x6   :  { %5227 = vmatmul.mubr.msk.f32.vlgmr.msra.gmra.mxu1 %vm102_vm0, %v91_v3  ;;  %5235 = vmatprep.subr.mxu1 %v4720_v4  ;;  %v6168_v16 = vld [vmem:[%s7319_s2 + $0x18] sm:$0xff]  ;;  %v6178_v17 = vld [vmem:[%s7319_s2 + $0x10] sm:$0xff]  ;;  %v6192_v19 = vld [vmem:[%s7319_s2 + $0x8] sm:$0xff] }
   0x7   :  { %5236 = vmatpush3.msra.mxu1 %v4720_v4  ;;  %5229 = vmatprep.mubr.msk.f32.mxu1 %vm102_vm0, %v92_v5  ;;  %v6184_v18 = vld [vmem:[%s7319_s2 + $0x50] sm:$0xff]  ;;  %v6202_v20 = vld [vmem:[%s7319_s2] sm:$0xff]  ;;  %v6213_v21 = vld [vmem:[%s7319_s2 + $0x48] sm:$0xff] }
   0x8   :  { %5237 = vmatprep.subr.mxu1 %v4719_v6  ;;  %5222 = vmatpush3.msra.mxu0 %v38_v1  ;;  %v6222_v22 = vld [vmem:[%s7319_s2 + $0x40] sm:$0xff]  ;;  %v6237_v23 = vld [vmem:[%s7319_s2 + $0x38] sm:$0xff]  ;;  %v6245_v24 = vld [vmem:[%s7319_s2 + $0x30] sm:$0xff] }
   0x9   :  { %5238 = vmatpush3.msra.mxu1 %v4719_v6  ;;  %5223 = vmatprep.mubr.msk.f32.mxu0 %vm102_vm0, %v88_v9  ;;  %v6255_v25 = vld [vmem:[%s7319_s2 + $0x28] sm:$0xff]  ;;  %v6264_v26 = vld [vmem:[%s7319_s2 + $0x20] sm:$0xff] }
   0xa   :  { %5230 = vmatmul.mubr.msk.f32.gmra.mxu1 %vm102_vm0, %v93_v7  ;;  %5267 = vmatprep.subr.mxu1 %v6045_v12  ;;  %v4738_v27 = vld [vmem:[%s7320_s3] ss:$0 sm:$0xff]  ;;  %v6304_v40 = vld [vmem:[%s7320_s3 + $0x2] ss:$0 sm:$0xff]  ;;  %v4747_v43 = vld [vmem:[%s7320_s3 + $0x1] ss:$0 sm:$0xff] }
   0xb   :  { %5232 = vmatprep.mubr.msk.f32.mxu1 %vm102_vm0, %v94_v8  ;;  %5224 = vmatmul.mubr.msk.f32.vlgmr.msra.gmra.mxu0 %vm102_vm0, %v89_v11 }
   0xc   :  { %5251 = vmatprep.subr.mxu0 %v4722_v10  ;;  %5255 = vmatprep.mubr.msk.f32.mxu0 %vm102_vm0, %v88_v9 }
   0xd   :  { %5252 = vmatpush3.msra.mxu0 %v4722_v10 }
   0xe   :  { %5233 = vmatmul.mubr.msk.f32.gmra.mxu1 %vm102_vm0, %v95_v13  ;;  %5253 = vmatprep.subr.mxu0 %v4721_v14 }
   0xf   :  { %5239 = vmatprep.mubr.msk.f32.mxu1 %vm102_vm0, %v88_v9  ;;  %5254 = vmatpush3.msra.mxu0 %v4721_v14  ;;  %v6346_v9 = vld [vmem:[%s7321_s4] ss:$0 sm:$0xff] }
  0x10   :  { %5256 = vmatmul.mubr.msk.f32.vlgmr.msra.gmra.mxu0 %vm102_vm0, %v89_v11  ;;  %5289 = vmatprep.subr.mxu0 %v6045_v12 }
  0x11   :  { %5290 = vmatpush3.msra.mxu0 %v6162_v15  ;;  %5258 = vmatprep.mubr.msk.f32.mxu0 %vm102_vm0, %v90_v2 }
  0x12   :  { %5240 = vmatmul.mubr.msk.f32.vlgmr.msra.gmra.mxu1 %vm102_vm0, %v89_v11  ;;  %5291 = vmatprep.subr.mxu0 %v6045_v12 }
  0x13   :  { %5268 = vmatpush3.msra.mxu1 %v6168_v16  ;;  %5242 = vmatprep.mubr.msk.f32.mxu1 %vm102_vm0, %v90_v2 }
  0x14   :  { %5269 = vmatprep.subr.mxu1 %v6045_v12  ;;  %5259 = vmatmul.mubr.msk.f32.gmra.mxu0 %vm102_vm0, %v91_v3 }
  0x15   :  { %5270 = vmatpush3.msra.mxu1 %v6178_v17  ;;  %5292 = vmatpush3.msra.mxu0 %v6184_v18 }
  0x16   :  { %5243 = vmatmul.mubr.msk.f32.gmra.mxu1 %vm102_vm0, %v91_v3  ;;  %5271 = vmatprep.subr.mxu1 %v6045_v12 }
  0x17   :  { %5245 = vmatprep.mubr.msk.f32.mxu1 %vm102_vm0, %v92_v5  ;;  %5272 = vmatpush3.msra.mxu1 %v6192_v19 }
  0x18   :  { %5273 = vmatprep.subr.mxu1 %v6045_v12  ;;  %5261 = vmatprep.mubr.msk.f32.mxu0 %vm102_vm0, %v92_v5 }
  0x19   :  { %5274 = vmatpush3.msra.mxu1 %v6202_v20  ;;  %5262 = vmatmul.mubr.msk.f32.gmra.mxu0 %vm102_vm0, %v93_v7 }
  0x1a   :  { %5246 = vmatmul.mubr.msk.f32.gmra.mxu1 %vm102_vm0, %v93_v7  ;;  %5278 = vmatprep.subr.mxu1 %v6045_v12 }
  0x1b   :  { %5248 = vmatprep.mubr.msk.f32.mxu1 %vm102_vm0, %v94_v8  ;;  %5293 = vmatprep.subr.mxu0 %v6045_v12 }
  0x1c   :  { %5294 = vmatpush3.msra.mxu0 %v6213_v21  ;;  %5264 = vmatprep.mubr.msk.f32.mxu0 %vm102_vm0, %v94_v8 }
  0x1d   :  { %5265 = vmatmul.mubr.msk.f32.gmra.mxu0 %vm102_vm0, %v95_v13  ;;  %5295 = vmatprep.subr.mxu0 %v6045_v12 }
  0x1e   :  { %5249 = vmatmul.mubr.msk.f32.gmra.mxu1 %vm102_vm0, %v95_v13  ;;  %5296 = vmatpush3.msra.mxu0 %v6222_v22 }
  0x1f   :  { %5275 = vmatprep.mubr.msk.f32.mxu1 %vm6046_vm1, %v6045_v12  ;;  %5297 = vmatprep.mubr.msk.f32.mxu0 %vm6046_vm1, %v6045_v12 }
  0x20   :  { %5311 = vmatprep.subr.mxu0 %v6045_v12 }
  0x21   :  { %5298 = vmatmul.mubr.f32.vlgmr.msra.gmra.mxu0 %v6045_v12 }
  0x22   :  { %5276 = vmatmul.mubr.f32.vlgmr.msra.gmra.mxu1 %v6045_v12  ;;  %5312 = vmatpush3.msra.mxu0 %v6237_v23 }
  0x23   :  { %5279 = vmatpush3.msra.mxu1 %v6237_v23  ;;  %5286 = vmatprep.mubr.msk.f32.mxu1 %vm6046_vm1, %v6045_v12 }
  0x24   :  { %5280 = vmatprep.subr.mxu1 %v6045_v12  ;;  %5313 = vmatprep.subr.mxu0 %v6045_v12 }
  0x25   :  { %5281 = vmatpush3.msra.mxu1 %v6245_v24  ;;  %5314 = vmatpush3.msra.mxu0 %v6245_v24 }
  0x26   :  { %5282 = vmatprep.subr.mxu1 %v6045_v12  ;;  %5315 = vmatprep.subr.mxu0 %v6045_v12 }
  0x27   :  { %5283 = vmatpush3.msra.mxu1 %v6255_v25  ;;  %5316 = vmatpush3.msra.mxu0 %v6255_v25 }
  0x28   :  { %5284 = vmatprep.subr.mxu1 %v6045_v12  ;;  %5317 = vmatprep.subr.mxu0 %v6045_v12 }
  0x29   :  { %5285 = vmatpush3.msra.mxu1 %v6264_v26  ;;  %5318 = vmatpush3.msra.mxu0 %v6264_v26 }
  0x2a   :  { %5287 = vmatmul.mubr.f32.vlgmr.msra.gmra.mxu1 %v6045_v12  ;;  %5300 = vmatprep.subr.mxu1 %v6045_v12 }
  0x2b   :  { %5301 = vmatpush3.msra.mxu1 %v6168_v16  ;;  %5308 = vmatprep.mubr.msk.f32.mxu1 %vm6046_vm1, %v6045_v12 }
  0x2c   :  { %5302 = vmatprep.subr.mxu1 %v6045_v12  ;;  %5319 = vmatprep.mubr.msk.f32.mxu0 %vm6046_vm1, %v6045_v12 }
  0x2d   :  { %5303 = vmatpush3.msra.mxu1 %v6178_v17  ;;  %5333 = vmatprep.subr.mxu0 %v6045_v12 }
  0x2e   :  { %5304 = vmatprep.subr.mxu1 %v6045_v12 }
  0x2f   :  { %5305 = vmatpush3.msra.mxu1 %v6192_v19 }
  0x30   :  { %5306 = vmatprep.subr.mxu1 %v6045_v12 }
  0x31   :  { %5307 = vmatpush3.msra.mxu1 %v6202_v20 }
  0x32   :  { %5322 = vmatprep.subr.mxu1 %v6045_v12 }
  0xc6   :  { %v5228_v28 = vpop.f32.mrf.mxu1 }
  0xc7   :  { %v6291_v29 = vadd.f32 %v5228_v28, %v4738_v27 }
  0xc8   :  { %v203_v30 = vpop.f32.mrf.mxu1 }
  0xc9   :  { %v6293_v31 = vadd.f32 %v4738_v27, %v203_v30 }
  0xca   :  { %v5231_v32 = vpop.f32.mrf.mxu1 }
  0xcb   :  { %v6295_v33 = vadd.f32 %v5231_v32, %v4738_v27  ;;  %v5225_v34 = vpop.f32.mrf.mxu0 }
  0xcc   :  { %v213_v35 = vpop.f32.mrf.mxu1  ;;  %v6297_v36 = vadd.f32 %v5225_v34, %v4738_v27 }
  0xcd   :  { %v6299_v37 = vadd.f32 %v4738_v27, %v213_v35  ;;  %v193_v39 = vpop.f32.mrf.mxu0 }
  0xce   :  { %v5234_v38 = vpop.f32.mrf.mxu1  ;;  %v194_v28 = vadd.f32 %v4738_v27, %v193_v39 }
  0xcf   :  { %v6306_v41 = vadd.f32 %v5234_v38, %v4738_v27 }
  0xd0   :  { %v223_v42 = vpop.f32.mrf.mxu1  ;;  %v5257_v44 = vpop.f32.mrf.mxu0 }
  0xd1   :  { %v6311_v45 = vadd.f32 %v4738_v27, %v223_v42  ;;  %v6314_v46 = vadd.f32 %v5257_v44, %v6304_v40  ;;  %v6357_v42 = vld [vmem:[%s7321_s4 + $0x1] ss:$0 sm:$0xff] }
  0xd2   :  { %v5241_v47 = vpop.f32.mrf.mxu1  ;;  %v415_v48 = vpop.f32.mrf.mxu0 }
  0xd3   :  { %v6316_v49 = vadd.f32 %v5241_v47, %v4747_v43 }
  0xd4   :  { %v304_v50 = vpop.f32.mrf.mxu1  ;;  %v5260_v51 = vpop.f32.mrf.mxu0 }
  0xd5   :  { %v6319_v52 = vadd.f32 %v5260_v51, %v6304_v40  ;;  %v305_v47 = vadd.f32 %v4747_v43, %v304_v50 }
  0xd6   :  { %v5244_v53 = vpop.f32.mrf.mxu1  ;;  %v425_v54 = vpop.f32.mrf.mxu0 }
  0xd7   :  { %v6321_v55 = vadd.f32 %v5244_v53, %v4747_v43  ;;  %v6324_v56 = vadd.f32 %v6304_v40, %v425_v54 }
  0xd8   :  { %v314_v57 = vpop.f32.mrf.mxu1 }
  0xd9   :  { %v6326_v58 = vadd.f32 %v4747_v43, %v314_v57  ;;  %v5263_v59 = vpop.f32.mrf.mxu0 }
  0xda   :  { %v5247_v60 = vpop.f32.mrf.mxu1  ;;  %v6329_v61 = vadd.f32 %v5263_v59, %v6304_v40 }
  0xdb   :  { %v6331_v62 = vadd.f32 %v5247_v60, %v4747_v43  ;;  %v435_v63 = vpop.f32.mrf.mxu0  ;;  %v6363_v60 = vld [vmem:[%s7321_s4 + $0x2] ss:$0 sm:$0xff] }
  0xdc   :  { %v324_v0 = vpop.f32.mrf.mxu1  ;;  %v6334_v1 = vadd.f32 %v6304_v40, %v435_v63 }
  0xdd   :  { %v6336_v2 = vadd.f32 %v4747_v43, %v324_v0  ;;  %v5266_v3 = vpop.f32.mrf.mxu0 }
  0xde   :  { %v5250_v4 = vpop.f32.mrf.mxu1  ;;  %v6339_v5 = vadd.f32 %v5266_v3, %v6304_v40 }
  0xdf   :  { %v6341_v6 = vadd.f32 %v5250_v4, %v4747_v43  ;;  %v445_v7 = vpop.f32.mrf.mxu0 }
  0xe0   :  { %v334_v8 = vpop.f32.mrf.mxu1  ;;  %v6349_v10 = vadd.f32 %v6304_v40, %v445_v7 }
  0xe1   :  { %v6351_v11 = vadd.f32 %v4747_v43, %v334_v8  ;;  %v664_v13 = vpop.f32.mrf.mxu0  ;;  %v416_v43 = vadd.f32 %v6304_v40, %v415_v48 }
  0xe2   :  { %v524_v14 = vpop.f32.mrf.mxu1  ;;  %v665_v0 = vadd.f32 %v6363_v60, %v664_v13 }
  0xe3   :  { %v525_v30 = vadd.f32 %v6346_v9, %v524_v14  ;;  %v5299_v32 = vpop.f32.mrf.mxu0 }
  0xe4   :  { %v5277_v34 = vpop.f32.mrf.mxu1 }
  0xe5   :  { %v668_v35 = vadd.f32 %v525_v30, %v194_v28 }
  0xe7   :  { %v4765_v38 = vmul.f32 -1.442695, %v668_v35 }
  0xe9   :  { %5881 = vpow2.f32 %v4765_v38 }
  0xea   :  { %v594_v44 = vpop.f32.mrf.mxu1 }
  0xeb   :  { %v595_v51 = vadd.f32 %v6357_v42, %v594_v44 }
  0xec   :  { %v5288_v53 = vpop.f32.mrf.mxu1 }
  0xed   :  { %v675_v54 = vadd.f32 %v595_v51, %v305_v47 }
  0xef   :  { %v4766_v57 = vmul.f32 -1.442695, %v675_v54 }
  0xf1   :  { %5883 = vpow2.f32 %v4766_v57 }
  0xf6   :  { %v5882_v27 = vpop.eup %5881 }
  0xf7   :  { %v672_v39 = vadd.f32 1.0, %v5882_v27 }
  0xf9   :  { %5885 = vrcp.f32 %v672_v39 }
  0xfe   :  { %v5884_v59 = vpop.eup %5883 }
  0xff   :  { %v679_v63 = vadd.f32 1.0, %v5884_v59 }
 0x101   :  { %5887 = vrcp.f32 %v679_v63 }
 0x106   :  { %v5886_v3 = vpop.eup %5885 }
 0x107   :  { %v682_v50 = vmul.f32 %v5886_v3, %v665_v0 }
 0x109   :  { %v683_v4 = vadd.f32 %v682_v50, %v416_v43 }
 0x10b   :  { %5889 = vtanh.f32 %v683_v4 }
 0x10e   :  { %v5888_v7 = vpop.eup %5887 }
 0x10f   :  { %v685_v8 = vsub.f32 1.0, %v5888_v7  ;;  %v687_v28 = vmul.f32 0.0, %v5888_v7 }
 0x118   :  { %v5890_v14 = vpop.eup %5889 }
 0x119   :  { %v686_v30 = vmul.f32 %v5890_v14, %v685_v8 }
 0x11b   :  { %v6367_v32 = vadd.f32 %v687_v28, %v686_v30 }
 0x11d   :  { %5309 = vmatmul.mubr.msk.f32.vlgmr.msra.gmra.mxu1 %vm454_vm2, %v6367_v32  ;;  %5320 = vmatmul.mubr.msk.f32.vlgmr.msra.gmra.mxu0 %vm454_vm2, %v6367_v32 }
 0x11e   :  { %5323 = vmatpush3.msra.mxu1 %v6162_v15  ;;  %5330 = vmatprep.mubr.msk.f32.mxu1 %vm6046_vm1, %v6045_v12 }
 0x11f   :  { %5324 = vmatprep.subr.mxu1 %v6045_v12  ;;  %5334 = vmatpush3.msra.mxu0 %v6168_v16 }
 0x120   :  { %5325 = vmatpush3.msra.mxu1 %v6184_v18  ;;  %5335 = vmatprep.subr.mxu0 %v6045_v12 }
 0x121   :  { %5326 = vmatprep.subr.mxu1 %v6045_v12  ;;  %5336 = vmatpush3.msra.mxu0 %v6178_v17 }
 0x122   :  { %5327 = vmatpush3.msra.mxu1 %v6213_v21  ;;  %5337 = vmatprep.subr.mxu0 %v6045_v12 }
 0x123   :  { %5328 = vmatprep.subr.mxu1 %v6045_v12  ;;  %5338 = vmatpush3.msra.mxu0 %v6192_v19 }
 0x124   :  { %5329 = vmatpush3.msra.mxu1 %v6222_v22  ;;  %5339 = vmatprep.subr.mxu0 %v6045_v12 }
 0x125   :  { %5331 = vmatmul.mubr.msk.f32.vlgmr.msra.gmra.mxu1 %vm454_vm2, %v6367_v32  ;;  %5344 = vmatprep.subr.mxu1 %v6045_v12 }
 0x126   :  { %5345 = vmatpush3.msra.mxu1 %v6237_v23  ;;  %5340 = vmatpush3.msra.mxu0 %v6202_v20 }
 0x127   :  { %5346 = vmatprep.subr.mxu1 %v6045_v12  ;;  %5341 = vmatprep.mubr.msk.f32.mxu0 %vm6046_vm1, %v6045_v12 }
 0x128   :  { %5347 = vmatpush3.msra.mxu1 %v6245_v24  ;;  %5352 = vmatprep.mubr.msk.f32.mxu1 %vm6046_vm1, %v6045_v12 }
 0x129   :  { %5348 = vmatprep.subr.mxu1 %v6045_v12  ;;  %5355 = vmatprep.subr.mxu0 %v6045_v12 }
 0x12a   :  { %5349 = vmatpush3.msra.mxu1 %v6255_v25 }
 0x12b   :  { %5350 = vmatprep.subr.mxu1 %v6045_v12 }
 0x12c   :  { %5351 = vmatpush3.msra.mxu1 %v6264_v26 }
 0x12d   :  { %5366 = vmatprep.subr.mxu1 %v6045_v12 }
 0x1dd   :  { %v758_v40 = vpop.f32.mrf.mxu1  ;;  %v828_v48 = vpop.f32.mrf.mxu0 }
 0x1de   :  { %v759_v13 = vadd.f32 %v6346_v9, %v758_v40  ;;  %v829_v47 = vadd.f32 %v6357_v42, %v828_v48 }
 0x1df   :  { %v5310_v34 = vpop.f32.mrf.mxu1  ;;  %v5321_v35 = vpop.f32.mrf.mxu0 }
 0x1e0   :  { %v902_v38 = vadd.f32 %v759_v13, %v6297_v36  ;;  %v909_v53 = vadd.f32 %v829_v47, %v6316_v49 }
 0x1e2   :  { %v4770_v44 = vmul.f32 -1.442695, %v902_v38  ;;  %v4771_v57 = vmul.f32 -1.442695, %v909_v53 }
 0x1e4   :  { %5891 = vpow2.f32 %v4770_v44 }
 0x1e5   :  { %v898_v51 = vpop.f32.mrf.mxu1  ;;  %5893 = vpow2.f32 %v4771_v57 }
 0x1e6   :  { %v899_v0 = vadd.f32 %v6363_v60, %v898_v51 }
 0x1e7   :  { %v5332_v54 = vpop.f32.mrf.mxu1 }
 0x1f1   :  { %v5892_v27 = vpop.eup %5891 }
 0x1f2   :  { %v906_v39 = vadd.f32 1.0, %v5892_v27  ;;  %v5894_v59 = vpop.eup %5893 }
 0x1f3   :  { %v913_v63 = vadd.f32 1.0, %v5894_v59 }
 0x1f4   :  { %5895 = vrcp.f32 %v906_v39 }
 0x1f5   :  { %5897 = vrcp.f32 %v913_v63 }
 0x201   :  { %v5896_v3 = vpop.eup %5895 }
 0x202   :  { %v916_v36 = vmul.f32 %v5896_v3, %v899_v0  ;;  %v5898_v50 = vpop.eup %5897 }
 0x203   :  { %v919_v4 = vsub.f32 1.0, %v5898_v50  ;;  %v921_v49 = vmul.f32 %v5898_v50, %v6367_v32 }
 0x204   :  { %v917_v43 = vadd.f32 %v916_v36, %v6314_v46 }
 0x206   :  { %5899 = vtanh.f32 %v917_v43 }
 0x213   :  { %v5900_v7 = vpop.eup %5899 }
 0x214   :  { %v920_v8 = vmul.f32 %v5900_v7, %v919_v4 }
 0x216   :  { %v6412_v14 = vadd.f32 %v921_v49, %v920_v8 }
 0x218   :  { %5342 = vmatmul.mubr.msk.f32.vlgmr.msra.gmra.mxu0 %vm454_vm2, %v6412_v14  ;;  %5353 = vmatmul.mubr.msk.f32.vlgmr.msra.gmra.mxu1 %vm454_vm2, %v6412_v14 }
 0x219   :  { %5356 = vmatpush3.msra.mxu0 %v6162_v15  ;;  %5363 = vmatprep.mubr.msk.f32.mxu0 %vm6046_vm1, %v6045_v12 }
 0x21a   :  { %5357 = vmatprep.subr.mxu0 %v6045_v12  ;;  %5367 = vmatpush3.msra.mxu1 %v6168_v16 }
 0x21b   :  { %5358 = vmatpush3.msra.mxu0 %v6184_v18  ;;  %5368 = vmatprep.subr.mxu1 %v6045_v12 }
 0x21c   :  { %5359 = vmatprep.subr.mxu0 %v6045_v12  ;;  %5369 = vmatpush3.msra.mxu1 %v6178_v17 }
 0x21d   :  { %5360 = vmatpush3.msra.mxu0 %v6213_v21  ;;  %5370 = vmatprep.subr.mxu1 %v6045_v12 }
 0x21e   :  { %5361 = vmatprep.subr.mxu0 %v6045_v12  ;;  %5371 = vmatpush3.msra.mxu1 %v6192_v19 }
 0x21f   :  { %5362 = vmatpush3.msra.mxu0 %v6222_v22  ;;  %5372 = vmatprep.subr.mxu1 %v6045_v12 }
 0x220   :  { %5364 = vmatmul.mubr.msk.f32.vlgmr.msra.gmra.mxu0 %vm454_vm2, %v6412_v14  ;;  %5377 = vmatprep.subr.mxu0 %v6045_v12 }
 0x221   :  { %5378 = vmatpush3.msra.mxu0 %v6237_v23  ;;  %5373 = vmatpush3.msra.mxu1 %v6202_v20 }
 0x222   :  { %5379 = vmatprep.subr.mxu0 %v6045_v12  ;;  %5374 = vmatprep.mubr.msk.f32.mxu1 %vm6046_vm1, %v6045_v12 }
 0x223   :  { %5380 = vmatpush3.msra.mxu0 %v6245_v24  ;;  %5385 = vmatprep.mubr.msk.f32.mxu0 %vm6046_vm1, %v6045_v12 }
 0x224   :  { %5381 = vmatprep.subr.mxu0 %v6045_v12  ;;  %5388 = vmatprep.subr.mxu1 %v6045_v12 }
 0x225   :  { %5382 = vmatpush3.msra.mxu0 %v6255_v25 }
 0x226   :  { %5383 = vmatprep.subr.mxu0 %v6045_v12 }
 0x227   :  { %5384 = vmatpush3.msra.mxu0 %v6264_v26 }
 0x228   :  { %5399 = vmatprep.subr.mxu0 %v6045_v12 }
 0x2d8   :  { %v992_v46 = vpop.f32.mrf.mxu0  ;;  %v1062_v28 = vpop.f32.mrf.mxu1 }
 0x2d9   :  { %v993_v30 = vadd.f32 %v6346_v9, %v992_v46  ;;  %v1063_v35 = vadd.f32 %v6357_v42, %v1062_v28 }
 0x2da   :  { %v5343_v40 = vpop.f32.mrf.mxu0  ;;  %v5354_v48 = vpop.f32.mrf.mxu1 }
 0x2db   :  { %v1136_v13 = vadd.f32 %v993_v30, %v6293_v31  ;;  %v1143_v44 = vadd.f32 %v1063_v35, %v6326_v58 }
 0x2dd   :  { %v4775_v34 = vmul.f32 -1.442695, %v1136_v13  ;;  %v4776_v51 = vmul.f32 -1.442695, %v1143_v44 }
 0x2df   :  { %5901 = vpow2.f32 %v4775_v34 }
 0x2e0   :  { %v1132_v38 = vpop.f32.mrf.mxu0  ;;  %5903 = vpow2.f32 %v4776_v51 }
 0x2e1   :  { %v1133_v39 = vadd.f32 %v6363_v60, %v1132_v38 }
 0x2e2   :  { %v5365_v47 = vpop.f32.mrf.mxu0 }
 0x2ec   :  { %v5902_v53 = vpop.eup %5901 }
 0x2ed   :  { %v1140_v54 = vadd.f32 1.0, %v5902_v53  ;;  %v5904_v57 = vpop.eup %5903 }
 0x2ee   :  { %v1147_v27 = vadd.f32 1.0, %v5904_v57 }
 0x2ef   :  { %5905 = vrcp.f32 %v1140_v54 }
 0x2f0   :  { %5907 = vrcp.f32 %v1147_v27 }
 0x2fc   :  { %v5906_v59 = vpop.eup %5905 }
 0x2fd   :  { %v1150_v31 = vmul.f32 %v5906_v59, %v1133_v39  ;;  %v5908_v0 = vpop.eup %5907 }
 0x2fe   :  { %v1153_v3 = vsub.f32 1.0, %v5908_v0  ;;  %v1155_v58 = vmul.f32 %v5908_v0, %v6412_v14 }
 0x2ff   :  { %v1151_v63 = vadd.f32 %v1150_v31, %v6324_v56 }
 0x301   :  { %5909 = vtanh.f32 %v1151_v63 }
 0x30e   :  { %v5910_v36 = vpop.eup %5909 }
 0x30f   :  { %v1154_v43 = vmul.f32 %v5910_v36, %v1153_v3 }
 0x311   :  { %v6457_v50 = vadd.f32 %v1155_v58, %v1154_v43 }
 0x313   :  { %5375 = vmatmul.mubr.msk.f32.vlgmr.msra.gmra.mxu1 %vm454_vm2, %v6457_v50  ;;  %5386 = vmatmul.mubr.msk.f32.vlgmr.msra.gmra.mxu0 %vm454_vm2, %v6457_v50 }
 0x314   :  { %5389 = vmatpush3.msra.mxu1 %v6162_v15  ;;  %5396 = vmatprep.mubr.msk.f32.mxu1 %vm6046_vm1, %v6045_v12 }
 0x315   :  { %5390 = vmatprep.subr.mxu1 %v6045_v12  ;;  %5400 = vmatpush3.msra.mxu0 %v6168_v16 }
 0x316   :  { %5391 = vmatpush3.msra.mxu1 %v6184_v18  ;;  %5401 = vmatprep.subr.mxu0 %v6045_v12 }
 0x317   :  { %5392 = vmatprep.subr.mxu1 %v6045_v12  ;;  %5402 = vmatpush3.msra.mxu0 %v6178_v17 }
 0x318   :  { %5393 = vmatpush3.msra.mxu1 %v6213_v21  ;;  %5403 = vmatprep.subr.mxu0 %v6045_v12 }
 0x319   :  { %5394 = vmatprep.subr.mxu1 %v6045_v12  ;;  %5404 = vmatpush3.msra.mxu0 %v6192_v19 }
 0x31a   :  { %5395 = vmatpush3.msra.mxu1 %v6222_v22  ;;  %5405 = vmatprep.subr.mxu0 %v6045_v12 }
 0x31b   :  { %5397 = vmatmul.mubr.msk.f32.vlgmr.msra.gmra.mxu1 %vm454_vm2, %v6457_v50  ;;  %5410 = vmatprep.subr.mxu1 %v6045_v12 }
 0x31c   :  { %5411 = vmatpush3.msra.mxu1 %v6237_v23  ;;  %5406 = vmatpush3.msra.mxu0 %v6202_v20 }
 0x31d   :  { %5412 = vmatprep.subr.mxu1 %v6045_v12  ;;  %5407 = vmatprep.mubr.msk.f32.mxu0 %vm6046_vm1, %v6045_v12 }
 0x31e   :  { %5413 = vmatpush3.msra.mxu1 %v6245_v24  ;;  %5418 = vmatprep.mubr.msk.f32.mxu1 %vm6046_vm1, %v6045_v12 }
 0x31f   :  { %5414 = vmatprep.subr.mxu1 %v6045_v12  ;;  %5421 = vmatprep.subr.mxu0 %v6045_v12 }
 0x320   :  { %5415 = vmatpush3.msra.mxu1 %v6255_v25 }
 0x321   :  { %5416 = vmatprep.subr.mxu1 %v6045_v12 }
 0x322   :  { %5417 = vmatpush3.msra.mxu1 %v6264_v26 }
 0x323   :  { %5432 = vmatprep.subr.mxu1 %v6045_v12 }
 0x3d3   :  { %v1226_v56 = vpop.f32.mrf.mxu1  ;;  %v1296_v4 = vpop.f32.mrf.mxu0 }
 0x3d4   :  { %v1227_v7 = vadd.f32 %v6346_v9, %v1226_v56  ;;  %v1297_v30 = vadd.f32 %v6357_v42, %v1296_v4 }
 0x3d5   :  { %v5376_v49 = vpop.f32.mrf.mxu1  ;;  %v5387_v8 = vpop.f32.mrf.mxu0 }
 0x3d6   :  { %v1370_v46 = vadd.f32 %v1227_v7, %v6291_v29  ;;  %v1377_v48 = vadd.f32 %v1297_v30, %v6321_v55 }
 0x3d8   :  { %v4780_v28 = vmul.f32 -1.442695, %v1370_v46  ;;  %v4781_v34 = vmul.f32 -1.442695, %v1377_v48 }
 0x3da   :  { %5911 = vpow2.f32 %v4780_v28 }
 0x3db   :  { %v1366_v40 = vpop.f32.mrf.mxu1  ;;  %5913 = vpow2.f32 %v4781_v34 }
 0x3dc   :  { %v1367_v51 = vadd.f32 %v6363_v60, %v1366_v40 }
 0x3dd   :  { %v5398_v13 = vpop.f32.mrf.mxu1 }
 0x3e7   :  { %v5912_v35 = vpop.eup %5911 }
 0x3e8   :  { %v1374_v38 = vadd.f32 1.0, %v5912_v35  ;;  %v5914_v44 = vpop.eup %5913 }
 0x3e9   :  { %v1381_v47 = vadd.f32 1.0, %v5914_v44 }
 0x3ea   :  { %5915 = vrcp.f32 %v1374_v38 }
 0x3eb   :  { %5917 = vrcp.f32 %v1381_v47 }
 0x3f7   :  { %v5916_v53 = vpop.eup %5915 }
 0x3f8   :  { %v1384_v29 = vmul.f32 %v5916_v53, %v1367_v51  ;;  %v5918_v57 = vpop.eup %5917 }
 0x3f9   :  { %v1387_v27 = vsub.f32 1.0, %v5918_v57  ;;  %v1389_v55 = vmul.f32 %v5918_v57, %v6457_v50 }
 0x3fa   :  { %v1385_v54 = vadd.f32 %v1384_v29, %v6319_v52 }
 0x3fc   :  { %5919 = vtanh.f32 %v1385_v54 }
 0x409   :  { %v5920_v39 = vpop.eup %5919 }
 0x40a   :  { %v1388_v59 = vmul.f32 %v5920_v39, %v1387_v27 }
 0x40c   :  { %v6502_v31 = vadd.f32 %v1389_v55, %v1388_v59 }
 0x40e   :  { %5408 = vmatmul.mubr.msk.f32.vlgmr.msra.gmra.mxu0 %vm454_vm2, %v6502_v31  ;;  %5419 = vmatmul.mubr.msk.f32.vlgmr.msra.gmra.mxu1 %vm454_vm2, %v6502_v31 }
 0x40f   :  { %5422 = vmatpush3.msra.mxu0 %v6162_v15  ;;  %5429 = vmatprep.mubr.msk.f32.mxu0 %vm6046_vm1, %v6045_v12 }
 0x410   :  { %5423 = vmatprep.subr.mxu0 %v6045_v12  ;;  %5433 = vmatpush3.msra.mxu1 %v6168_v16 }
 0x411   :  { %5424 = vmatpush3.msra.mxu0 %v6184_v18  ;;  %5434 = vmatprep.subr.mxu1 %v6045_v12 }
 0x412   :  { %5425 = vmatprep.subr.mxu0 %v6045_v12  ;;  %5435 = vmatpush3.msra.mxu1 %v6178_v17 }
 0x413   :  { %5426 = vmatpush3.msra.mxu0 %v6213_v21  ;;  %5436 = vmatprep.subr.mxu1 %v6045_v12 }
 0x414   :  { %5427 = vmatprep.subr.mxu0 %v6045_v12  ;;  %5437 = vmatpush3.msra.mxu1 %v6192_v19 }
 0x415   :  { %5428 = vmatpush3.msra.mxu0 %v6222_v22  ;;  %5438 = vmatprep.subr.mxu1 %v6045_v12 }
 0x416   :  { %5430 = vmatmul.mubr.msk.f32.vlgmr.msra.gmra.mxu0 %vm454_vm2, %v6502_v31  ;;  %5443 = vmatprep.subr.mxu0 %v6045_v12 }
 0x417   :  { %5444 = vmatpush3.msra.mxu0 %v6237_v23  ;;  %5439 = vmatpush3.msra.mxu1 %v6202_v20 }
 0x418   :  { %5445 = vmatprep.subr.mxu0 %v6045_v12  ;;  %5440 = vmatprep.mubr.msk.f32.mxu1 %vm6046_vm1, %v6045_v12 }
 0x419   :  { %5446 = vmatpush3.msra.mxu0 %v6245_v24  ;;  %5451 = vmatprep.mubr.msk.f32.mxu0 %vm6046_vm1, %v6045_v12 }
 0x41a   :  { %5447 = vmatprep.subr.mxu0 %v6045_v12  ;;  %5454 = vmatprep.subr.mxu1 %v6045_v12 }
 0x41b   :  { %5448 = vmatpush3.msra.mxu0 %v6255_v25 }
 0x41c   :  { %5449 = vmatprep.subr.mxu0 %v6045_v12 }
 0x41d   :  { %5450 = vmatpush3.msra.mxu0 %v6264_v26 }
 0x41e   :  { %5465 = vmatprep.subr.mxu0 %v6045_v12 }
 0x4ce   :  { %v1460_v52 = vpop.f32.mrf.mxu0  ;;  %v1530_v63 = vpop.f32.mrf.mxu1 }
 0x4cf   :  { %v1461_v0 = vadd.f32 %v6346_v9, %v1460_v52  ;;  %v1531_v56 = vadd.f32 %v6357_v42, %v1530_v63 }
 0x4d0   :  { %v5409_v3 = vpop.f32.mrf.mxu0  ;;  %v5420_v36 = vpop.f32.mrf.mxu1 }
 0x4d1   :  { %v1604_v58 = vadd.f32 %v1461_v0, %v6299_v37  ;;  %v1611_v7 = vadd.f32 %v1531_v56, %v6336_v2 }
 0x4d3   :  { %v4785_v43 = vmul.f32 -1.442695, %v1604_v58  ;;  %v4786_v8 = vmul.f32 -1.442695, %v1611_v7 }
 0x4d5   :  { %5921 = vpow2.f32 %v4785_v43 }
 0x4d6   :  { %v1600_v4 = vpop.f32.mrf.mxu0  ;;  %5923 = vpow2.f32 %v4786_v8 }
 0x4d7   :  { %v1601_v48 = vadd.f32 %v6363_v60, %v1600_v4 }
 0x4d8   :  { %v5431_v49 = vpop.f32.mrf.mxu0 }
 0x4e2   :  { %v5922_v46 = vpop.eup %5921 }
 0x4e3   :  { %v1608_v28 = vadd.f32 1.0, %v5922_v46  ;;  %v5924_v30 = vpop.eup %5923 }
 0x4e4   :  { %v1615_v40 = vadd.f32 1.0, %v5924_v30 }
 0x4e5   :  { %5925 = vrcp.f32 %v1608_v28 }
 0x4e6   :  { %5927 = vrcp.f32 %v1615_v40 }
 0x4f2   :  { %v5926_v13 = vpop.eup %5925 }
 0x4f3   :  { %v1618_v37 = vmul.f32 %v5926_v13, %v1601_v48  ;;  %v5928_v35 = vpop.eup %5927 }
 0x4f4   :  { %v1621_v38 = vsub.f32 1.0, %v5928_v35  ;;  %v1623_v2 = vmul.f32 %v5928_v35, %v6502_v31 }
 0x4f5   :  { %v1619_v34 = vadd.f32 %v1618_v37, %v6334_v1 }
 0x4f7   :  { %5929 = vtanh.f32 %v1619_v34 }
 0x504   :  { %v5930_v44 = vpop.eup %5929 }
 0x505   :  { %v1622_v47 = vmul.f32 %v5930_v44, %v1621_v38 }
 0x507   :  { %v6547_v51 = vadd.f32 %v1623_v2, %v1622_v47 }
 0x509   :  { %5441 = vmatmul.mubr.msk.f32.vlgmr.msra.gmra.mxu1 %vm454_vm2, %v6547_v51  ;;  %5452 = vmatmul.mubr.msk.f32.vlgmr.msra.gmra.mxu0 %vm454_vm2, %v6547_v51 }
 0x50a   :  { %5455 = vmatpush3.msra.mxu1 %v6162_v15  ;;  %5462 = vmatprep.mubr.msk.f32.mxu1 %vm6046_vm1, %v6045_v12 }
 0x50b   :  { %5456 = vmatprep.subr.mxu1 %v6045_v12  ;;  %5466 = vmatpush3.msra.mxu0 %v6168_v16 }
 0x50c   :  { %5457 = vmatpush3.msra.mxu1 %v6184_v18  ;;  %5467 = vmatprep.subr.mxu0 %v6045_v12 }
 0x50d   :  { %5458 = vmatprep.subr.mxu1 %v6045_v12  ;;  %5468 = vmatpush3.msra.mxu0 %v6178_v17 }
 0x50e   :  { %5459 = vmatpush3.msra.mxu1 %v6213_v21  ;;  %5469 = vmatprep.subr.mxu0 %v6045_v12 }
 0x50f   :  { %5460 = vmatprep.subr.mxu1 %v6045_v12  ;;  %5470 = vmatpush3.msra.mxu0 %v6192_v19 }
 0x510   :  { %5461 = vmatpush3.msra.mxu1 %v6222_v22  ;;  %5471 = vmatprep.subr.mxu0 %v6045_v12 }
 0x511   :  { %5463 = vmatmul.mubr.msk.f32.vlgmr.msra.gmra.mxu1 %vm454_vm2, %v6547_v51  ;;  %5476 = vmatprep.subr.mxu1 %v6045_v12 }
 0x512   :  { %5477 = vmatpush3.msra.mxu1 %v6237_v23  ;;  %5472 = vmatpush3.msra.mxu0 %v6202_v20 }
 0x513   :  { %5478 = vmatprep.subr.mxu1 %v6045_v12  ;;  %5473 = vmatprep.mubr.msk.f32.mxu0 %vm6046_vm1, %v6045_v12 }
 0x514   :  { %5479 = vmatpush3.msra.mxu1 %v6245_v24  ;;  %5484 = vmatprep.mubr.msk.f32.mxu1 %vm6046_vm1, %v6045_v12 }
 0x515   :  { %5480 = vmatprep.subr.mxu1 %v6045_v12  ;;  %5487 = vmatprep.subr.mxu0 %v6045_v12 }
 0x516   :  { %5481 = vmatpush3.msra.mxu1 %v6255_v25 }
 0x517   :  { %5482 = vmatprep.subr.mxu1 %v6045_v12 }
 0x518   :  { %5483 = vmatpush3.msra.mxu1 %v6264_v26 }
 0x519   :  { %5498 = vmatprep.subr.mxu1 %v6045_v12 }
 0x5c9   :  { %v1694_v1 = vpop.f32.mrf.mxu1  ;;  %v1764_v53 = vpop.f32.mrf.mxu0 }
 0x5ca   :  { %v1695_v29 = vadd.f32 %v6346_v9, %v1694_v1  ;;  %v1765_v55 = vadd.f32 %v6357_v42, %v1764_v53 }
 0x5cb   :  { %v5442_v54 = vpop.f32.mrf.mxu1  ;;  %v5453_v57 = vpop.f32.mrf.mxu0 }
 0x5cc   :  { %v1838_v27 = vadd.f32 %v1695_v29, %v6295_v33  ;;  %v1845_v52 = vadd.f32 %v1765_v55, %v6331_v62  ;;  %v2329_v29 = vld [vmem:[%s7322_s5 + $0x10] sm:$0xff]  ;;  %v2328_v54 = vld [vmem:[%s7322_s5 + $0x8] sm:$0xff]  ;;  %v6044_v55 = vld [vmem:[%s7319_s2 + $0x40] sm:$0xff] }
 0x5cd   :  { %v6042_v57 = vld [vmem:[%s7319_s2 + $0x50] sm:$0xff] }
 0x5ce   :  { %v4790_v39 = vmul.f32 -1.442695, %v1838_v27  ;;  %v4791_v0 = vmul.f32 -1.442695, %v1845_v52  ;;  %v2327_v27 = vld [vmem:[%s7322_s5] sm:$0xff]  ;;  %v4804_v52 = vld [vmem:[%s7322_s5 + $0x30] sm:$0xff] }
 0x5d0   :  { %5931 = vpow2.f32 %v4790_v39  ;;  %v6043_v39 = vld [vmem:[%s7319_s2 + $0x48] sm:$0xff] }
 0x5d1   :  { %v1834_v59 = vpop.f32.mrf.mxu1  ;;  %5933 = vpow2.f32 %v4791_v0  ;;  %v4802_v0 = vld [vmem:[%s7322_s5 + $0x20] sm:$0xff] }
 0x5d2   :  { %v1835_v56 = vadd.f32 %v6363_v60, %v1834_v59  ;;  %v4805_v59 = vld [vmem:[%s7322_s5 + $0x38] sm:$0xff] }
 0x5d3   :  { %v5464_v63 = vpop.f32.mrf.mxu1 }
 0x5d4   :  { %v4803_v63 = vld [vmem:[%s7322_s5 + $0x28] sm:$0xff] }
 0x5dd   :  { %v5932_v3 = vpop.eup %5931 }
 0x5de   :  { %v1842_v36 = vadd.f32 1.0, %v5932_v3  ;;  %v5934_v58 = vpop.eup %5933  ;;  %v6717_v3 = vld [vmem:[%s7323_s6 + $0x18] sm:$0xff] }
 0x5df   :  { %v1849_v43 = vadd.f32 1.0, %v5934_v58  ;;  %v4809_v58 = vld [vmem:[%s7322_s5 + $0x58] sm:$0xff] }
 0x5e0   :  { %5935 = vrcp.f32 %v1842_v36  ;;  %v6722_v36 = vld [vmem:[%s7323_s6 + $0x10] sm:$0xff] }
 0x5e1   :  { %5937 = vrcp.f32 %v1849_v43  ;;  %v4808_v43 = vld [vmem:[%s7322_s5 + $0x50] sm:$0xff] }
 0x5ed   :  { %v5936_v4 = vpop.eup %5935 }
 0x5ee   :  { %v1852_v33 = vmul.f32 %v5936_v4, %v1835_v56  ;;  %v5938_v49 = vpop.eup %5937  ;;  %v6735_v56 = vld [vmem:[%s7323_s6 + $0x8] sm:$0xff] }
 0x5ef   :  { %v1855_v8 = vsub.f32 1.0, %v5938_v49  ;;  %v1857_v62 = vmul.f32 %v5938_v49, %v6547_v51  ;;  %v4807_v4 = vld [vmem:[%s7322_s5 + $0x48] sm:$0xff] }
 0x5f0   :  { %v1853_v7 = vadd.f32 %v1852_v33, %v6329_v61  ;;  %v6745_v33 = vld [vmem:[%s7323_s6] sm:$0xff] }
 0x5f2   :  { %5939 = vtanh.f32 %v1853_v7  ;;  %v4806_v7 = vld [vmem:[%s7322_s5 + $0x40] sm:$0xff] }
 0x5ff   :  { %v5940_v46 = vpop.eup %5939 }
 0x600   :  { %v1856_v28 = vmul.f32 %v5940_v46, %v1855_v8 }
 0x602   :  { %v6592_v30 = vadd.f32 %v1857_v62, %v1856_v28 }
 0x604   :  { %5474 = vmatmul.mubr.msk.f32.vlgmr.msra.gmra.mxu0 %vm454_vm2, %v6592_v30  ;;  %5485 = vmatmul.mubr.msk.f32.vlgmr.msra.gmra.mxu1 %vm454_vm2, %v6592_v30 }
 0x605   :  { %5488 = vmatpush3.msra.mxu0 %v6162_v15  ;;  %5495 = vmatprep.mubr.msk.f32.mxu0 %vm6046_vm1, %v6045_v12  ;;  %v2330_v15 = vld [vmem:[%s7322_s5 + $0x18] sm:$0xff] }
 0x606   :  { %5489 = vmatprep.subr.mxu0 %v6045_v12  ;;  %5499 = vmatpush3.msra.mxu1 %v6168_v16 }
 0x607   :  { %5490 = vmatpush3.msra.mxu0 %v6184_v18  ;;  %5500 = vmatprep.subr.mxu1 %v6045_v12 }
 0x608   :  { %5491 = vmatprep.subr.mxu0 %v6045_v12  ;;  %5501 = vmatpush3.msra.mxu1 %v6178_v17 }
 0x609   :  { %5492 = vmatpush3.msra.mxu0 %v6213_v21  ;;  %5502 = vmatprep.subr.mxu1 %v6045_v12 }
 0x60a   :  { %5493 = vmatprep.subr.mxu0 %v6045_v12  ;;  %5503 = vmatpush3.msra.mxu1 %v6192_v19 }
 0x60b   :  { %5494 = vmatpush3.msra.mxu0 %v6222_v22  ;;  %5504 = vmatprep.subr.mxu1 %v6045_v12 }
 0x60c   :  { %5496 = vmatmul.mubr.msk.f32.vlgmr.msra.gmra.mxu0 %vm454_vm2, %v6592_v30  ;;  %5509 = vmatprep.subr.mxu0 %v6045_v12 }
 0x60d   :  { %5510 = vmatpush3.msra.mxu0 %v6237_v23  ;;  %5505 = vmatpush3.msra.mxu1 %v6202_v20 }
 0x60e   :  { %5511 = vmatprep.subr.mxu0 %v6045_v12  ;;  %5506 = vmatprep.mubr.msk.f32.mxu1 %vm6046_vm1, %v6045_v12 }
 0x60f   :  { %5512 = vmatpush3.msra.mxu0 %v6245_v24  ;;  %5517 = vmatprep.mubr.msk.f32.mxu0 %vm6046_vm1, %v6045_v12 }
 0x610   :  { %5513 = vmatprep.subr.mxu0 %v6045_v12  ;;  %5520 = vmatprep.subr.mxu1 %v6045_v12 }
 0x611   :  { %5514 = vmatpush3.msra.mxu0 %v6255_v25 }
 0x612   :  { %5515 = vmatprep.subr.mxu0 %v6045_v12 }
 0x613   :  { %5516 = vmatpush3.msra.mxu0 %v6264_v26 }
 0x614   :  { %5531 = vmatprep.subr.mxu0 %v2330_v15 }
 0x6c4   :  { %v1928_v16 = vpop.f32.mrf.mxu0  ;;  %v1998_v17 = vpop.f32.mrf.mxu1 }
 0x6c5   :  { %v1929_v18 = vadd.f32 %v6346_v9, %v1928_v16  ;;  %v1999_v23 = vadd.f32 %v6357_v42, %v1998_v17 }
 0x6c6   :  { %v5475_v19 = vpop.f32.mrf.mxu0  ;;  %v5486_v20 = vpop.f32.mrf.mxu1 }
 0x6c7   :  { %v2072_v21 = vadd.f32 %v1929_v18, %v6311_v45  ;;  %v2079_v25 = vadd.f32 %v1999_v23, %v6351_v11 }
 0x6c9   :  { %v4795_v22 = vmul.f32 -1.442695, %v2072_v21  ;;  %v4796_v61 = vmul.f32 -1.442695, %v2079_v25 }
 0x6cb   :  { %5941 = vpow2.f32 %v4795_v22 }
 0x6cc   :  { %v2068_v24 = vpop.f32.mrf.mxu0  ;;  %5943 = vpow2.f32 %v4796_v61 }
 0x6cd   :  { %v2069_v34 = vadd.f32 %v6363_v60, %v2068_v24 }
 0x6ce   :  { %v5497_v26 = vpop.f32.mrf.mxu0 }
 0x6d8   :  { %v5942_v40 = vpop.eup %5941 }
 0x6d9   :  { %v2076_v48 = vadd.f32 1.0, %v5942_v40  ;;  %v5944_v13 = vpop.eup %5943 }
 0x6da   :  { %v2083_v37 = vadd.f32 1.0, %v5944_v13 }
 0x6db   :  { %5945 = vrcp.f32 %v2076_v48 }
 0x6dc   :  { %5947 = vrcp.f32 %v2083_v37 }
 0x6e8   :  { %v5946_v35 = vpop.eup %5945 }
 0x6e9   :  { %v2086_v45 = vmul.f32 %v5946_v35, %v2069_v34  ;;  %v5948_v44 = vpop.eup %5947  ;;  %v6815_v34 = vld [vmem:[%s7323_s6 + $0x50] sm:$0xff] }
 0x6ea   :  { %v2089_v2 = vsub.f32 1.0, %v5948_v44  ;;  %v2091_v11 = vmul.f32 %v5948_v44, %v6592_v30 }
 0x6eb   :  { %v2087_v38 = vadd.f32 %v2086_v45, %v6349_v10  ;;  %v6041_v10 = vld [vmem:[%s7319_s2 + $0x58] sm:$0xff] }
 0x6ed   :  { %5949 = vtanh.f32 %v2087_v38 }
 0x6fa   :  { %v5950_v47 = vpop.eup %5949 }
 0x6fb   :  { %v2090_v1 = vmul.f32 %v5950_v47, %v2089_v2 }
 0x6fd   :  { %v6639_v53 = vadd.f32 %v2091_v11, %v2090_v1 }
 0x6ff   :  { %5507 = vmatmul.mubr.msk.f32.vlgmr.msra.gmra.mxu1 %vm454_vm2, %v6639_v53  ;;  %5518 = vmatmul.mubr.msk.f32.vlgmr.msra.gmra.mxu0 %vm454_vm2, %v6639_v53 }
 0x700   :  { %5521 = vmatpush3.msra.mxu1 %v6041_v10  ;;  %5532 = vmatpush3.msra.mxu0 %v2330_v15 }
 0x701   :  { %5522 = vmatprep.subr.mxu1 %v6045_v12  ;;  %5533 = vmatprep.subr.mxu0 %v2329_v29 }
 0x702   :  { %5539 = vmatprep.mubr.msk.f32.mxu0 %vm454_vm2, %v6367_v32  ;;  %5523 = vmatpush3.msra.mxu1 %v6042_v57 }
 0x703   :  { %5534 = vmatpush3.msra.mxu0 %v2329_v29  ;;  %5524 = vmatprep.subr.mxu1 %v6045_v12 }
 0x704   :  { %5535 = vmatprep.subr.mxu0 %v2328_v54  ;;  %5525 = vmatpush3.msra.mxu1 %v6043_v39 }
 0x705   :  { %5536 = vmatpush3.msra.mxu0 %v2328_v54  ;;  %5526 = vmatprep.subr.mxu1 %v6045_v12 }
 0x706   :  { %5537 = vmatprep.subr.mxu0 %v2327_v27  ;;  %5527 = vmatpush3.msra.mxu1 %v6044_v55  ;;  %v4843_v55 = vld [vmem:[%s7325_s7 + $0x2] ss:$0 sm:$0xff] }
 0x707   :  { %5528 = vmatprep.mubr.msk.f32.mxu1 %vm6046_vm1, %v6045_v12  ;;  %5538 = vmatpush3.msra.mxu0 %v2327_v27 }
 0x708   :  { %5529 = vmatmul.mubr.msk.f32.vlgmr.msra.gmra.mxu1 %vm454_vm2, %v6639_v53  ;;  %5540 = vmatmul.mubr.msk.f32.vlgmr.msra.gmra.mxu0 %vm454_vm2, %v6412_v14 }
 0x709   :  { %5551 = vmatprep.subr.mxu1 %v4805_v59  ;;  %5542 = vmatprep.mubr.msk.f32.mxu0 %vm454_vm2, %v6457_v50 }
 0x70a   :  { %5552 = vmatpush3.msra.mxu1 %v4805_v59  ;;  %5559 = vmatprep.mubr.msk.f32.mxu1 %vm454_vm2, %v6367_v32  ;;  %v6906_v59 = vld [vmem:[%s7324_s8] ss:$0 sm:$0xff] }
 0x70b   :  { %5553 = vmatprep.subr.mxu1 %v4804_v52  ;;  %5571 = vmatprep.subr.mxu0 %v4809_v58 }
 0x70c   :  { %5554 = vmatpush3.msra.mxu1 %v4804_v52  ;;  %5543 = vmatmul.mubr.msk.f32.gmra.mxu0 %vm454_vm2, %v6502_v31  ;;  %v6911_v52 = vld [vmem:[%s7325_s7] ss:$0 sm:$0xff] }
 0x70d   :  { %5555 = vmatprep.subr.mxu1 %v4803_v63  ;;  %5545 = vmatprep.mubr.msk.f32.mxu0 %vm454_vm2, %v6547_v51 }
 0x70e   :  { %5556 = vmatpush3.msra.mxu1 %v4803_v63  ;;  %5572 = vmatpush3.msra.mxu0 %v4809_v58 }
 0x70f   :  { %5557 = vmatprep.subr.mxu1 %v4802_v0  ;;  %5573 = vmatprep.subr.mxu0 %v4808_v43 }
 0x710   :  { %5558 = vmatpush3.msra.mxu1 %v4802_v0  ;;  %5546 = vmatmul.mubr.msk.f32.gmra.mxu0 %vm454_vm2, %v6592_v30 }
 0x711   :  { %5560 = vmatmul.mubr.msk.f32.vlgmr.msra.gmra.mxu1 %vm454_vm2, %v6412_v14  ;;  %5548 = vmatprep.mubr.msk.f32.mxu0 %vm454_vm2, %v6639_v53 }
 0x712   :  { %5562 = vmatprep.mubr.msk.f32.mxu1 %vm454_vm2, %v6457_v50  ;;  %5591 = vmatprep.subr.mxu1 %v6045_v12 }
 0x713   :  { %5592 = vmatpush3.msra.mxu1 %v6717_v3  ;;  %5574 = vmatpush3.msra.mxu0 %v4808_v43 }
 0x714   :  { %5593 = vmatprep.subr.mxu1 %v6045_v12  ;;  %5575 = vmatprep.subr.mxu0 %v4807_v4 }
 0x715   :  { %5563 = vmatmul.mubr.msk.f32.gmra.mxu1 %vm454_vm2, %v6502_v31  ;;  %5576 = vmatpush3.msra.mxu0 %v4807_v4 }
 0x716   :  { %5565 = vmatprep.mubr.msk.f32.mxu1 %vm454_vm2, %v6547_v51  ;;  %5594 = vmatpush3.msra.mxu1 %v6722_v36 }
 0x717   :  { %5595 = vmatprep.subr.mxu1 %v6045_v12  ;;  %5577 = vmatprep.subr.mxu0 %v4806_v7 }
 0x718   :  { %5596 = vmatpush3.msra.mxu1 %v6735_v56  ;;  %5578 = vmatpush3.msra.mxu0 %v4806_v7 }
 0x719   :  { %5566 = vmatmul.mubr.msk.f32.gmra.mxu1 %vm454_vm2, %v6592_v30  ;;  %5597 = vmatprep.subr.mxu1 %v6045_v12 }
 0x71a   :  { %5568 = vmatprep.mubr.msk.f32.mxu1 %vm454_vm2, %v6639_v53  ;;  %5598 = vmatpush3.msra.mxu1 %v6745_v33 }
 0x71b   :  { %5602 = vmatprep.subr.mxu1 %v6045_v12  ;;  %5613 = vmatprep.subr.mxu0 %v6045_v12 }
 0x7bf   :  { %v2162_v49 = vpop.f32.mrf.mxu1  ;;  %v2232_v8 = vpop.f32.mrf.mxu0 }
 0x7c0   :  { %v2163_v46 = vadd.f32 %v6346_v9, %v2162_v49  ;;  %v2233_v17 = vadd.f32 %v6357_v42, %v2232_v8 }
 0x7c1   :  { %v5508_v62 = vpop.f32.mrf.mxu1  ;;  %v5519_v28 = vpop.f32.mrf.mxu0 }
 0x7c2   :  { %v2306_v15 = vadd.f32 %v2163_v46, %v6306_v41  ;;  %v2313_v18 = vadd.f32 %v2233_v17, %v6341_v6 }
 0x7c4   :  { %v4800_v16 = vmul.f32 -1.442695, %v2306_v15  ;;  %v4801_v21 = vmul.f32 -1.442695, %v2313_v18  ;;  %v6929_v18 = vld [vmem:[%s7325_s7 + $0x1] ss:$0 sm:$0xff] }
 0x7c6   :  { %5951 = vpow2.f32 %v4800_v16  ;;  %v6922_v16 = vld [vmem:[%s7324_s8 + $0x1] ss:$0 sm:$0xff] }
 0x7c7   :  { %5953 = vpow2.f32 %v4801_v21 }
 0x7c8   :  { %v2302_v19 = vpop.f32.mrf.mxu1 }
 0x7c9   :  { %v2303_v9 = vadd.f32 %v6363_v60, %v2302_v19  ;;  %v6784_v60 = vld [vmem:[%s7323_s6 + $0x30] sm:$0xff] }
 0x7ca   :  { %v5530_v20 = vpop.f32.mrf.mxu1 }
 0x7d1   :  { %v6874_v35 = vpop.f32.mrf.mxu1 }
 0x7d3   :  { %v5952_v22 = vpop.eup %5951  ;;  %v2569_v38 = vpop.f32.mrf.mxu1 }
 0x7d4   :  { %v2310_v23 = vadd.f32 1.0, %v5952_v22  ;;  %v5954_v24 = vpop.eup %5953  ;;  %v2570_v21 = vadd.f32 %v6929_v18, %v2569_v38 }
 0x7d5   :  { %v2317_v25 = vadd.f32 1.0, %v5954_v24  ;;  %v6878_v2 = vpop.f32.mrf.mxu1 }
 0x7d6   :  { %5955 = vrcp.f32 %v2310_v23 }
 0x7d7   :  { %5957 = vrcp.f32 %v2317_v25  ;;  %v6882_v11 = vpop.f32.mrf.mxu1 }
 0x7e3   :  { %v5956_v26 = vpop.eup %5955 }
 0x7e4   :  { %v2320_v41 = vmul.f32 %v5956_v26, %v2303_v9  ;;  %v5958_v42 = vpop.eup %5957 }
 0x7e5   :  { %v2323_v40 = vsub.f32 1.0, %v5958_v42  ;;  %v2325_v48 = vmul.f32 %v5958_v42, %v6639_v53 }
 0x7e6   :  { %v2321_v61 = vadd.f32 %v2320_v41, %v6339_v5  ;;  %v6775_v5 = vld [vmem:[%s7323_s6 + $0x38] sm:$0xff] }
 0x7e8   :  { %5959 = vtanh.f32 %v2321_v61 }
 0x7f5   :  { %v5960_v6 = vpop.eup %5959 }
 0x7f6   :  { %v2324_v13 = vmul.f32 %v5960_v6, %v2323_v40 }
 0x7f8   :  { %v6762_v37 = vadd.f32 %v2325_v48, %v2324_v13 }
 0x7fa   :  { %5549 = vmatmul.mubr.msk.f32.gmra.mxu0 %vm454_vm2, %v6762_v37  ;;  %5569 = vmatmul.mubr.msk.f32.gmra.mxu1 %vm454_vm2, %v6762_v37 }
 0x7fb   :  { %5579 = vmatprep.mubr.msk.f32.mxu0 %vm454_vm2, %v6367_v32  ;;  %5599 = vmatprep.mubr.msk.f32.mxu1 %vm6046_vm1, %v6045_v12  ;;  %v6789_v32 = vld [vmem:[%s7323_s6 + $0x58] sm:$0xff] }
 0x7fe   :  { %5580 = vmatmul.mubr.msk.f32.vlgmr.msra.gmra.mxu0 %vm454_vm2, %v6412_v14  ;;  %5600 = vmatmul.mubr.msk.f32.vlgmr.msra.gmra.mxu1 %vm454_vm2, %v6762_v37  ;;  %v6798_v14 = vld [vmem:[%s7323_s6 + $0x28] sm:$0xff] }
 0x7ff   :  { %5603 = vmatpush3.msra.mxu1 %v6775_v5  ;;  %5582 = vmatprep.mubr.msk.f32.mxu0 %vm454_vm2, %v6457_v50  ;;  %v6810_v50 = vld [vmem:[%s7323_s6 + $0x20] sm:$0xff] }
 0x800   :  { %5604 = vmatprep.subr.mxu1 %v6045_v12  ;;  %5610 = vmatprep.mubr.msk.f32.mxu1 %vm6046_vm1, %v6045_v12 }
 0x801   :  { %5605 = vmatpush3.msra.mxu1 %v6784_v60  ;;  %5614 = vmatpush3.msra.mxu0 %v6789_v32 }
 0x802   :  { %5606 = vmatprep.subr.mxu1 %v6045_v12  ;;  %5583 = vmatmul.mubr.msk.f32.gmra.mxu0 %vm454_vm2, %v6502_v31  ;;  %v6827_v31 = vld [vmem:[%s7323_s6 + $0x48] sm:$0xff] }
 0x803   :  { %5607 = vmatpush3.msra.mxu1 %v6798_v14  ;;  %5585 = vmatprep.mubr.msk.f32.mxu0 %vm454_vm2, %v6547_v51  ;;  %v6840_v51 = vld [vmem:[%s7323_s6 + $0x40] sm:$0xff] }
 0x804   :  { %5608 = vmatprep.subr.mxu1 %v6045_v12  ;;  %5615 = vmatprep.subr.mxu0 %v6045_v12 }
 0x805   :  { %5609 = vmatpush3.msra.mxu1 %v6810_v50  ;;  %5616 = vmatpush3.msra.mxu0 %v6815_v34 }
 0x806   :  { %5611 = vmatmul.mubr.msk.f32.vlgmr.msra.gmra.mxu1 %vm454_vm2, %v6762_v37  ;;  %5586 = vmatmul.mubr.msk.f32.gmra.mxu0 %vm454_vm2, %v6592_v30  ;;  %v6872_v30 = vpop.f32.mrf.mxu0 }
 0x807   :  { %5588 = vmatprep.mubr.msk.f32.mxu0 %vm454_vm2, %v6639_v53  ;;  %5617 = vmatprep.subr.mxu0 %v6045_v12  ;;  %v6886_v53 = vpop.f32.mrf.mxu1 }
 0x808   :  { %5618 = vmatpush3.msra.mxu0 %v6827_v31  ;;  %5624 = vmatprep.subr.mxu1 %v6045_v12  ;;  %v2458_v45 = vpop.f32.mrf.mxu0 }
 0x809   :  { %5619 = vmatprep.subr.mxu0 %v6045_v12  ;;  %5625 = vmatpush3.msra.mxu1 %v6717_v3  ;;  %v6890_v10 = vpop.f32.mrf.mxu1  ;;  %v2459_v58 = vadd.f32 %v6911_v52, %v2458_v45 }
 0x80a   :  { %5589 = vmatmul.mubr.msk.f32.gmra.mxu0 %vm454_vm2, %v6762_v37  ;;  %5626 = vmatprep.subr.mxu1 %v6045_v12  ;;  %v6876_v44 = vpop.f32.mrf.mxu0 }
 0x80b   :  { %5620 = vmatpush3.msra.mxu0 %v6840_v51  ;;  %5621 = vmatprep.mubr.msk.f32.mxu0 %vm6046_vm1, %v6045_v12 }
 0x80c   :  { %5635 = vmatprep.subr.mxu0 %v6045_v12  ;;  %5627 = vmatpush3.msra.mxu1 %v6722_v36  ;;  %v6880_v47 = vpop.f32.mrf.mxu0 }
 0x80d   :  { %5628 = vmatprep.subr.mxu1 %v6045_v12  ;;  %5632 = vmatprep.mubr.msk.f32.mxu1 %vm6046_vm1, %v6045_v12 }
 0x80e   :  { %5622 = vmatmul.mubr.msk.f32.vlgmr.msra.gmra.mxu0 %vm454_vm2, %v6762_v37  ;;  %5629 = vmatpush3.msra.mxu1 %v6735_v56  ;;  %v6884_v1 = vpop.f32.mrf.mxu0 }
 0x80f   :  { %5636 = vmatpush3.msra.mxu0 %v6775_v5  ;;  %5630 = vmatprep.subr.mxu1 %v6045_v12 }
 0x810   :  { %5637 = vmatprep.subr.mxu0 %v6045_v12  ;;  %5631 = vmatpush3.msra.mxu1 %v6745_v33  ;;  %v6888_v29 = vpop.f32.mrf.mxu0 }
 0x811   :  { %5638 = vmatpush3.msra.mxu0 %v6784_v60  ;;  %5643 = vmatprep.mubr.msk.f32.mxu0 %vm6046_vm1, %v6045_v12 }
 0x812   :  { %5639 = vmatprep.subr.mxu0 %v6045_v12  ;;  %5646 = vmatprep.subr.mxu1 %v6045_v12 }
 0x813   :  { %5640 = vmatpush3.msra.mxu0 %v6798_v14 }
 0x814   :  { %5641 = vmatprep.subr.mxu0 %v6045_v12 }
 0x815   :  { %5642 = vmatpush3.msra.mxu0 %v6810_v50 }
 0x816   :  { %5657 = vmatprep.subr.mxu0 %v6045_v12 }
 0x8ba   :  { %v6892_v54 = vpop.f32.mrf.mxu0  ;;  %v6894_v57 = vpop.f32.mrf.mxu1 }
 0x8bc   :  { %v6896_v27 = vpop.f32.mrf.mxu0  ;;  %v6898_v39 = vpop.f32.mrf.mxu1 }
 0x8be   :  { %v5581_v63 = vpop.f32.mrf.mxu0  ;;  %v2785_v0 = vpop.f32.mrf.mxu1 }
 0x8bf   :  { %v6914_v43 = vadd.f32 %v5581_v63, %v4843_v55  ;;  %v2786_v4 = vadd.f32 %v6906_v59, %v2785_v0  ;;  %v6944_v0 = vld [vmem:[%s7324_s8 + $0x2] ss:$0 sm:$0xff] }
 0x8c0   :  { %v2680_v7 = vpop.f32.mrf.mxu0  ;;  %v5601_v49 = vpop.f32.mrf.mxu1 }
 0x8c1   :  { %v2929_v8 = vadd.f32 %v2786_v4, %v2459_v58 }
 0x8c2   :  { %v5584_v46 = vpop.f32.mrf.mxu0 }
 0x8c3   :  { %v4855_v62 = vmul.f32 -1.442695, %v2929_v8  ;;  %v6917_v28 = vadd.f32 %v5584_v46, %v4843_v55  ;;  %v2681_v8 = vadd.f32 %v4843_v55, %v2680_v7  ;;  %v2464_v7 = vadd.f32 %v6872_v30, %v6911_v52 }
 0x8c4   :  { %v2690_v15 = vpop.f32.mrf.mxu0 }
 0x8c5   :  { %5961 = vpow2.f32 %v4855_v62  ;;  %v6924_v17 = vadd.f32 %v4843_v55, %v2690_v15 }
 0x8c6   :  { %v2855_v19 = vpop.f32.mrf.mxu1  ;;  %v5587_v20 = vpop.f32.mrf.mxu0 }
 0x8c7   :  { %v2856_v22 = vadd.f32 %v6922_v16, %v2855_v19  ;;  %v6933_v23 = vadd.f32 %v5587_v20, %v4843_v55 }
 0x8c8   :  { %v5612_v24 = vpop.f32.mrf.mxu1  ;;  %v2700_v25 = vpop.f32.mrf.mxu0 }
 0x8c9   :  { %v2936_v9 = vadd.f32 %v2856_v22, %v2570_v21  ;;  %v6935_v26 = vadd.f32 %v4843_v55, %v2700_v25 }
 0x8ca   :  { %v5590_v41 = vpop.f32.mrf.mxu0 }
 0x8cb   :  { %v4856_v61 = vmul.f32 -1.442695, %v2936_v9  ;;  %v6937_v42 = vadd.f32 %v5590_v41, %v4843_v55 }
 0x8cc   :  { %v2710_v40 = vpop.f32.mrf.mxu0 }
 0x8cd   :  { %v6939_v6 = vadd.f32 %v4843_v55, %v2710_v40  ;;  %5963 = vpow2.f32 %v4856_v61 }
 0x8ce   :  { %v2925_v48 = vpop.f32.mrf.mxu0 }
 0x8cf   :  { %v2926_v4 = vadd.f32 %v6944_v0, %v2925_v48 }
 0x8d0   :  { %v5623_v13 = vpop.f32.mrf.mxu0 }
 0x8d1   :  { %v2575_v13 = vadd.f32 %v6874_v35, %v6929_v18 }
 0x8d2   :  { %v5962_v45 = vpop.eup %5961 }
 0x8d3   :  { %v2933_v38 = vadd.f32 1.0, %v5962_v45 }
 0x8d5   :  { %5965 = vrcp.f32 %v2933_v38 }
 0x8da   :  { %v5964_v63 = vpop.eup %5963 }
 0x8db   :  { %v2940_v58 = vadd.f32 1.0, %v5964_v63 }
 0x8dd   :  { %5967 = vrcp.f32 %v2940_v58 }
 0x8e2   :  { %v5966_v49 = vpop.eup %5965 }
 0x8e3   :  { %v2943_v46 = vmul.f32 %v5966_v49, %v2926_v4 }
 0x8e5   :  { %v2944_v62 = vadd.f32 %v2943_v46, %v2681_v8 }
 0x8e7   :  { %5969 = vtanh.f32 %v2944_v62 }
 0x8ea   :  { %v5968_v15 = vpop.eup %5967 }
 0x8eb   :  { %v2946_v19 = vsub.f32 1.0, %v5968_v15  ;;  %v2948_v22 = vmul.f32 %v5968_v15, %v6762_v37 }
 0x8f4   :  { %v5970_v20 = vpop.eup %5969 }
 0x8f5   :  { %v2947_v21 = vmul.f32 %v5970_v20, %v2946_v19 }
 0x8f7   :  { %v6948_v24 = vadd.f32 %v2948_v22, %v2947_v21 }
 0x8f9   :  { %5633 = vmatmul.mubr.msk.f32.vlgmr.msra.gmra.mxu1 %vm454_vm2, %v6948_v24  ;;  %5644 = vmatmul.mubr.msk.f32.vlgmr.msra.gmra.mxu0 %vm454_vm2, %v6948_v24 }
 0x8fa   :  { %5647 = vmatpush3.msra.mxu1 %v6789_v32  ;;  %5654 = vmatprep.mubr.msk.f32.mxu1 %vm6046_vm1, %v6045_v12 }
 0x8fb   :  { %5648 = vmatprep.subr.mxu1 %v6045_v12  ;;  %5658 = vmatpush3.msra.mxu0 %v6717_v3 }
 0x8fc   :  { %5649 = vmatpush3.msra.mxu1 %v6815_v34  ;;  %5659 = vmatprep.subr.mxu0 %v6045_v12 }
 0x8fd   :  { %5650 = vmatprep.subr.mxu1 %v6045_v12  ;;  %5660 = vmatpush3.msra.mxu0 %v6722_v36 }
 0x8fe   :  { %5651 = vmatpush3.msra.mxu1 %v6827_v31  ;;  %5661 = vmatprep.subr.mxu0 %v6045_v12 }
 0x8ff   :  { %5652 = vmatprep.subr.mxu1 %v6045_v12  ;;  %5662 = vmatpush3.msra.mxu0 %v6735_v56 }
 0x900   :  { %5653 = vmatpush3.msra.mxu1 %v6840_v51  ;;  %5663 = vmatprep.subr.mxu0 %v6045_v12 }
 0x901   :  { %5655 = vmatmul.mubr.msk.f32.vlgmr.msra.gmra.mxu1 %vm454_vm2, %v6948_v24  ;;  %5668 = vmatprep.subr.mxu1 %v6045_v12 }
 0x902   :  { %5669 = vmatpush3.msra.mxu1 %v6775_v5  ;;  %5664 = vmatpush3.msra.mxu0 %v6745_v33 }
 0x903   :  { %5670 = vmatprep.subr.mxu1 %v6045_v12  ;;  %5665 = vmatprep.mubr.msk.f32.mxu0 %vm6046_vm1, %v6045_v12 }
 0x904   :  { %5671 = vmatpush3.msra.mxu1 %v6784_v60  ;;  %5676 = vmatprep.mubr.msk.f32.mxu1 %vm6046_vm1, %v6045_v12 }
 0x905   :  { %5672 = vmatprep.subr.mxu1 %v6045_v12  ;;  %5679 = vmatprep.subr.mxu0 %v6045_v12 }
 0x906   :  { %5673 = vmatpush3.msra.mxu1 %v6798_v14 }
 0x907   :  { %5674 = vmatprep.subr.mxu1 %v6045_v12 }
 0x908   :  { %5675 = vmatpush3.msra.mxu1 %v6810_v50 }
 0x909   :  { %5690 = vmatprep.subr.mxu1 %v6045_v12 }
 0x9b9   :  { %v3019_v37 = vpop.f32.mrf.mxu1  ;;  %v3089_v55 = vpop.f32.mrf.mxu0 }
 0x9ba   :  { %v3020_v25 = vadd.f32 %v6906_v59, %v3019_v37  ;;  %v3090_v48 = vadd.f32 %v6922_v16, %v3089_v55 }
 0x9bb   :  { %v5634_v9 = vpop.f32.mrf.mxu1  ;;  %v5645_v41 = vpop.f32.mrf.mxu0 }
 0x9bc   :  { %v3163_v61 = vadd.f32 %v3020_v25, %v2464_v7  ;;  %v3170_v38 = vadd.f32 %v3090_v48, %v2575_v13  ;;  %v2469_v25 = vadd.f32 %v6911_v52, %v6880_v47 }
 0x9be   :  { %v4860_v40 = vmul.f32 -1.442695, %v3163_v61  ;;  %v4861_v58 = vmul.f32 -1.442695, %v3170_v38 }
 0x9c0   :  { %5971 = vpow2.f32 %v4860_v40 }
 0x9c1   :  { %v3159_v45 = vpop.f32.mrf.mxu1  ;;  %5973 = vpow2.f32 %v4861_v58 }
 0x9c2   :  { %v3160_v46 = vadd.f32 %v6944_v0, %v3159_v45  ;;  %v2580_v45 = vadd.f32 %v6929_v18, %v6882_v11 }
 0x9c3   :  { %v5656_v63 = vpop.f32.mrf.mxu1 }
 0x9cd   :  { %v5972_v4 = vpop.eup %5971 }
 0x9ce   :  { %v3167_v49 = vadd.f32 1.0, %v5972_v4  ;;  %v5974_v30 = vpop.eup %5973 }
 0x9cf   :  { %v3174_v8 = vadd.f32 1.0, %v5974_v30 }
 0x9d0   :  { %5975 = vrcp.f32 %v3167_v49 }
 0x9d1   :  { %5977 = vrcp.f32 %v3174_v8 }
 0x9dd   :  { %v5976_v62 = vpop.eup %5975 }
 0x9de   :  { %v3177_v15 = vmul.f32 %v5976_v62, %v3160_v46  ;;  %v5978_v35 = vpop.eup %5977 }
 0x9df   :  { %v3180_v20 = vsub.f32 1.0, %v5978_v35  ;;  %v3182_v37 = vmul.f32 %v5978_v35, %v6948_v24 }
 0x9e0   :  { %v3178_v19 = vadd.f32 %v3177_v15, %v6914_v43 }
 0x9e2   :  { %5979 = vtanh.f32 %v3178_v19 }
 0x9ef   :  { %v5980_v21 = vpop.eup %5979 }
 0x9f0   :  { %v3181_v22 = vmul.f32 %v5980_v21, %v3180_v20 }
 0x9f2   :  { %v6995_v55 = vadd.f32 %v3182_v37, %v3181_v22 }
 0x9f4   :  { %5666 = vmatmul.mubr.msk.f32.vlgmr.msra.gmra.mxu0 %vm454_vm2, %v6995_v55  ;;  %5677 = vmatmul.mubr.msk.f32.vlgmr.msra.gmra.mxu1 %vm454_vm2, %v6995_v55 }
 0x9f5   :  { %5680 = vmatpush3.msra.mxu0 %v6789_v32  ;;  %5687 = vmatprep.mubr.msk.f32.mxu0 %vm6046_vm1, %v6045_v12 }
 0x9f6   :  { %5681 = vmatprep.subr.mxu0 %v6045_v12  ;;  %5691 = vmatpush3.msra.mxu1 %v6717_v3 }
 0x9f7   :  { %5682 = vmatpush3.msra.mxu0 %v6815_v34  ;;  %5692 = vmatprep.subr.mxu1 %v6045_v12 }
 0x9f8   :  { %5683 = vmatprep.subr.mxu0 %v6045_v12  ;;  %5693 = vmatpush3.msra.mxu1 %v6722_v36 }
 0x9f9   :  { %5684 = vmatpush3.msra.mxu0 %v6827_v31  ;;  %5694 = vmatprep.subr.mxu1 %v6045_v12 }
 0x9fa   :  { %5685 = vmatprep.subr.mxu0 %v6045_v12  ;;  %5695 = vmatpush3.msra.mxu1 %v6735_v56 }
 0x9fb   :  { %5686 = vmatpush3.msra.mxu0 %v6840_v51  ;;  %5696 = vmatprep.subr.mxu1 %v6045_v12 }
 0x9fc   :  { %5688 = vmatmul.mubr.msk.f32.vlgmr.msra.gmra.mxu0 %vm454_vm2, %v6995_v55  ;;  %5701 = vmatprep.subr.mxu0 %v6045_v12 }
 0x9fd   :  { %5702 = vmatpush3.msra.mxu0 %v6775_v5  ;;  %5697 = vmatpush3.msra.mxu1 %v6745_v33 }
 0x9fe   :  { %5703 = vmatprep.subr.mxu0 %v6045_v12  ;;  %5698 = vmatprep.mubr.msk.f32.mxu1 %vm6046_vm1, %v6045_v12 }
 0x9ff   :  { %5704 = vmatpush3.msra.mxu0 %v6784_v60  ;;  %5709 = vmatprep.mubr.msk.f32.mxu0 %vm6046_vm1, %v6045_v12 }
 0xa00   :  { %5705 = vmatprep.subr.mxu0 %v6045_v12  ;;  %5712 = vmatprep.subr.mxu1 %v6045_v12 }
 0xa01   :  { %5706 = vmatpush3.msra.mxu0 %v6798_v14 }
 0xa02   :  { %5707 = vmatprep.subr.mxu0 %v6045_v12 }
 0xa03   :  { %5708 = vmatpush3.msra.mxu0 %v6810_v50 }
 0xa04   :  { %5723 = vmatprep.subr.mxu0 %v6045_v12 }
 0xab4   :  { %v3253_v43 = vpop.f32.mrf.mxu0  ;;  %v3323_v7 = vpop.f32.mrf.mxu1 }
 0xab5   :  { %v3254_v9 = vadd.f32 %v6906_v59, %v3253_v43  ;;  %v3324_v13 = vadd.f32 %v6922_v16, %v3323_v7  ;;  %v2474_v7 = vadd.f32 %v6876_v44, %v6911_v52 }
 0xab6   :  { %v5667_v41 = vpop.f32.mrf.mxu0  ;;  %v5678_v61 = vpop.f32.mrf.mxu1 }
 0xab7   :  { %v3397_v40 = vadd.f32 %v3254_v9, %v2469_v25  ;;  %v3404_v63 = vadd.f32 %v3324_v13, %v2580_v45  ;;  %v2585_v13 = vadd.f32 %v6878_v2, %v6929_v18 }
 0xab9   :  { %v4865_v48 = vmul.f32 -1.442695, %v3397_v40  ;;  %v4866_v4 = vmul.f32 -1.442695, %v3404_v63 }
 0xabb   :  { %5981 = vpow2.f32 %v4865_v48 }
 0xabc   :  { %v3393_v38 = vpop.f32.mrf.mxu0  ;;  %5983 = vpow2.f32 %v4866_v4 }
 0xabd   :  { %v3394_v46 = vadd.f32 %v6944_v0, %v3393_v38 }
 0xabe   :  { %v5689_v58 = vpop.f32.mrf.mxu0 }
 0xac8   :  { %v5982_v49 = vpop.eup %5981 }
 0xac9   :  { %v3401_v30 = vadd.f32 1.0, %v5982_v49  ;;  %v5984_v47 = vpop.eup %5983 }
 0xaca   :  { %v3408_v8 = vadd.f32 1.0, %v5984_v47 }
 0xacb   :  { %5985 = vrcp.f32 %v3401_v30 }
 0xacc   :  { %5987 = vrcp.f32 %v3408_v8 }
 0xad8   :  { %v5986_v62 = vpop.eup %5985 }
 0xad9   :  { %v3411_v15 = vmul.f32 %v5986_v62, %v3394_v46  ;;  %v5988_v11 = vpop.eup %5987 }
 0xada   :  { %v3414_v35 = vsub.f32 1.0, %v5988_v11  ;;  %v3416_v22 = vmul.f32 %v5988_v11, %v6995_v55 }
 0xadb   :  { %v3412_v19 = vadd.f32 %v3411_v15, %v6924_v17 }
 0xadd   :  { %5989 = vtanh.f32 %v3412_v19 }
 0xaea   :  { %v5990_v20 = vpop.eup %5989 }
 0xaeb   :  { %v3415_v21 = vmul.f32 %v5990_v20, %v3414_v35 }
 0xaed   :  { %v7042_v37 = vadd.f32 %v3416_v22, %v3415_v21  ;;  %v2479_v22 = vadd.f32 %v6911_v52, %v6888_v29 }
 0xaef   :  { %5699 = vmatmul.mubr.msk.f32.vlgmr.msra.gmra.mxu1 %vm454_vm2, %v7042_v37  ;;  %5710 = vmatmul.mubr.msk.f32.vlgmr.msra.gmra.mxu0 %vm454_vm2, %v7042_v37 }
 0xaf0   :  { %5713 = vmatpush3.msra.mxu1 %v6789_v32  ;;  %5720 = vmatprep.mubr.msk.f32.mxu1 %vm6046_vm1, %v6045_v12 }
 0xaf1   :  { %5714 = vmatprep.subr.mxu1 %v6045_v12  ;;  %5724 = vmatpush3.msra.mxu0 %v6717_v3 }
 0xaf2   :  { %5715 = vmatpush3.msra.mxu1 %v6815_v34  ;;  %5725 = vmatprep.subr.mxu0 %v6045_v12 }
 0xaf3   :  { %5716 = vmatprep.subr.mxu1 %v6045_v12  ;;  %5726 = vmatpush3.msra.mxu0 %v6722_v36 }
 0xaf4   :  { %5717 = vmatpush3.msra.mxu1 %v6827_v31  ;;  %5727 = vmatprep.subr.mxu0 %v6045_v12 }
 0xaf5   :  { %5718 = vmatprep.subr.mxu1 %v6045_v12  ;;  %5728 = vmatpush3.msra.mxu0 %v6735_v56 }
 0xaf6   :  { %5719 = vmatpush3.msra.mxu1 %v6840_v51  ;;  %5729 = vmatprep.subr.mxu0 %v6045_v12 }
 0xaf7   :  { %5721 = vmatmul.mubr.msk.f32.vlgmr.msra.gmra.mxu1 %vm454_vm2, %v7042_v37  ;;  %5734 = vmatprep.subr.mxu1 %v6045_v12 }
 0xaf8   :  { %5735 = vmatpush3.msra.mxu1 %v6775_v5  ;;  %5730 = vmatpush3.msra.mxu0 %v6745_v33 }
 0xaf9   :  { %5736 = vmatprep.subr.mxu1 %v6045_v12  ;;  %5731 = vmatprep.mubr.msk.f32.mxu0 %vm6046_vm1, %v6045_v12 }
 0xafa   :  { %5737 = vmatpush3.msra.mxu1 %v6784_v60  ;;  %5742 = vmatprep.mubr.msk.f32.mxu1 %vm6046_vm1, %v6045_v12 }
 0xafb   :  { %5738 = vmatprep.subr.mxu1 %v6045_v12  ;;  %5745 = vmatprep.subr.mxu0 %v6045_v12 }
 0xafc   :  { %5739 = vmatpush3.msra.mxu1 %v6798_v14 }
 0xafd   :  { %5740 = vmatprep.subr.mxu1 %v6045_v12 }
 0xafe   :  { %5741 = vmatpush3.msra.mxu1 %v6810_v50 }
 0xaff   :  { %5756 = vmatprep.subr.mxu1 %v6045_v12 }
 0xbaf   :  { %v3487_v17 = vpop.f32.mrf.mxu1  ;;  %v3557_v43 = vpop.f32.mrf.mxu0 }
 0xbb0   :  { %v3488_v25 = vadd.f32 %v6906_v59, %v3487_v17  ;;  %v3558_v48 = vadd.f32 %v6922_v16, %v3557_v43 }
 0xbb1   :  { %v5700_v9 = vpop.f32.mrf.mxu1  ;;  %v5711_v41 = vpop.f32.mrf.mxu0 }
 0xbb2   :  { %v3631_v61 = vadd.f32 %v3488_v25, %v2474_v7  ;;  %v3638_v38 = vadd.f32 %v3558_v48, %v2585_v13 }
 0xbb4   :  { %v4870_v40 = vmul.f32 -1.442695, %v3631_v61  ;;  %v4871_v58 = vmul.f32 -1.442695, %v3638_v38  ;;  %v2590_v61 = vadd.f32 %v6929_v18, %v6890_v10 }
 0xbb6   :  { %5991 = vpow2.f32 %v4870_v40 }
 0xbb7   :  { %v3627_v45 = vpop.f32.mrf.mxu1  ;;  %5993 = vpow2.f32 %v4871_v58 }
 0xbb8   :  { %v3628_v47 = vadd.f32 %v6944_v0, %v3627_v45 }
 0xbb9   :  { %v5722_v63 = vpop.f32.mrf.mxu1 }
 0xbc3   :  { %v5992_v4 = vpop.eup %5991 }
 0xbc4   :  { %v3635_v49 = vadd.f32 1.0, %v5992_v4  ;;  %v5994_v44 = vpop.eup %5993 }
 0xbc5   :  { %v3642_v30 = vadd.f32 1.0, %v5994_v44 }
 0xbc6   :  { %5995 = vrcp.f32 %v3635_v49 }
 0xbc7   :  { %5997 = vrcp.f32 %v3642_v30 }
 0xbd3   :  { %v5996_v8 = vpop.eup %5995 }
 0xbd4   :  { %v3645_v46 = vmul.f32 %v5996_v8, %v3628_v47  ;;  %v5998_v2 = vpop.eup %5997 }
 0xbd5   :  { %v3648_v15 = vsub.f32 1.0, %v5998_v2  ;;  %v3650_v35 = vmul.f32 %v5998_v2, %v7042_v37 }
 0xbd6   :  { %v3646_v62 = vadd.f32 %v3645_v46, %v6917_v28 }
 0xbd8   :  { %5999 = vtanh.f32 %v3646_v62 }
 0xbe5   :  { %v6000_v19 = vpop.eup %5999 }
 0xbe6   :  { %v3649_v11 = vmul.f32 %v6000_v19, %v3648_v15  ;;  %v2484_v19 = vadd.f32 %v6884_v1, %v6911_v52 }
 0xbe8   :  { %v7089_v20 = vadd.f32 %v3650_v35, %v3649_v11 }
 0xbea   :  { %5732 = vmatmul.mubr.msk.f32.vlgmr.msra.gmra.mxu0 %vm454_vm2, %v7089_v20  ;;  %5743 = vmatmul.mubr.msk.f32.vlgmr.msra.gmra.mxu1 %vm454_vm2, %v7089_v20 }
 0xbeb   :  { %5746 = vmatpush3.msra.mxu0 %v6789_v32  ;;  %5753 = vmatprep.mubr.msk.f32.mxu0 %vm6046_vm1, %v6045_v12 }
 0xbec   :  { %5747 = vmatprep.subr.mxu0 %v6045_v12  ;;  %5757 = vmatpush3.msra.mxu1 %v6717_v3 }
 0xbed   :  { %5748 = vmatpush3.msra.mxu0 %v6815_v34  ;;  %5758 = vmatprep.subr.mxu1 %v6045_v12 }
 0xbee   :  { %5749 = vmatprep.subr.mxu0 %v6045_v12  ;;  %5759 = vmatpush3.msra.mxu1 %v6722_v36 }
 0xbef   :  { %5750 = vmatpush3.msra.mxu0 %v6827_v31  ;;  %5760 = vmatprep.subr.mxu1 %v6045_v12 }
 0xbf0   :  { %5751 = vmatprep.subr.mxu0 %v6045_v12  ;;  %5761 = vmatpush3.msra.mxu1 %v6735_v56 }
 0xbf1   :  { %5752 = vmatpush3.msra.mxu0 %v6840_v51  ;;  %5762 = vmatprep.subr.mxu1 %v6045_v12 }
 0xbf2   :  { %5754 = vmatmul.mubr.msk.f32.vlgmr.msra.gmra.mxu0 %vm454_vm2, %v7089_v20  ;;  %5767 = vmatprep.subr.mxu0 %v6045_v12 }
 0xbf3   :  { %5768 = vmatpush3.msra.mxu0 %v6775_v5  ;;  %5763 = vmatpush3.msra.mxu1 %v6745_v33 }
 0xbf4   :  { %5769 = vmatprep.subr.mxu0 %v6045_v12  ;;  %5764 = vmatprep.mubr.msk.f32.mxu1 %vm6046_vm1, %v6045_v12 }
 0xbf5   :  { %5770 = vmatpush3.msra.mxu0 %v6784_v60  ;;  %5775 = vmatprep.mubr.msk.f32.mxu0 %vm6046_vm1, %v6045_v12 }
 0xbf6   :  { %5771 = vmatprep.subr.mxu0 %v6045_v12  ;;  %5778 = vmatprep.subr.mxu1 %v6045_v12 }
 0xbf7   :  { %5772 = vmatpush3.msra.mxu0 %v6798_v14 }
 0xbf8   :  { %5773 = vmatprep.subr.mxu0 %v6045_v12 }
 0xbf9   :  { %5774 = vmatpush3.msra.mxu0 %v6810_v50 }
 0xbfa   :  { %5789 = vmatprep.subr.mxu0 %v6045_v12 }
 0xcaa   :  { %v3721_v28 = vpop.f32.mrf.mxu0  ;;  %v3791_v21 = vpop.f32.mrf.mxu1 }
 0xcab   :  { %v3722_v17 = vadd.f32 %v6906_v59, %v3721_v28  ;;  %v3792_v41 = vadd.f32 %v6922_v16, %v3791_v21 }
 0xcac   :  { %v5733_v43 = vpop.f32.mrf.mxu0  ;;  %v5744_v7 = vpop.f32.mrf.mxu1 }
 0xcad   :  { %v3865_v25 = vadd.f32 %v3722_v17, %v2479_v22  ;;  %v3872_v48 = vadd.f32 %v3792_v41, %v2590_v61  ;;  %v2595_v43 = vadd.f32 %v6886_v53, %v6929_v18 }
 0xcaf   :  { %v4875_v9 = vmul.f32 -1.442695, %v3865_v25  ;;  %v4876_v45 = vmul.f32 -1.442695, %v3872_v48 }
 0xcb1   :  { %6001 = vpow2.f32 %v4875_v9 }
 0xcb2   :  { %v3861_v40 = vpop.f32.mrf.mxu0  ;;  %6003 = vpow2.f32 %v4876_v45 }
 0xcb3   :  { %v3862_v4 = vadd.f32 %v6944_v0, %v3861_v40 }
 0xcb4   :  { %v5755_v13 = vpop.f32.mrf.mxu0 }
 0xcbe   :  { %v6002_v38 = vpop.eup %6001 }
 0xcbf   :  { %v3869_v63 = vadd.f32 1.0, %v6002_v38  ;;  %v6004_v29 = vpop.eup %6003 }
 0xcc0   :  { %v3876_v58 = vadd.f32 1.0, %v6004_v29 }
 0xcc1   :  { %6005 = vrcp.f32 %v3869_v63 }
 0xcc2   :  { %6007 = vrcp.f32 %v3876_v58 }
 0xcce   :  { %v6006_v49 = vpop.eup %6005 }
 0xccf   :  { %v3879_v44 = vmul.f32 %v6006_v49, %v3862_v4  ;;  %v6008_v10 = vpop.eup %6007 }
 0xcd0   :  { %v3882_v47 = vsub.f32 1.0, %v6008_v10  ;;  %v3884_v62 = vmul.f32 %v6008_v10, %v7089_v20 }
 0xcd1   :  { %v3880_v30 = vadd.f32 %v3879_v44, %v6935_v26 }
 0xcd3   :  { %6009 = vtanh.f32 %v3880_v30 }
 0xce0   :  { %v6010_v8 = vpop.eup %6009 }
 0xce1   :  { %v3883_v46 = vmul.f32 %v6010_v8, %v3882_v47 }
 0xce3   :  { %v7136_v2 = vadd.f32 %v3884_v62, %v3883_v46 }
 0xce5   :  { %5765 = vmatmul.mubr.msk.f32.vlgmr.msra.gmra.mxu1 %vm454_vm2, %v7136_v2  ;;  %5776 = vmatmul.mubr.msk.f32.vlgmr.msra.gmra.mxu0 %vm454_vm2, %v7136_v2 }
 0xce6   :  { %5779 = vmatpush3.msra.mxu1 %v6789_v32  ;;  %5786 = vmatprep.mubr.msk.f32.mxu1 %vm6046_vm1, %v6045_v12 }
 0xce7   :  { %5780 = vmatprep.subr.mxu1 %v6045_v12  ;;  %5790 = vmatpush3.msra.mxu0 %v6717_v3 }
 0xce8   :  { %5781 = vmatpush3.msra.mxu1 %v6815_v34  ;;  %5791 = vmatprep.subr.mxu0 %v6045_v12 }
 0xce9   :  { %5782 = vmatprep.subr.mxu1 %v6045_v12  ;;  %5792 = vmatpush3.msra.mxu0 %v6722_v36 }
 0xcea   :  { %5783 = vmatpush3.msra.mxu1 %v6827_v31  ;;  %5793 = vmatprep.subr.mxu0 %v6045_v12 }
 0xceb   :  { %5784 = vmatprep.subr.mxu1 %v6045_v12  ;;  %5794 = vmatpush3.msra.mxu0 %v6735_v56 }
 0xcec   :  { %5785 = vmatpush3.msra.mxu1 %v6840_v51  ;;  %5795 = vmatprep.subr.mxu0 %v6045_v12 }
 0xced   :  { %5787 = vmatmul.mubr.msk.f32.vlgmr.msra.gmra.mxu1 %vm454_vm2, %v7136_v2  ;;  %5800 = vmatprep.subr.mxu1 %v6045_v12 }
 0xcee   :  { %5801 = vmatpush3.msra.mxu1 %v6775_v5  ;;  %5796 = vmatpush3.msra.mxu0 %v6745_v33 }
 0xcef   :  { %5802 = vmatprep.subr.mxu1 %v6045_v12  ;;  %5797 = vmatprep.mubr.msk.f32.mxu0 %vm6046_vm1, %v6045_v12 }
 0xcf0   :  { %5803 = vmatpush3.msra.mxu1 %v6784_v60  ;;  %5808 = vmatprep.mubr.msk.f32.mxu1 %vm6046_vm1, %v6045_v12 }
 0xcf1   :  { %5804 = vmatprep.subr.mxu1 %v6045_v12  ;;  %5811 = vmatprep.subr.mxu0 %v6045_v12 }
 0xcf2   :  { %5805 = vmatpush3.msra.mxu1 %v6798_v14 }
 0xcf3   :  { %5806 = vmatprep.subr.mxu1 %v6045_v12 }
 0xcf4   :  { %5807 = vmatpush3.msra.mxu1 %v6810_v50 }
 0xcf5   :  { %5822 = vmatprep.subr.mxu1 %v6045_v12 }
 0xda5   :  { %v3955_v26 = vpop.f32.mrf.mxu1  ;;  %v4025_v15 = vpop.f32.mrf.mxu0 }
 0xda6   :  { %v3956_v11 = vadd.f32 %v6906_v59, %v3955_v26  ;;  %v4026_v17 = vadd.f32 %v6922_v16, %v4025_v15 }
 0xda7   :  { %v5766_v35 = vpop.f32.mrf.mxu1  ;;  %v5777_v28 = vpop.f32.mrf.mxu0 }
 0xda8   :  { %v4099_v21 = vadd.f32 %v3956_v11, %v2484_v19  ;;  %v4106_v25 = vadd.f32 %v4026_v17, %v2595_v43 }
 0xdaa   :  { %v4880_v22 = vmul.f32 -1.442695, %v4099_v21  ;;  %v4881_v41 = vmul.f32 -1.442695, %v4106_v25 }
 0xdac   :  { %6011 = vpow2.f32 %v4880_v22 }
 0xdad   :  { %v4095_v7 = vpop.f32.mrf.mxu1  ;;  %6013 = vpow2.f32 %v4881_v41 }
 0xdae   :  { %v4096_v13 = vadd.f32 %v6944_v0, %v4095_v7 }
 0xdaf   :  { %v5788_v9 = vpop.f32.mrf.mxu1 }
 0xdb0   :  { %v4590_v9 = vld [vmem:[%s7326_s9 + $0x10] sm:$0xff] }
 0xdb9   :  { %v6012_v61 = vpop.eup %6011 }
 0xdba   :  { %v4103_v40 = vadd.f32 1.0, %v6012_v61  ;;  %v6014_v1 = vpop.eup %6013  ;;  %v4892_v61 = vld [vmem:[%s7327_s10] ss:$0 sm:$0xff] }
 0xdbb   :  { %v4110_v48 = vadd.f32 1.0, %v6014_v1 }
 0xdbc   :  { %6015 = vrcp.f32 %v4103_v40 }
 0xdbd   :  { %6017 = vrcp.f32 %v4110_v48 }
 0xdc9   :  { %v6016_v45 = vpop.eup %6015 }
 0xdca   :  { %v4113_v38 = vmul.f32 %v6016_v45, %v4096_v13  ;;  %v6018_v53 = vpop.eup %6017 }
 0xdcb   :  { %v4116_v29 = vsub.f32 1.0, %v6018_v53  ;;  %v4118_v49 = vmul.f32 %v6018_v53, %v7136_v2 }
 0xdcc   :  { %v4114_v63 = vadd.f32 %v4113_v38, %v6933_v23 }
 0xdce   :  { %6019 = vtanh.f32 %v4114_v63 }
 0xddb   :  { %v6020_v58 = vpop.eup %6019 }
 0xddc   :  { %v4117_v4 = vmul.f32 %v6020_v58, %v4116_v29 }
 0xdde   :  { %v7183_v44 = vadd.f32 %v4118_v49, %v4117_v4 }
 0xde0   :  { %5798 = vmatmul.mubr.msk.f32.vlgmr.msra.gmra.mxu0 %vm454_vm2, %v7183_v44  ;;  %5809 = vmatmul.mubr.msk.f32.vlgmr.msra.gmra.mxu1 %vm454_vm2, %v7183_v44 }
 0xde1   :  { %5812 = vmatpush3.msra.mxu0 %v6789_v32  ;;  %5819 = vmatprep.mubr.msk.f32.mxu0 %vm6046_vm1, %v6045_v12 }
 0xde2   :  { %5813 = vmatprep.subr.mxu0 %v6045_v12  ;;  %5823 = vmatpush3.msra.mxu1 %v6717_v3  ;;  %v4591_v3 = vld [vmem:[%s7326_s9 + $0x18] sm:$0xff] }
 0xde3   :  { %5814 = vmatpush3.msra.mxu0 %v6815_v34  ;;  %5824 = vmatprep.subr.mxu1 %v6045_v12 }
 0xde4   :  { %5815 = vmatprep.subr.mxu0 %v6045_v12  ;;  %5825 = vmatpush3.msra.mxu1 %v6722_v36 }
 0xde5   :  { %5816 = vmatpush3.msra.mxu0 %v6827_v31  ;;  %5826 = vmatprep.subr.mxu1 %v6045_v12 }
 0xde6   :  { %5817 = vmatprep.subr.mxu0 %v6045_v12  ;;  %5827 = vmatpush3.msra.mxu1 %v6735_v56 }
 0xde7   :  { %5818 = vmatpush3.msra.mxu0 %v6840_v51  ;;  %5828 = vmatprep.subr.mxu1 %v6045_v12 }
 0xde8   :  { %5820 = vmatmul.mubr.msk.f32.vlgmr.msra.gmra.mxu0 %vm454_vm2, %v7183_v44  ;;  %5833 = vmatprep.subr.mxu0 %v6045_v12 }
 0xde9   :  { %5834 = vmatpush3.msra.mxu0 %v6775_v5  ;;  %5829 = vmatpush3.msra.mxu1 %v6745_v33  ;;  %v2489_v33 = vadd.f32 %v6911_v52, %v6896_v27 }
 0xdea   :  { %5835 = vmatprep.subr.mxu0 %v6045_v12  ;;  %5830 = vmatprep.mubr.msk.f32.mxu1 %vm6046_vm1, %v6045_v12 }
 0xdeb   :  { %5836 = vmatpush3.msra.mxu0 %v6784_v60  ;;  %5841 = vmatprep.mubr.msk.f32.mxu0 %vm6046_vm1, %v6045_v12 }
 0xdec   :  { %5837 = vmatprep.subr.mxu0 %v6045_v12  ;;  %5844 = vmatprep.subr.mxu1 %v6045_v12 }
 0xded   :  { %5838 = vmatpush3.msra.mxu0 %v6798_v14 }
 0xdee   :  { %5839 = vmatprep.subr.mxu0 %v6045_v12 }
 0xdef   :  { %5840 = vmatpush3.msra.mxu0 %v6810_v50  ;;  %v2600_v50 = vadd.f32 %v6929_v18, %v6898_v39 }
 0xdf0   :  { %5855 = vmatprep.subr.mxu0 %v4591_v3 }
 0xea0   :  { %v4189_v36 = vpop.f32.mrf.mxu0  ;;  %v4259_v56 = vpop.f32.mrf.mxu1 }
 0xea1   :  { %v4190_v5 = vadd.f32 %v6906_v59, %v4189_v36  ;;  %v4260_v10 = vadd.f32 %v6922_v16, %v4259_v56 }
 0xea2   :  { %v5799_v60 = vpop.f32.mrf.mxu0  ;;  %v5810_v23 = vpop.f32.mrf.mxu1 }
 0xea3   :  { %v4333_v30 = vadd.f32 %v4190_v5, %v2489_v33  ;;  %v4340_v8 = vadd.f32 %v4260_v10, %v2600_v50 }
 0xea5   :  { %v4885_v14 = vmul.f32 -1.442695, %v4333_v30  ;;  %v4886_v62 = vmul.f32 -1.442695, %v4340_v8 }
 0xea7   :  { %6021 = vpow2.f32 %v4885_v14 }
 0xea8   :  { %v4329_v47 = vpop.f32.mrf.mxu0  ;;  %6023 = vpow2.f32 %v4886_v62 }
 0xea9   :  { %v4330_v11 = vadd.f32 %v6944_v0, %v4329_v47 }
 0xeaa   :  { %v5821_v46 = vpop.f32.mrf.mxu0 }
 0xeb4   :  { %v6022_v26 = vpop.eup %6021 }
 0xeb5   :  { %v4337_v15 = vadd.f32 1.0, %v6022_v26  ;;  %v6024_v27 = vpop.eup %6023 }
 0xeb6   :  { %v4344_v19 = vadd.f32 1.0, %v6024_v27 }
 0xeb7   :  { %6025 = vrcp.f32 %v4337_v15 }
 0xeb8   :  { %6027 = vrcp.f32 %v4344_v19 }
 0xec4   :  { %v6026_v35 = vpop.eup %6025 }
 0xec5   :  { %v4347_v28 = vmul.f32 %v6026_v35, %v4330_v11  ;;  %v6028_v39 = vpop.eup %6027 }
 0xec6   :  { %v4350_v22 = vsub.f32 1.0, %v6028_v39  ;;  %v4352_v7 = vmul.f32 %v6028_v39, %v7183_v44 }
 0xec7   :  { %v4348_v21 = vadd.f32 %v4347_v28, %v6939_v6  ;;  %v4589_v6 = vld [vmem:[%s7326_s9 + $0x8] sm:$0xff] }
 0xec9   :  { %6029 = vtanh.f32 %v4348_v21 }
 0xed6   :  { %v6030_v17 = vpop.eup %6029 }
 0xed7   :  { %v4351_v43 = vmul.f32 %v6030_v17, %v4350_v22 }
 0xed9   :  { %v7232_v25 = vadd.f32 %v4352_v7, %v4351_v43 }
 0xedb   :  { %5831 = vmatmul.mubr.msk.f32.vlgmr.msra.gmra.mxu1 %vm454_vm2, %v7232_v25  ;;  %5842 = vmatmul.mubr.msk.f32.vlgmr.msra.gmra.mxu0 %vm454_vm2, %v7232_v25 }
 0xedc   :  { %5845 = vmatpush3.msra.mxu1 %v6789_v32  ;;  %5856 = vmatpush3.msra.mxu0 %v4591_v3  ;;  %v4588_v32 = vld [vmem:[%s7326_s9] sm:$0xff] }
 0xedd   :  { %5846 = vmatprep.subr.mxu1 %v6045_v12  ;;  %5857 = vmatprep.subr.mxu0 %v4590_v9 }
 0xede   :  { %5863 = vmatprep.mubr.msk.f32.mxu0 %vm454_vm2, %v6948_v24  ;;  %5847 = vmatpush3.msra.mxu1 %v6815_v34 }
 0xedf   :  { %5858 = vmatpush3.msra.mxu0 %v4590_v9  ;;  %5848 = vmatprep.subr.mxu1 %v6045_v12 }
 0xee0   :  { %5859 = vmatprep.subr.mxu0 %v4589_v6  ;;  %5849 = vmatpush3.msra.mxu1 %v6827_v31  ;;  %v2494_v31 = vadd.f32 %v6892_v54, %v6911_v52 }
 0xee1   :  { %5860 = vmatpush3.msra.mxu0 %v4589_v6  ;;  %5850 = vmatprep.subr.mxu1 %v6045_v12 }
 0xee2   :  { %5861 = vmatprep.subr.mxu0 %v4588_v32  ;;  %5851 = vmatpush3.msra.mxu1 %v6840_v51 }
 0xee3   :  { %5852 = vmatprep.mubr.msk.f32.mxu1 %vm6046_vm1, %v6045_v12  ;;  %5862 = vmatpush3.msra.mxu0 %v4588_v32 }
 0xee4   :  { %5853 = vmatmul.mubr.msk.f32.vlgmr.msra.gmra.mxu1 %vm454_vm2, %v7232_v25  ;;  %5864 = vmatmul.mubr.msk.f32.vlgmr.msra.gmra.mxu0 %vm454_vm2, %v6995_v55 }
 0xee5   :  { %5866 = vmatprep.mubr.msk.f32.mxu0 %vm454_vm2, %v7042_v37 }
 0xee8   :  { %5867 = vmatmul.mubr.msk.f32.gmra.mxu0 %vm454_vm2, %v7089_v20 }
 0xee9   :  { %5869 = vmatprep.mubr.msk.f32.mxu0 %vm454_vm2, %v7136_v2  ;;  %v2605_v2 = vadd.f32 %v6894_v57, %v6929_v18 }
 0xeec   :  { %5870 = vmatmul.mubr.msk.f32.gmra.mxu0 %vm454_vm2, %v7183_v44 }
 0xeed   :  { %5872 = vmatprep.mubr.msk.f32.mxu0 %vm454_vm2, %v7232_v25 }
 0xf9b   :  { %v4423_v12 = vpop.f32.mrf.mxu1  ;;  %v4493_v34 = vpop.f32.mrf.mxu0 }
 0xf9c   :  { %v4424_v51 = vadd.f32 %v6906_v59, %v4423_v12  ;;  %v4494_v41 = vadd.f32 %v6922_v16, %v4493_v34 }
 0xf9d   :  { %v5832_v24 = vpop.f32.mrf.mxu1  ;;  %v5843_v55 = vpop.f32.mrf.mxu0 }
 0xf9e   :  { %v4567_v37 = vadd.f32 %v4424_v51, %v2494_v31  ;;  %v4574_v40 = vadd.f32 %v4494_v41, %v2605_v2 }
 0xfa0   :  { %v4890_v20 = vmul.f32 -1.442695, %v4567_v37  ;;  %v4891_v13 = vmul.f32 -1.442695, %v4574_v40 }
 0xfa2   :  { %6031 = vpow2.f32 %v4890_v20 }
 0xfa3   :  { %6033 = vpow2.f32 %v4891_v13 }
 0xfa4   :  { %v4563_v1 = vpop.f32.mrf.mxu1  ;;  %v5865_v48 = vpop.f32.mrf.mxu0 }
 0xfa5   :  { %v4674_v54 = vadd.f32 %v5865_v48, %v4892_v61  ;;  %v4564_v36 = vadd.f32 %v6944_v0, %v4563_v1 }
 0xfa6   :  { %v5854_v52 = vpop.f32.mrf.mxu1  ;;  %v4668_v59 = vpop.f32.mrf.mxu0 }
 0xfa7   :  { %4708 = vst.msk [vmem:[%s7328_s11 + $0x8] sm:$0xff] %vm102_vm0, %v4674_v54  ;;  %v4669_v16 = vadd.f32 %v4892_v61, %v4668_v59 }
 0xfa8   :  { %v5868_v45 = vpop.f32.mrf.mxu0 }
 0xfa9   :  { %4707 = vst.msk [vmem:[%s7328_s11] sm:$0xff] %vm102_vm0, %v4669_v16  ;;  %v4684_v57 = vadd.f32 %v5868_v45, %v4892_v61 }
 0xfaa   :  { %v4678_v18 = vpop.f32.mrf.mxu0 }
 0xfab   :  { %4710 = vst.msk [vmem:[%s7328_s11 + $0x18] sm:$0xff] %vm102_vm0, %v4684_v57  ;;  %v4679_v38 = vadd.f32 %v4892_v61, %v4678_v18 }
 0xfac   :  { %v5871_v63 = vpop.f32.mrf.mxu0 }
 0xfad   :  { %4709 = vst.msk [vmem:[%s7328_s11 + $0x10] sm:$0xff] %vm102_vm0, %v4679_v38  ;;  %v4694_v53 = vadd.f32 %v5871_v63, %v4892_v61 }
 0xfae   :  { %v4688_v29 = vpop.f32.mrf.mxu0 }
 0xfaf   :  { %v6032_v58 = vpop.eup %6031  ;;  %4712 = vst.msk [vmem:[%s7328_s11 + $0x28] sm:$0xff] %vm102_vm0, %v4694_v53  ;;  %v4689_v4 = vadd.f32 %v4892_v61, %v4688_v29 }
 0xfb0   :  { %v4571_v49 = vadd.f32 1.0, %v6032_v58  ;;  %v6034_v44 = vpop.eup %6033 }
 0xfb1   :  { %4711 = vst.msk [vmem:[%s7328_s11 + $0x20] sm:$0xff] %vm102_vm0, %v4689_v4  ;;  %v4578_v3 = vadd.f32 1.0, %v6034_v44 }
 0xfb2   :  { %6035 = vrcp.f32 %v4571_v49 }
 0xfb3   :  { %6037 = vrcp.f32 %v4578_v3 }
 0xfbf   :  { %v6036_v56 = vpop.eup %6035 }
 0xfc0   :  { %v4581_v33 = vmul.f32 %v6036_v56, %v4564_v36  ;;  %v6038_v60 = vpop.eup %6037 }
 0xfc1   :  { %v4584_v23 = vsub.f32 1.0, %v6038_v60  ;;  %v4586_v10 = vmul.f32 %v6038_v60, %v7232_v25 }
 0xfc2   :  { %v4582_v5 = vadd.f32 %v4581_v33, %v6937_v42 }
 0xfc4   :  { %6039 = vtanh.f32 %v4582_v5 }
 0xfd1   :  { %v6040_v30 = vpop.eup %6039 }
 0xfd2   :  { %v4585_v14 = vmul.f32 %v6040_v30, %v4584_v23 }
 0xfd4   :  { %v4587_v50 = vadd.f32 %v4586_v10, %v4585_v14 }
 0xfd6   :  { %5873 = vmatmul.mubr.msk.f32.gmra.mxu0 %vm454_vm2, %v4587_v50 }
0x1096   :  { %v5874_v47 = vpop.f32.mrf.mxu0 }
0x1097   :  { %v4704_v8 = vadd.f32 %v5874_v47, %v4892_v61 }
0x1098   :  { %v4698_v46 = vpop.f32.mrf.mxu0 }
0x1099   :  { %4714 = vst.msk [vmem:[%s7328_s11 + $0x38] sm:$0xff] %vm102_vm0, %v4704_v8  ;;  %v4699_v0 = vadd.f32 %v4892_v61, %v4698_v46 }
0x109b   :  { %4713 = vst.msk [vmem:[%s7328_s11 + $0x30] sm:$0xff] %vm102_vm0, %v4699_v0 }

</bundles_post_ra>
